<compile_context>
chip_gen: v7x
topology: tpu7x:2x2x1
jax: 0.10.0
libtpu: 0.0.40
codegen_flags: <defaults>
</compile_context>

<pallas_src>
import numpy as np
import jax
import jax.numpy as jnp
from jax import lax
from jax.experimental import pallas as pl
from jax.experimental.pallas import tpu as pltpu

EPS = 1e-5                    # nn.BatchNorm2d default eps
LEAKY_SLOPE = 0.2             # nn.LeakyReLU(0.2)
SPADE_HIDDEN = 32             # SPADE nhidden (repo default)
MATMUL_DTYPE = jnp.bfloat16   # MXU-native conv operand dtype; accumulation is f32
# Modest scoped-VMEM request: actual footprint here is <1 MiB.  Do NOT request
# the full per-TC VMEM (64 MiB on v7x).
VMEM_LIMIT_BYTES = 16 * 1024 * 1024


# ----------------------------------------------------------------------------
# Static 3x3 tap plan for the (C, N*H*W) pixels-on-lanes layout.
# ----------------------------------------------------------------------------
def _tap_offsets(W):
    """Flattened-pixel offsets of the 9 taps, tap = (dy+1)*3 + (dx+1)."""
    return tuple(dy * W + dx for dy in (-1, 0, 1) for dx in (-1, 0, 1))


def _tap_masks(N, H, W):
    """(9, N*H*W) f32 multiplicative validity masks for a 3x3 / pad=1 conv over
    a channels-on-sublanes / pixels-on-lanes layout with the batch collapsed
    into the lane dim.  Computed with numpy at trace time (fully static); also
    zeroes cross-image bleed introduced by lane rolls over N*H*W."""
    HW = H * W
    q = np.arange(N * HW) % HW
    row, col = q // W, q % W
    out = np.empty((9, N * HW), np.float32)
    t = 0
    for dy in (-1, 0, 1):
        for dx in (-1, 0, 1):
            valid = (row + dy >= 0) & (row + dy < H) & \
                    (col + dx >= 0) & (col + dx < W)
            out[t] = valid.astype(np.float32)
            t += 1
    return out


def _stacked_taps(x, masks_ref, offsets):
    """im2col for 3x3/pad=1: 9 lane-rolled, boundary-masked copies of
    x:(Cin, L) stacked along the contraction axis -> one (9*Cin, L) bf16 MXU
    operand (single matmul per conv instead of 9)."""
    L = x.shape[-1]
    taps = []
    for tap, off in enumerate(offsets):
        if off == 0:
            t = x                                        # center tap: mask is all-ones
        else:
            t = pltpu.roll(x, shift=(-off) % L, axis=1)
            t = t * masks_ref[tap:tap + 1, :]            # (1, L) broadcast over channels
        taps.append(t.astype(MATMUL_DTYPE))
    return jnp.concatenate(taps, axis=0)                 # (9*Cin, L)


# ----------------------------------------------------------------------------
# Kernel 1: SPADE1 (shared conv + ReLU, fused gamma/beta conv) + normalize /
# modulate + LeakyReLU(0.2) + conv1, and SPADE2's BatchNorm batch stats
# (the whole batch is resident in this single grid step).
# ----------------------------------------------------------------------------
def _make_spade_conv1_kernel(H, W):
    offsets = _tap_offsets(W)

    def kernel(x_ref, skip_ref, masks_ref, sc1_ref, sh1_ref,
               wsh_ref, bsh_ref, wgb_ref, bgb_ref, wc1_ref, bc1_ref,
               h_ref, sc2_ref, sh2_ref):
        cx = x_ref.shape[0]
        L = x_ref.shape[1]

        # SPADE1 conditioning branch: shared 3x3 conv + ReLU on skip, then the
        # gamma and beta 3x3 convs fused into ONE stacked MXU matmul.
        skip_st = _stacked_taps(skip_ref[...], masks_ref, offsets)
        actv = jnp.maximum(
            jnp.dot(wsh_ref[...], skip_st, preferred_element_type=jnp.float32)
            + bsh_ref[...], 0.0)
        actv_st = _stacked_taps(actv, masks_ref, offsets)
        gb = (jnp.dot(wgb_ref[...], actv_st, preferred_element_type=jnp.float32)
              + bgb_ref[...])                            # (2*Cx, L)
        gamma = gb[:cx, :]
        beta = gb[cx:, :]

        # Param-free BatchNorm (precomputed batch scale/shift) + SPADE
        # modulation + LeakyReLU(0.2).
        xn = x_ref[...] * sc1_ref[...] + sh1_ref[...]
        mod = xn * (1.0 + gamma) + beta
        a = jnp.where(mod >= 0.0, mod, LEAKY_SLOPE * mod)

        # conv1 (3x3) as one stacked matmul; lane-dense (Ch, L) store.
        h = (jnp.dot(wc1_ref[...], _stacked_taps(a, masks_ref, offsets),
                     preferred_element_type=jnp.float32) + bc1_ref[...])
        h_ref[...] = h

        # SPADE2 BatchNorm training-mode batch stats (biased variance) -> the
        # fused scale/shift used by kernel 2.  No extra HBM pass over h.
        # TODO(synk): E[x^2]-mean^2 in f32 loses precision at production N*H*W.
        inv_cnt = 1.0 / L
        mean = jnp.sum(h, axis=1, keepdims=True) * inv_cnt
        var = jnp.sum(h * h, axis=1, keepdims=True) * inv_cnt - mean * mean
        inv_std = lax.rsqrt(var + EPS)
        sc2_ref[...] = inv_std
        sh2_ref[...] = -mean * inv_std

    return kernel


# ----------------------------------------------------------------------------
# Kernel 2: SPADE2 + LeakyReLU(0.2) + conv2 + residual.  The learned 1x1
# residual conv is folded into the stacked conv2 contraction; the identity
# residual is a plain f32 add.
# ----------------------------------------------------------------------------
def _make_spade_conv2_kernel(H, W, learned_res):
    offsets = _tap_offsets(W)

    def kernel(h_ref, skip_ref, x_ref, masks_ref, sc2_ref, sh2_ref,
               wsh_ref, bsh_ref, wgb_ref, bgb_ref, wc2_ref, bc2_ref, o_ref):
        ch = h_ref.shape[0]

        skip_st = _stacked_taps(skip_ref[...], masks_ref, offsets)
        actv = jnp.maximum(
            jnp.dot(wsh_ref[...], skip_st, preferred_element_type=jnp.float32)
            + bsh_ref[...], 0.0)
        actv_st = _stacked_taps(actv, masks_ref, offsets)
        gb = (jnp.dot(wgb_ref[...], actv_st, preferred_element_type=jnp.float32)
              + bgb_ref[...])                            # (2*Ch, L)
        gamma = gb[:ch, :]
        beta = gb[ch:, :]

        hn = h_ref[...] * sc2_ref[...] + sh2_ref[...]
        mod = hn * (1.0 + gamma) + beta
        a = jnp.where(mod >= 0.0, mod, LEAKY_SLOPE * mod)

        a_st = _stacked_taps(a, masks_ref, offsets)
        if learned_res:
            # Fold the learned 1x1 residual: append x as a 10th contraction
            # block; wc2_ref already carries res_w concatenated along its
            # contraction axis.
            operand = jnp.concatenate(
                [a_st, x_ref[...].astype(MATMUL_DTYPE)], axis=0)
            out = (jnp.dot(wc2_ref[...], operand,
                           preferred_element_type=jnp.float32) + bc2_ref[...])
        else:
            out = (jnp.dot(wc2_ref[...], a_st,
                           preferred_element_type=jnp.float32)
                   + bc2_ref[...] + x_ref[...])          # identity residual, f32
        o_ref[...] = out                                  # lane-dense (Cout, L) store

    return kernel


# ----------------------------------------------------------------------------
# pallas_call wrappers (single grid step; every block = full array).
# ----------------------------------------------------------------------------
def _full_spec(shape):
    return pl.BlockSpec(shape, lambda i, _n=len(shape): (0,) * _n)


def _compiler_params():
    return pltpu.CompilerParams(
        dimension_semantics=("arbitrary",),
        vmem_limit_bytes=VMEM_LIMIT_BYTES)


def spade_conv1(x, skip, masks, sc1, sh1, wsh, bsh, wgb, bgb, wc1, bc1, H, W):
    _, L = x.shape
    ch = wc1.shape[0]
    args = (x, skip, masks, sc1, sh1, wsh, bsh, wgb, bgb, wc1, bc1)
    return pl.pallas_call(
        _make_spade_conv1_kernel(H, W),
        out_shape=(jax.ShapeDtypeStruct((ch, L), jnp.float32),
                   jax.ShapeDtypeStruct((ch, 1), jnp.float32),
                   jax.ShapeDtypeStruct((ch, 1), jnp.float32)),
        grid=(1,),
        in_specs=[_full_spec(a.shape) for a in args],
        out_specs=(_full_spec((ch, L)), _full_spec((ch, 1)), _full_spec((ch, 1))),
        compiler_params=_compiler_params(),
    )(*args)


def spade_conv2(h, skip, x, masks, sc2, sh2, wsh, bsh, wgb, bgb, wc2, bc2,
                H, W, *, learned_res):
    _, L = h.shape
    cout = wc2.shape[0]
    args = (h, skip, x, masks, sc2, sh2, wsh, bsh, wgb, bgb, wc2, bc2)
    return pl.pallas_call(
        _make_spade_conv2_kernel(H, W, learned_res),
        out_shape=jax.ShapeDtypeStruct((cout, L), jnp.float32),
        grid=(1,),
        in_specs=[_full_spec(a.shape) for a in args],
        out_specs=_full_spec((cout, L)),
        compiler_params=_compiler_params(),
    )(*args)


# ----------------------------------------------------------------------------
# Parameters (deterministic synthetic init, pre-stacked layouts) and forward.
# ----------------------------------------------------------------------------
def init_params(key, x_in_ch, x_out_ch, y_ch, spade_hidden=SPADE_HIDDEN):
    x_hidden_ch = min(x_in_ch, x_out_ch)
    learned_res = x_in_ch != x_out_ch
    ks = jax.random.split(key, 17)

    def conv_w(k, cin, cout, scale=0.1):
        # Stacked 3x3 weight (Cout, 9*Cin); contraction index = tap*Cin + cin,
        # tap = ky*3 + kx.  From PyTorch (Cout, Cin, 3, 3):
        #   w.transpose(0, 2, 3, 1).reshape(Cout, 9*Cin).
        return (scale * jax.random.normal(k, (cout, 9 * cin), jnp.float32)
                ).astype(MATMUL_DTYPE)

    def bias(k, c, scale=0.05):
        return scale * jax.random.normal(k, (c, 1), jnp.float32)

    def gb_w(kg, kb, cin, cout, scale=0.1):
        # gamma conv weight stacked on top of beta conv weight along Cout.
        g = scale * jax.random.normal(kg, (cout, 9 * cin), jnp.float32)
        b = scale * jax.random.normal(kb, (cout, 9 * cin), jnp.float32)
        return jnp.concatenate([g, b], axis=0).astype(MATMUL_DTYPE)

    def gb_b(kg, kb, c):
        return jnp.concatenate([bias(kg, c), bias(kb, c)], axis=0)

    conv2_w = 0.1 * jax.random.normal(ks[14], (x_out_ch, 9 * x_hidden_ch),
                                      jnp.float32)
    if learned_res:
        # Learned 1x1 residual folded onto conv2's contraction axis.
        res_w = 0.1 * jax.random.normal(ks[16], (x_out_ch, x_in_ch), jnp.float32)
        conv2_w = jnp.concatenate([conv2_w, res_w], axis=1)
    conv2_w = conv2_w.astype(MATMUL_DTYPE)

    return {
        "sp1_shared_w": conv_w(ks[0], y_ch, spade_hidden),
        "sp1_shared_b": bias(ks[1], spade_hidden),
        "sp1_gb_w": gb_w(ks[2], ks[3], spade_hidden, x_in_ch),
        "sp1_gb_b": gb_b(ks[4], ks[5], x_in_ch),
        "conv1_w": conv_w(ks[6], x_in_ch, x_hidden_ch),
        "conv1_b": bias(ks[7], x_hidden_ch),
        "sp2_shared_w": conv_w(ks[8], y_ch, spade_hidden),
        "sp2_shared_b": bias(ks[9], spade_hidden),
        "sp2_gb_w": gb_w(ks[10], ks[11], spade_hidden, x_hidden_ch),
        "sp2_gb_b": gb_b(ks[12], ks[13], x_hidden_ch),
        "conv2_w": conv2_w,
        "conv2_b": bias(ks[15], x_out_ch),
    }, learned_res


def adaptive_block_forward(x_nchw, skip_nchw, params, *, learned_res):
    N, Cx, H, W = x_nchw.shape
    L = N * H * W

    # Channels-on-sublanes / pixels-on-lanes with the batch collapsed into the
    # lane dim (tiny one-time XLA transpose in the wrapper).
    xT = x_nchw.astype(jnp.float32).transpose(1, 0, 2, 3).reshape(Cx, L)

    skip = skip_nchw.astype(jnp.float32)
    if skip.shape[2:] != (H, W):
        # SPADE's F.interpolate(skip, size=x.shape[2:], mode='bilinear'),
        # hoisted once and shared by both SPADE stages (identity at test size).
        skip = jax.image.resize(skip, (skip.shape[0], skip.shape[1], H, W),
                                method="bilinear")
    skipT = skip.transpose(1, 0, 2, 3).reshape(skip.shape[1], L)

    masks = jnp.asarray(_tap_masks(N, H, W))          # static trace-time constants

    # SPADE1 BatchNorm batch stats (training mode, biased variance) -> fused
    # scale/shift.  Plain jnp here: a dedicated stats kernel is pure launch
    # overhead at these sizes.
    mean1 = jnp.mean(xT, axis=1, keepdims=True)
    var1 = jnp.var(xT, axis=1, keepdims=True)
    sc1 = lax.rsqrt(var1 + EPS)
    sh1 = -mean1 * sc1

    # SPADE1 + LeakyReLU + conv1, emitting SPADE2's BN scale/shift.
    h, sc2, sh2 = spade_conv1(
        xT, skipT, masks, sc1, sh1,
        params["sp1_shared_w"], params["sp1_shared_b"],
        params["sp1_gb_w"], params["sp1_gb_b"],
        params["conv1_w"], params["conv1_b"], H, W)

    # SPADE2 + LeakyReLU + conv2 + residual (learned 1x1 folded into conv2).
    out = spade_conv2(
        h, skipT, xT, masks, sc2, sh2,
        params["sp2_shared_w"], params["sp2_shared_b"],
        params["sp2_gb_w"], params["sp2_gb_b"],
        params["conv2_w"], params["conv2_b"], H, W,
        learned_res=learned_res)

    Cout = out.shape[0]
    return out.reshape(Cout, N, H, W).transpose(1, 0, 2, 3)


if __name__ == "__main__":
    key = jax.random.PRNGKey(0)
    k_x, k_skip, k_p = jax.random.split(key, 3)

    N, x_in_ch, x_out_ch, y_ch, H, W = 2, 4, 8, 4, 16, 16
    x = jax.random.normal(k_x, (N, x_in_ch, H, W), jnp.float32)
    skip = jax.random.normal(k_skip, (N, y_ch, H, W), jnp.float32)
    params, learned_res = init_params(k_p, x_in_ch, x_out_ch, y_ch)

    fwd = jax.jit(adaptive_block_forward, static_argnames=("learned_res",))
    out = jax.block_until_ready(fwd(x, skip, params, learned_res=learned_res))

    assert out.shape == (N, x_out_ch, H, W), out.shape
    assert bool(jnp.all(jnp.isfinite(out)))
    print("KERNEL_OK")
</pallas_src>

<mosaic_0001>
module attributes {stable_mosaic.version = 11 : i64} {
  func.func @kernel(%arg0: i32, %arg1: memref<4x512xf32, #tpu.memory_space<vmem>>, %arg2: memref<4x512xf32, #tpu.memory_space<vmem>>, %arg3: memref<9x512xf32, #tpu.memory_space<vmem>>, %arg4: memref<4x1xf32, #tpu.memory_space<vmem>>, %arg5: memref<4x1xf32, #tpu.memory_space<vmem>>, %arg6: memref<32x36xbf16, #tpu.memory_space<vmem>>, %arg7: memref<32x1xf32, #tpu.memory_space<vmem>>, %arg8: memref<8x288xbf16, #tpu.memory_space<vmem>>, %arg9: memref<8x1xf32, #tpu.memory_space<vmem>>, %arg10: memref<4x36xbf16, #tpu.memory_space<vmem>>, %arg11: memref<4x1xf32, #tpu.memory_space<vmem>>, %arg12: memref<4x512xf32, #tpu.memory_space<vmem>>, %arg13: memref<4x1xf32, #tpu.memory_space<vmem>>, %arg14: memref<4x1xf32, #tpu.memory_space<vmem>>) attributes {dimension_semantics = [#tpu.dimension_semantics<arbitrary>], iteration_bounds = array<i64: 1>, scalar_prefetch = 0 : i64, scratch_operands = 0 : i64, tpu.core_type = #tpu.core_type<tc>, window_params = [{pipeline_mode = #tpu.pipeline_mode<synchronous>, transform_indices = @transform_0, window_bounds = array<i64: 4, 512>}, {pipeline_mode = #tpu.pipeline_mode<synchronous>, transform_indices = @transform_1, window_bounds = array<i64: 4, 512>}, {pipeline_mode = #tpu.pipeline_mode<synchronous>, transform_indices = @transform_2, window_bounds = array<i64: 9, 512>}, {pipeline_mode = #tpu.pipeline_mode<synchronous>, transform_indices = @transform_3, window_bounds = array<i64: 4, 1>}, {pipeline_mode = #tpu.pipeline_mode<synchronous>, transform_indices = @transform_4, window_bounds = array<i64: 4, 1>}, {pipeline_mode = #tpu.pipeline_mode<synchronous>, transform_indices = @transform_5, window_bounds = array<i64: 32, 36>}, {pipeline_mode = #tpu.pipeline_mode<synchronous>, transform_indices = @transform_6, window_bounds = array<i64: 32, 1>}, {pipeline_mode = #tpu.pipeline_mode<synchronous>, transform_indices = @transform_7, window_bounds = array<i64: 8, 288>}, {pipeline_mode = #tpu.pipeline_mode<synchronous>, transform_indices = @transform_8, window_bounds = array<i64: 8, 1>}, {pipeline_mode = #tpu.pipeline_mode<synchronous>, transform_indices = @transform_9, window_bounds = array<i64: 4, 36>}, {pipeline_mode = #tpu.pipeline_mode<synchronous>, transform_indices = @transform_10, window_bounds = array<i64: 4, 1>}, {pipeline_mode = #tpu.pipeline_mode<synchronous>, transform_indices = @transform_11, window_bounds = array<i64: 4, 512>}, {pipeline_mode = #tpu.pipeline_mode<synchronous>, transform_indices = @transform_12, window_bounds = array<i64: 4, 1>}, {pipeline_mode = #tpu.pipeline_mode<synchronous>, transform_indices = @transform_13, window_bounds = array<i64: 4, 1>}]} {
    %c0 = arith.constant 0 : index
    %c0_0 = arith.constant 0 : index
    %0 = vector.load %arg2[%c0, %c0_0] : memref<4x512xf32, #tpu.memory_space<vmem>>, vector<4x512xf32>
    %c17_i32 = arith.constant 17 : i32
    %1 = tpu.dynamic_rotate %0 by %c17_i32 dim 1 : vector<4x512xf32>, i32 -> vector<4x512xf32>
    %c0_1 = arith.constant 0 : index
    %c0_2 = arith.constant 0 : index
    %2 = vector.load %arg3[%c0_1, %c0_2] : memref<9x512xf32, #tpu.memory_space<vmem>>, vector<1x512xf32>
    %3 = vector.broadcast %2 : vector<1x512xf32> to vector<4x512xf32>
    %4 = arith.mulf %1, %3 : vector<4x512xf32>
    %5 = arith.truncf %4 : vector<4x512xf32> to vector<4x512xbf16>
    %c16_i32 = arith.constant 16 : i32
    %6 = tpu.dynamic_rotate %0 by %c16_i32 dim 1 : vector<4x512xf32>, i32 -> vector<4x512xf32>
    %c1 = arith.constant 1 : index
    %c0_3 = arith.constant 0 : index
    %7 = vector.load %arg3[%c1, %c0_3] : memref<9x512xf32, #tpu.memory_space<vmem>>, vector<1x512xf32>
    %8 = vector.broadcast %7 : vector<1x512xf32> to vector<4x512xf32>
    %9 = arith.mulf %6, %8 : vector<4x512xf32>
    %10 = arith.truncf %9 : vector<4x512xf32> to vector<4x512xbf16>
    %c15_i32 = arith.constant 15 : i32
    %11 = tpu.dynamic_rotate %0 by %c15_i32 dim 1 : vector<4x512xf32>, i32 -> vector<4x512xf32>
    %c2 = arith.constant 2 : index
    %c0_4 = arith.constant 0 : index
    %12 = vector.load %arg3[%c2, %c0_4] : memref<9x512xf32, #tpu.memory_space<vmem>>, vector<1x512xf32>
    %13 = vector.broadcast %12 : vector<1x512xf32> to vector<4x512xf32>
    %14 = arith.mulf %11, %13 : vector<4x512xf32>
    %15 = arith.truncf %14 : vector<4x512xf32> to vector<4x512xbf16>
    %c1_i32 = arith.constant 1 : i32
    %16 = tpu.dynamic_rotate %0 by %c1_i32 dim 1 : vector<4x512xf32>, i32 -> vector<4x512xf32>
    %c3 = arith.constant 3 : index
    %c0_5 = arith.constant 0 : index
    %17 = vector.load %arg3[%c3, %c0_5] : memref<9x512xf32, #tpu.memory_space<vmem>>, vector<1x512xf32>
    %18 = vector.broadcast %17 : vector<1x512xf32> to vector<4x512xf32>
    %19 = arith.mulf %16, %18 : vector<4x512xf32>
    %20 = arith.truncf %19 : vector<4x512xf32> to vector<4x512xbf16>
    %21 = arith.truncf %0 : vector<4x512xf32> to vector<4x512xbf16>
    %c511_i32 = arith.constant 511 : i32
    %22 = tpu.dynamic_rotate %0 by %c511_i32 dim 1 : vector<4x512xf32>, i32 -> vector<4x512xf32>
    %c5 = arith.constant 5 : index
    %c0_6 = arith.constant 0 : index
    %23 = vector.load %arg3[%c5, %c0_6] : memref<9x512xf32, #tpu.memory_space<vmem>>, vector<1x512xf32>
    %24 = vector.broadcast %23 : vector<1x512xf32> to vector<4x512xf32>
    %25 = arith.mulf %22, %24 : vector<4x512xf32>
    %26 = arith.truncf %25 : vector<4x512xf32> to vector<4x512xbf16>
    %c497_i32 = arith.constant 497 : i32
    %27 = tpu.dynamic_rotate %0 by %c497_i32 dim 1 : vector<4x512xf32>, i32 -> vector<4x512xf32>
    %c6 = arith.constant 6 : index
    %c0_7 = arith.constant 0 : index
    %28 = vector.load %arg3[%c6, %c0_7] : memref<9x512xf32, #tpu.memory_space<vmem>>, vector<1x512xf32>
    %29 = vector.broadcast %28 : vector<1x512xf32> to vector<4x512xf32>
    %30 = arith.mulf %27, %29 : vector<4x512xf32>
    %31 = arith.truncf %30 : vector<4x512xf32> to vector<4x512xbf16>
    %c496_i32 = arith.constant 496 : i32
    %32 = tpu.dynamic_rotate %0 by %c496_i32 dim 1 : vector<4x512xf32>, i32 -> vector<4x512xf32>
    %c7 = arith.constant 7 : index
    %c0_8 = arith.constant 0 : index
    %33 = vector.load %arg3[%c7, %c0_8] : memref<9x512xf32, #tpu.memory_space<vmem>>, vector<1x512xf32>
    %34 = vector.broadcast %33 : vector<1x512xf32> to vector<4x512xf32>
    %35 = arith.mulf %32, %34 : vector<4x512xf32>
    %36 = arith.truncf %35 : vector<4x512xf32> to vector<4x512xbf16>
    %c495_i32 = arith.constant 495 : i32
    %37 = tpu.dynamic_rotate %0 by %c495_i32 dim 1 : vector<4x512xf32>, i32 -> vector<4x512xf32>
    %c8 = arith.constant 8 : index
    %c0_9 = arith.constant 0 : index
    %38 = vector.load %arg3[%c8, %c0_9] : memref<9x512xf32, #tpu.memory_space<vmem>>, vector<1x512xf32>
    %39 = vector.broadcast %38 : vector<1x512xf32> to vector<4x512xf32>
    %40 = arith.mulf %37, %39 : vector<4x512xf32>
    %41 = arith.truncf %40 : vector<4x512xf32> to vector<4x512xbf16>
    %42 = tpu.concatenate %5, %10, %15, %20, %21, %26, %31, %36, %41 in 0 : vector<4x512xbf16>, vector<4x512xbf16>, vector<4x512xbf16>, vector<4x512xbf16>, vector<4x512xbf16>, vector<4x512xbf16>, vector<4x512xbf16>, vector<4x512xbf16>, vector<4x512xbf16> -> vector<36x512xbf16>
    %c0_10 = arith.constant 0 : index
    %c0_11 = arith.constant 0 : index
    %43 = vector.load %arg6[%c0_10, %c0_11] : memref<32x36xbf16, #tpu.memory_space<vmem>>, vector<32x36xbf16>
    %cst = arith.constant dense<0.000000e+00> : vector<32x512xf32>
    %44 = tpu.matmul %43, %42, %cst {dimension_numbers = #tpu.dot_dimension_numbers<[1], [0], [0], [1], [0, 0, 1, 1], [], []>} : vector<32x36xbf16>, vector<36x512xbf16>, vector<32x512xf32> -> vector<32x512xf32>
    %c0_12 = arith.constant 0 : index
    %c0_13 = arith.constant 0 : index
    %45 = vector.load %arg7[%c0_12, %c0_13] : memref<32x1xf32, #tpu.memory_space<vmem>>, vector<32x1xf32>
    %46 = vector.broadcast %45 : vector<32x1xf32> to vector<32x512xf32>
    %47 = arith.addf %44, %46 : vector<32x512xf32>
    %cst_14 = arith.constant 0.000000e+00 : f32
    %48 = vector.broadcast %cst_14 : f32 to vector<32x512xf32>
    %49 = arith.maximumf %47, %48 : vector<32x512xf32>
    %c17_i32_15 = arith.constant 17 : i32
    %50 = tpu.dynamic_rotate %49 by %c17_i32_15 dim 1 : vector<32x512xf32>, i32 -> vector<32x512xf32>
    %c0_16 = arith.constant 0 : index
    %c0_17 = arith.constant 0 : index
    %51 = vector.load %arg3[%c0_16, %c0_17] : memref<9x512xf32, #tpu.memory_space<vmem>>, vector<1x512xf32>
    %52 = vector.broadcast %51 : vector<1x512xf32> to vector<32x512xf32>
    %53 = arith.mulf %50, %52 : vector<32x512xf32>
    %54 = arith.truncf %53 : vector<32x512xf32> to vector<32x512xbf16>
    %c16_i32_18 = arith.constant 16 : i32
    %55 = tpu.dynamic_rotate %49 by %c16_i32_18 dim 1 : vector<32x512xf32>, i32 -> vector<32x512xf32>
    %c1_19 = arith.constant 1 : index
    %c0_20 = arith.constant 0 : index
    %56 = vector.load %arg3[%c1_19, %c0_20] : memref<9x512xf32, #tpu.memory_space<vmem>>, vector<1x512xf32>
    %57 = vector.broadcast %56 : vector<1x512xf32> to vector<32x512xf32>
    %58 = arith.mulf %55, %57 : vector<32x512xf32>
    %59 = arith.truncf %58 : vector<32x512xf32> to vector<32x512xbf16>
    %c15_i32_21 = arith.constant 15 : i32
    %60 = tpu.dynamic_rotate %49 by %c15_i32_21 dim 1 : vector<32x512xf32>, i32 -> vector<32x512xf32>
    %c2_22 = arith.constant 2 : index
    %c0_23 = arith.constant 0 : index
    %61 = vector.load %arg3[%c2_22, %c0_23] : memref<9x512xf32, #tpu.memory_space<vmem>>, vector<1x512xf32>
    %62 = vector.broadcast %61 : vector<1x512xf32> to vector<32x512xf32>
    %63 = arith.mulf %60, %62 : vector<32x512xf32>
    %64 = arith.truncf %63 : vector<32x512xf32> to vector<32x512xbf16>
    %c1_i32_24 = arith.constant 1 : i32
    %65 = tpu.dynamic_rotate %49 by %c1_i32_24 dim 1 : vector<32x512xf32>, i32 -> vector<32x512xf32>
    %c3_25 = arith.constant 3 : index
    %c0_26 = arith.constant 0 : index
    %66 = vector.load %arg3[%c3_25, %c0_26] : memref<9x512xf32, #tpu.memory_space<vmem>>, vector<1x512xf32>
    %67 = vector.broadcast %66 : vector<1x512xf32> to vector<32x512xf32>
    %68 = arith.mulf %65, %67 : vector<32x512xf32>
    %69 = arith.truncf %68 : vector<32x512xf32> to vector<32x512xbf16>
    %70 = arith.truncf %49 : vector<32x512xf32> to vector<32x512xbf16>
    %c511_i32_27 = arith.constant 511 : i32
    %71 = tpu.dynamic_rotate %49 by %c511_i32_27 dim 1 : vector<32x512xf32>, i32 -> vector<32x512xf32>
    %c5_28 = arith.constant 5 : index
    %c0_29 = arith.constant 0 : index
    %72 = vector.load %arg3[%c5_28, %c0_29] : memref<9x512xf32, #tpu.memory_space<vmem>>, vector<1x512xf32>
    %73 = vector.broadcast %72 : vector<1x512xf32> to vector<32x512xf32>
    %74 = arith.mulf %71, %73 : vector<32x512xf32>
    %75 = arith.truncf %74 : vector<32x512xf32> to vector<32x512xbf16>
    %c497_i32_30 = arith.constant 497 : i32
    %76 = tpu.dynamic_rotate %49 by %c497_i32_30 dim 1 : vector<32x512xf32>, i32 -> vector<32x512xf32>
    %c6_31 = arith.constant 6 : index
    %c0_32 = arith.constant 0 : index
    %77 = vector.load %arg3[%c6_31, %c0_32] : memref<9x512xf32, #tpu.memory_space<vmem>>, vector<1x512xf32>
    %78 = vector.broadcast %77 : vector<1x512xf32> to vector<32x512xf32>
    %79 = arith.mulf %76, %78 : vector<32x512xf32>
    %80 = arith.truncf %79 : vector<32x512xf32> to vector<32x512xbf16>
    %c496_i32_33 = arith.constant 496 : i32
    %81 = tpu.dynamic_rotate %49 by %c496_i32_33 dim 1 : vector<32x512xf32>, i32 -> vector<32x512xf32>
    %c7_34 = arith.constant 7 : index
    %c0_35 = arith.constant 0 : index
    %82 = vector.load %arg3[%c7_34, %c0_35] : memref<9x512xf32, #tpu.memory_space<vmem>>, vector<1x512xf32>
    %83 = vector.broadcast %82 : vector<1x512xf32> to vector<32x512xf32>
    %84 = arith.mulf %81, %83 : vector<32x512xf32>
    %85 = arith.truncf %84 : vector<32x512xf32> to vector<32x512xbf16>
    %c495_i32_36 = arith.constant 495 : i32
    %86 = tpu.dynamic_rotate %49 by %c495_i32_36 dim 1 : vector<32x512xf32>, i32 -> vector<32x512xf32>
    %c8_37 = arith.constant 8 : index
    %c0_38 = arith.constant 0 : index
    %87 = vector.load %arg3[%c8_37, %c0_38] : memref<9x512xf32, #tpu.memory_space<vmem>>, vector<1x512xf32>
    %88 = vector.broadcast %87 : vector<1x512xf32> to vector<32x512xf32>
    %89 = arith.mulf %86, %88 : vector<32x512xf32>
    %90 = arith.truncf %89 : vector<32x512xf32> to vector<32x512xbf16>
    %91 = tpu.concatenate %54, %59, %64, %69, %70, %75, %80, %85, %90 in 0 : vector<32x512xbf16>, vector<32x512xbf16>, vector<32x512xbf16>, vector<32x512xbf16>, vector<32x512xbf16>, vector<32x512xbf16>, vector<32x512xbf16>, vector<32x512xbf16>, vector<32x512xbf16> -> vector<288x512xbf16>
    %c0_39 = arith.constant 0 : index
    %c0_40 = arith.constant 0 : index
    %92 = vector.load %arg8[%c0_39, %c0_40] : memref<8x288xbf16, #tpu.memory_space<vmem>>, vector<8x288xbf16>
    %cst_41 = arith.constant dense<0.000000e+00> : vector<8x512xf32>
    %93 = tpu.matmul %92, %91, %cst_41 {dimension_numbers = #tpu.dot_dimension_numbers<[1], [0], [0], [1], [0, 0, 1, 1], [], []>} : vector<8x288xbf16>, vector<288x512xbf16>, vector<8x512xf32> -> vector<8x512xf32>
    %c0_42 = arith.constant 0 : index
    %c0_43 = arith.constant 0 : index
    %94 = vector.load %arg9[%c0_42, %c0_43] : memref<8x1xf32, #tpu.memory_space<vmem>>, vector<8x1xf32>
    %95 = vector.broadcast %94 : vector<8x1xf32> to vector<8x512xf32>
    %96 = arith.addf %93, %95 : vector<8x512xf32>
    %97 = vector.extract_strided_slice %96 {offsets = [0, 0], sizes = [4, 512], strides = [1, 1]} : vector<8x512xf32> to vector<4x512xf32>
    %98 = vector.extract_strided_slice %96 {offsets = [4, 0], sizes = [4, 512], strides = [1, 1]} : vector<8x512xf32> to vector<4x512xf32>
    %c0_44 = arith.constant 0 : index
    %c0_45 = arith.constant 0 : index
    %99 = vector.load %arg1[%c0_44, %c0_45] : memref<4x512xf32, #tpu.memory_space<vmem>>, vector<4x512xf32>
    %c0_46 = arith.constant 0 : index
    %c0_47 = arith.constant 0 : index
    %100 = vector.load %arg4[%c0_46, %c0_47] : memref<4x1xf32, #tpu.memory_space<vmem>>, vector<4x1xf32>
    %101 = vector.broadcast %100 : vector<4x1xf32> to vector<4x512xf32>
    %102 = arith.mulf %99, %101 : vector<4x512xf32>
    %c0_48 = arith.constant 0 : index
    %c0_49 = arith.constant 0 : index
    %103 = vector.load %arg5[%c0_48, %c0_49] : memref<4x1xf32, #tpu.memory_space<vmem>>, vector<4x1xf32>
    %104 = vector.broadcast %103 : vector<4x1xf32> to vector<4x512xf32>
    %105 = arith.addf %102, %104 : vector<4x512xf32>
    %cst_50 = arith.constant 1.000000e+00 : f32
    %106 = vector.broadcast %cst_50 : f32 to vector<4x512xf32>
    %107 = arith.addf %106, %97 : vector<4x512xf32>
    %108 = arith.mulf %105, %107 : vector<4x512xf32>
    %109 = arith.addf %108, %98 : vector<4x512xf32>
    %cst_51 = arith.constant 0.000000e+00 : f32
    %110 = vector.broadcast %cst_51 : f32 to vector<4x512xf32>
    %111 = arith.cmpf oge, %109, %110 : vector<4x512xf32>
    %cst_52 = arith.constant 2.000000e-01 : f32
    %112 = vector.broadcast %cst_52 : f32 to vector<4x512xf32>
    %113 = arith.mulf %112, %109 : vector<4x512xf32>
    %114 = arith.select %111, %109, %113 : vector<4x512xi1>, vector<4x512xf32>
    %c0_53 = arith.constant 0 : index
    %c0_54 = arith.constant 0 : index
    %115 = vector.load %arg10[%c0_53, %c0_54] : memref<4x36xbf16, #tpu.memory_space<vmem>>, vector<4x36xbf16>
    %c17_i32_55 = arith.constant 17 : i32
    %116 = tpu.dynamic_rotate %114 by %c17_i32_55 dim 1 : vector<4x512xf32>, i32 -> vector<4x512xf32>
    %c0_56 = arith.constant 0 : index
    %c0_57 = arith.constant 0 : index
    %117 = vector.load %arg3[%c0_56, %c0_57] : memref<9x512xf32, #tpu.memory_space<vmem>>, vector<1x512xf32>
    %118 = vector.broadcast %117 : vector<1x512xf32> to vector<4x512xf32>
    %119 = arith.mulf %116, %118 : vector<4x512xf32>
    %120 = arith.truncf %119 : vector<4x512xf32> to vector<4x512xbf16>
    %c16_i32_58 = arith.constant 16 : i32
    %121 = tpu.dynamic_rotate %114 by %c16_i32_58 dim 1 : vector<4x512xf32>, i32 -> vector<4x512xf32>
    %c1_59 = arith.constant 1 : index
    %c0_60 = arith.constant 0 : index
    %122 = vector.load %arg3[%c1_59, %c0_60] : memref<9x512xf32, #tpu.memory_space<vmem>>, vector<1x512xf32>
    %123 = vector.broadcast %122 : vector<1x512xf32> to vector<4x512xf32>
    %124 = arith.mulf %121, %123 : vector<4x512xf32>
    %125 = arith.truncf %124 : vector<4x512xf32> to vector<4x512xbf16>
    %c15_i32_61 = arith.constant 15 : i32
    %126 = tpu.dynamic_rotate %114 by %c15_i32_61 dim 1 : vector<4x512xf32>, i32 -> vector<4x512xf32>
    %c2_62 = arith.constant 2 : index
    %c0_63 = arith.constant 0 : index
    %127 = vector.load %arg3[%c2_62, %c0_63] : memref<9x512xf32, #tpu.memory_space<vmem>>, vector<1x512xf32>
    %128 = vector.broadcast %127 : vector<1x512xf32> to vector<4x512xf32>
    %129 = arith.mulf %126, %128 : vector<4x512xf32>
    %130 = arith.truncf %129 : vector<4x512xf32> to vector<4x512xbf16>
    %c1_i32_64 = arith.constant 1 : i32
    %131 = tpu.dynamic_rotate %114 by %c1_i32_64 dim 1 : vector<4x512xf32>, i32 -> vector<4x512xf32>
    %c3_65 = arith.constant 3 : index
    %c0_66 = arith.constant 0 : index
    %132 = vector.load %arg3[%c3_65, %c0_66] : memref<9x512xf32, #tpu.memory_space<vmem>>, vector<1x512xf32>
    %133 = vector.broadcast %132 : vector<1x512xf32> to vector<4x512xf32>
    %134 = arith.mulf %131, %133 : vector<4x512xf32>
    %135 = arith.truncf %134 : vector<4x512xf32> to vector<4x512xbf16>
    %136 = arith.truncf %114 : vector<4x512xf32> to vector<4x512xbf16>
    %c511_i32_67 = arith.constant 511 : i32
    %137 = tpu.dynamic_rotate %114 by %c511_i32_67 dim 1 : vector<4x512xf32>, i32 -> vector<4x512xf32>
    %c5_68 = arith.constant 5 : index
    %c0_69 = arith.constant 0 : index
    %138 = vector.load %arg3[%c5_68, %c0_69] : memref<9x512xf32, #tpu.memory_space<vmem>>, vector<1x512xf32>
    %139 = vector.broadcast %138 : vector<1x512xf32> to vector<4x512xf32>
    %140 = arith.mulf %137, %139 : vector<4x512xf32>
    %141 = arith.truncf %140 : vector<4x512xf32> to vector<4x512xbf16>
    %c497_i32_70 = arith.constant 497 : i32
    %142 = tpu.dynamic_rotate %114 by %c497_i32_70 dim 1 : vector<4x512xf32>, i32 -> vector<4x512xf32>
    %c6_71 = arith.constant 6 : index
    %c0_72 = arith.constant 0 : index
    %143 = vector.load %arg3[%c6_71, %c0_72] : memref<9x512xf32, #tpu.memory_space<vmem>>, vector<1x512xf32>
    %144 = vector.broadcast %143 : vector<1x512xf32> to vector<4x512xf32>
    %145 = arith.mulf %142, %144 : vector<4x512xf32>
    %146 = arith.truncf %145 : vector<4x512xf32> to vector<4x512xbf16>
    %c496_i32_73 = arith.constant 496 : i32
    %147 = tpu.dynamic_rotate %114 by %c496_i32_73 dim 1 : vector<4x512xf32>, i32 -> vector<4x512xf32>
    %c7_74 = arith.constant 7 : index
    %c0_75 = arith.constant 0 : index
    %148 = vector.load %arg3[%c7_74, %c0_75] : memref<9x512xf32, #tpu.memory_space<vmem>>, vector<1x512xf32>
    %149 = vector.broadcast %148 : vector<1x512xf32> to vector<4x512xf32>
    %150 = arith.mulf %147, %149 : vector<4x512xf32>
    %151 = arith.truncf %150 : vector<4x512xf32> to vector<4x512xbf16>
    %c495_i32_76 = arith.constant 495 : i32
    %152 = tpu.dynamic_rotate %114 by %c495_i32_76 dim 1 : vector<4x512xf32>, i32 -> vector<4x512xf32>
    %c8_77 = arith.constant 8 : index
    %c0_78 = arith.constant 0 : index
    %153 = vector.load %arg3[%c8_77, %c0_78] : memref<9x512xf32, #tpu.memory_space<vmem>>, vector<1x512xf32>
    %154 = vector.broadcast %153 : vector<1x512xf32> to vector<4x512xf32>
    %155 = arith.mulf %152, %154 : vector<4x512xf32>
    %156 = arith.truncf %155 : vector<4x512xf32> to vector<4x512xbf16>
    %157 = tpu.concatenate %120, %125, %130, %135, %136, %141, %146, %151, %156 in 0 : vector<4x512xbf16>, vector<4x512xbf16>, vector<4x512xbf16>, vector<4x512xbf16>, vector<4x512xbf16>, vector<4x512xbf16>, vector<4x512xbf16>, vector<4x512xbf16>, vector<4x512xbf16> -> vector<36x512xbf16>
    %cst_79 = arith.constant dense<0.000000e+00> : vector<4x512xf32>
    %158 = tpu.matmul %115, %157, %cst_79 {dimension_numbers = #tpu.dot_dimension_numbers<[1], [0], [0], [1], [0, 0, 1, 1], [], []>} : vector<4x36xbf16>, vector<36x512xbf16>, vector<4x512xf32> -> vector<4x512xf32>
    %c0_80 = arith.constant 0 : index
    %c0_81 = arith.constant 0 : index
    %159 = vector.load %arg11[%c0_80, %c0_81] : memref<4x1xf32, #tpu.memory_space<vmem>>, vector<4x1xf32>
    %160 = vector.broadcast %159 : vector<4x1xf32> to vector<4x512xf32>
    %161 = arith.addf %158, %160 : vector<4x512xf32>
    %c0_82 = arith.constant 0 : index
    %c0_83 = arith.constant 0 : index
    %162 = vector.load %arg12[%c0_82, %c0_83] : memref<4x512xf32, #tpu.memory_space<vmem>>, vector<4x512xf32>
    tpu.vector_store %arg12[%c0_82, %c0_83], %161 {strides = array<i32>} : memref<4x512xf32, #tpu.memory_space<vmem>>, vector<4x512xf32>,
    %cst_84 = arith.constant dense<0.000000e+00> : vector<4xf32>
    %163 = vector.multi_reduction <add>, %161, %cst_84 [1] : vector<4x512xf32> to vector<4xf32>
    %164 = vector.shape_cast %163 : vector<4xf32> to vector<4x1xf32>
    %cst_85 = arith.constant 0.001953125 : f32
    %165 = vector.broadcast %cst_85 : f32 to vector<4x1xf32>
    %166 = arith.mulf %164, %165 : vector<4x1xf32>
    %167 = arith.mulf %161, %161 : vector<4x512xf32>
    %cst_86 = arith.constant dense<0.000000e+00> : vector<4xf32>
    %168 = vector.multi_reduction <add>, %167, %cst_86 [1] : vector<4x512xf32> to vector<4xf32>
    %169 = vector.shape_cast %168 : vector<4xf32> to vector<4x1xf32>
    %cst_87 = arith.constant 0.001953125 : f32
    %170 = vector.broadcast %cst_87 : f32 to vector<4x1xf32>
    %171 = arith.mulf %169, %170 : vector<4x1xf32>
    %172 = arith.mulf %166, %166 : vector<4x1xf32>
    %173 = arith.subf %171, %172 : vector<4x1xf32>
    %cst_88 = arith.constant 9.99999974E-6 : f32
    %174 = vector.broadcast %cst_88 : f32 to vector<4x1xf32>
    %175 = arith.addf %173, %174 : vector<4x1xf32>
    %176 = math.rsqrt %175 : vector<4x1xf32>
    %c0_89 = arith.constant 0 : index
    %c0_90 = arith.constant 0 : index
    %177 = vector.load %arg13[%c0_89, %c0_90] : memref<4x1xf32, #tpu.memory_space<vmem>>, vector<4x1xf32>
    tpu.vector_store %arg13[%c0_89, %c0_90], %176 {strides = array<i32>} : memref<4x1xf32, #tpu.memory_space<vmem>>, vector<4x1xf32>,
    %cst_91 = arith.constant 0.000000e+00 : f32
    %178 = vector.broadcast %cst_91 : f32 to vector<4x1xf32>
    %179 = arith.subf %178, %166 : vector<4x1xf32>
    %180 = arith.mulf %179, %176 : vector<4x1xf32>
    %c0_92 = arith.constant 0 : index
    %c0_93 = arith.constant 0 : index
    %181 = vector.load %arg14[%c0_92, %c0_93] : memref<4x1xf32, #tpu.memory_space<vmem>>, vector<4x1xf32>
    tpu.vector_store %arg14[%c0_92, %c0_93], %180 {strides = array<i32>} : memref<4x1xf32, #tpu.memory_space<vmem>>, vector<4x1xf32>,
    return
  }
  func.func @transform_0(%arg0: i32) -> (i32, i32) {
    %c0_i32 = arith.constant 0 : i32
    %c0_i32_0 = arith.constant 0 : i32
    %c0_i32_1 = arith.constant 0 : i32
    return %c0_i32, %c0_i32_0 : i32, i32
  }
  func.func @transform_1(%arg0: i32) -> (i32, i32) {
    %c0_i32 = arith.constant 0 : i32
    %c0_i32_0 = arith.constant 0 : i32
    %c0_i32_1 = arith.constant 0 : i32
    return %c0_i32, %c0_i32_0 : i32, i32
  }
  func.func @transform_2(%arg0: i32) -> (i32, i32) {
    %c0_i32 = arith.constant 0 : i32
    %c0_i32_0 = arith.constant 0 : i32
    %c0_i32_1 = arith.constant 0 : i32
    return %c0_i32, %c0_i32_0 : i32, i32
  }
  func.func @transform_3(%arg0: i32) -> (i32, i32) {
    %c0_i32 = arith.constant 0 : i32
    %c0_i32_0 = arith.constant 0 : i32
    %c0_i32_1 = arith.constant 0 : i32
    return %c0_i32, %c0_i32_0 : i32, i32
  }
  func.func @transform_4(%arg0: i32) -> (i32, i32) {
    %c0_i32 = arith.constant 0 : i32
    %c0_i32_0 = arith.constant 0 : i32
    %c0_i32_1 = arith.constant 0 : i32
    return %c0_i32, %c0_i32_0 : i32, i32
  }
  func.func @transform_5(%arg0: i32) -> (i32, i32) {
    %c0_i32 = arith.constant 0 : i32
    %c0_i32_0 = arith.constant 0 : i32
    %c0_i32_1 = arith.constant 0 : i32
    return %c0_i32, %c0_i32_0 : i32, i32
  }
  func.func @transform_6(%arg0: i32) -> (i32, i32) {
    %c0_i32 = arith.constant 0 : i32
    %c0_i32_0 = arith.constant 0 : i32
    %c0_i32_1 = arith.constant 0 : i32
    return %c0_i32, %c0_i32_0 : i32, i32
  }
  func.func @transform_7(%arg0: i32) -> (i32, i32) {
    %c0_i32 = arith.constant 0 : i32
    %c0_i32_0 = arith.constant 0 : i32
    %c0_i32_1 = arith.constant 0 : i32
    return %c0_i32, %c0_i32_0 : i32, i32
  }
  func.func @transform_8(%arg0: i32) -> (i32, i32) {
    %c0_i32 = arith.constant 0 : i32
    %c0_i32_0 = arith.constant 0 : i32
    %c0_i32_1 = arith.constant 0 : i32
    return %c0_i32, %c0_i32_0 : i32, i32
  }
  func.func @transform_9(%arg0: i32) -> (i32, i32) {
    %c0_i32 = arith.constant 0 : i32
    %c0_i32_0 = arith.constant 0 : i32
    %c0_i32_1 = arith.constant 0 : i32
    return %c0_i32, %c0_i32_0 : i32, i32
  }
  func.func @transform_10(%arg0: i32) -> (i32, i32) {
    %c0_i32 = arith.constant 0 : i32
    %c0_i32_0 = arith.constant 0 : i32
    %c0_i32_1 = arith.constant 0 : i32
    return %c0_i32, %c0_i32_0 : i32, i32
  }
  func.func @transform_11(%arg0: i32) -> (i32, i32) {
    %c0_i32 = arith.constant 0 : i32
    %c0_i32_0 = arith.constant 0 : i32
    %c0_i32_1 = arith.constant 0 : i32
    return %c0_i32, %c0_i32_0 : i32, i32
  }
  func.func @transform_12(%arg0: i32) -> (i32, i32) {
    %c0_i32 = arith.constant 0 : i32
    %c0_i32_0 = arith.constant 0 : i32
    %c0_i32_1 = arith.constant 0 : i32
    return %c0_i32, %c0_i32_0 : i32, i32
  }
  func.func @transform_13(%arg0: i32) -> (i32, i32) {
    %c0_i32 = arith.constant 0 : i32
    %c0_i32_0 = arith.constant 0 : i32
    %c0_i32_1 = arith.constant 0 : i32
    return %c0_i32, %c0_i32_0 : i32, i32
  }
}

module attributes {stable_mosaic.version = 11 : i64} {
  func.func @kernel(%arg0: i32, %arg1: memref<4x512xf32, #tpu.memory_space<vmem>>, %arg2: memref<4x512xf32, #tpu.memory_space<vmem>>, %arg3: memref<4x512xf32, #tpu.memory_space<vmem>>, %arg4: memref<9x512xf32, #tpu.memory_space<vmem>>, %arg5: memref<4x1xf32, #tpu.memory_space<vmem>>, %arg6: memref<4x1xf32, #tpu.memory_space<vmem>>, %arg7: memref<32x36xbf16, #tpu.memory_space<vmem>>, %arg8: memref<32x1xf32, #tpu.memory_space<vmem>>, %arg9: memref<8x288xbf16, #tpu.memory_space<vmem>>, %arg10: memref<8x1xf32, #tpu.memory_space<vmem>>, %arg11: memref<8x40xbf16, #tpu.memory_space<vmem>>, %arg12: memref<8x1xf32, #tpu.memory_space<vmem>>, %arg13: memref<8x512xf32, #tpu.memory_space<vmem>>) attributes {dimension_semantics = [#tpu.dimension_semantics<arbitrary>], iteration_bounds = array<i64: 1>, scalar_prefetch = 0 : i64, scratch_operands = 0 : i64, tpu.core_type = #tpu.core_type<tc>, window_params = [{pipeline_mode = #tpu.pipeline_mode<synchronous>, transform_indices = @transform_0, window_bounds = array<i64: 4, 512>}, {pipeline_mode = #tpu.pipeline_mode<synchronous>, transform_indices = @transform_1, window_bounds = array<i64: 4, 512>}, {pipeline_mode = #tpu.pipeline_mode<synchronous>, transform_indices = @transform_2, window_bounds = array<i64: 4, 512>}, {pipeline_mode = #tpu.pipeline_mode<synchronous>, transform_indices = @transform_3, window_bounds = array<i64: 9, 512>}, {pipeline_mode = #tpu.pipeline_mode<synchronous>, transform_indices = @transform_4, window_bounds = array<i64: 4, 1>}, {pipeline_mode = #tpu.pipeline_mode<synchronous>, transform_indices = @transform_5, window_bounds = array<i64: 4, 1>}, {pipeline_mode = #tpu.pipeline_mode<synchronous>, transform_indices = @transform_6, window_bounds = array<i64: 32, 36>}, {pipeline_mode = #tpu.pipeline_mode<synchronous>, transform_indices = @transform_7, window_bounds = array<i64: 32, 1>}, {pipeline_mode = #tpu.pipeline_mode<synchronous>, transform_indices = @transform_8, window_bounds = array<i64: 8, 288>}, {pipeline_mode = #tpu.pipeline_mode<synchronous>, transform_indices = @transform_9, window_bounds = array<i64: 8, 1>}, {pipeline_mode = #tpu.pipeline_mode<synchronous>, transform_indices = @transform_10, window_bounds = array<i64: 8, 40>}, {pipeline_mode = #tpu.pipeline_mode<synchronous>, transform_indices = @transform_11, window_bounds = array<i64: 8, 1>}, {pipeline_mode = #tpu.pipeline_mode<synchronous>, transform_indices = @transform_12, window_bounds = array<i64: 8, 512>}]} {
    %c0 = arith.constant 0 : index
    %c0_0 = arith.constant 0 : index
    %0 = vector.load %arg2[%c0, %c0_0] : memref<4x512xf32, #tpu.memory_space<vmem>>, vector<4x512xf32>
    %c17_i32 = arith.constant 17 : i32
    %1 = tpu.dynamic_rotate %0 by %c17_i32 dim 1 : vector<4x512xf32>, i32 -> vector<4x512xf32>
    %c0_1 = arith.constant 0 : index
    %c0_2 = arith.constant 0 : index
    %2 = vector.load %arg4[%c0_1, %c0_2] : memref<9x512xf32, #tpu.memory_space<vmem>>, vector<1x512xf32>
    %3 = vector.broadcast %2 : vector<1x512xf32> to vector<4x512xf32>
    %4 = arith.mulf %1, %3 : vector<4x512xf32>
    %5 = arith.truncf %4 : vector<4x512xf32> to vector<4x512xbf16>
    %c16_i32 = arith.constant 16 : i32
    %6 = tpu.dynamic_rotate %0 by %c16_i32 dim 1 : vector<4x512xf32>, i32 -> vector<4x512xf32>
    %c1 = arith.constant 1 : index
    %c0_3 = arith.constant 0 : index
    %7 = vector.load %arg4[%c1, %c0_3] : memref<9x512xf32, #tpu.memory_space<vmem>>, vector<1x512xf32>
    %8 = vector.broadcast %7 : vector<1x512xf32> to vector<4x512xf32>
    %9 = arith.mulf %6, %8 : vector<4x512xf32>
    %10 = arith.truncf %9 : vector<4x512xf32> to vector<4x512xbf16>
    %c15_i32 = arith.constant 15 : i32
    %11 = tpu.dynamic_rotate %0 by %c15_i32 dim 1 : vector<4x512xf32>, i32 -> vector<4x512xf32>
    %c2 = arith.constant 2 : index
    %c0_4 = arith.constant 0 : index
    %12 = vector.load %arg4[%c2, %c0_4] : memref<9x512xf32, #tpu.memory_space<vmem>>, vector<1x512xf32>
    %13 = vector.broadcast %12 : vector<1x512xf32> to vector<4x512xf32>
    %14 = arith.mulf %11, %13 : vector<4x512xf32>
    %15 = arith.truncf %14 : vector<4x512xf32> to vector<4x512xbf16>
    %c1_i32 = arith.constant 1 : i32
    %16 = tpu.dynamic_rotate %0 by %c1_i32 dim 1 : vector<4x512xf32>, i32 -> vector<4x512xf32>
    %c3 = arith.constant 3 : index
    %c0_5 = arith.constant 0 : index
    %17 = vector.load %arg4[%c3, %c0_5] : memref<9x512xf32, #tpu.memory_space<vmem>>, vector<1x512xf32>
    %18 = vector.broadcast %17 : vector<1x512xf32> to vector<4x512xf32>
    %19 = arith.mulf %16, %18 : vector<4x512xf32>
    %20 = arith.truncf %19 : vector<4x512xf32> to vector<4x512xbf16>
    %21 = arith.truncf %0 : vector<4x512xf32> to vector<4x512xbf16>
    %c511_i32 = arith.constant 511 : i32
    %22 = tpu.dynamic_rotate %0 by %c511_i32 dim 1 : vector<4x512xf32>, i32 -> vector<4x512xf32>
    %c5 = arith.constant 5 : index
    %c0_6 = arith.constant 0 : index
    %23 = vector.load %arg4[%c5, %c0_6] : memref<9x512xf32, #tpu.memory_space<vmem>>, vector<1x512xf32>
    %24 = vector.broadcast %23 : vector<1x512xf32> to vector<4x512xf32>
    %25 = arith.mulf %22, %24 : vector<4x512xf32>
    %26 = arith.truncf %25 : vector<4x512xf32> to vector<4x512xbf16>
    %c497_i32 = arith.constant 497 : i32
    %27 = tpu.dynamic_rotate %0 by %c497_i32 dim 1 : vector<4x512xf32>, i32 -> vector<4x512xf32>
    %c6 = arith.constant 6 : index
    %c0_7 = arith.constant 0 : index
    %28 = vector.load %arg4[%c6, %c0_7] : memref<9x512xf32, #tpu.memory_space<vmem>>, vector<1x512xf32>
    %29 = vector.broadcast %28 : vector<1x512xf32> to vector<4x512xf32>
    %30 = arith.mulf %27, %29 : vector<4x512xf32>
    %31 = arith.truncf %30 : vector<4x512xf32> to vector<4x512xbf16>
    %c496_i32 = arith.constant 496 : i32
    %32 = tpu.dynamic_rotate %0 by %c496_i32 dim 1 : vector<4x512xf32>, i32 -> vector<4x512xf32>
    %c7 = arith.constant 7 : index
    %c0_8 = arith.constant 0 : index
    %33 = vector.load %arg4[%c7, %c0_8] : memref<9x512xf32, #tpu.memory_space<vmem>>, vector<1x512xf32>
    %34 = vector.broadcast %33 : vector<1x512xf32> to vector<4x512xf32>
    %35 = arith.mulf %32, %34 : vector<4x512xf32>
    %36 = arith.truncf %35 : vector<4x512xf32> to vector<4x512xbf16>
    %c495_i32 = arith.constant 495 : i32
    %37 = tpu.dynamic_rotate %0 by %c495_i32 dim 1 : vector<4x512xf32>, i32 -> vector<4x512xf32>
    %c8 = arith.constant 8 : index
    %c0_9 = arith.constant 0 : index
    %38 = vector.load %arg4[%c8, %c0_9] : memref<9x512xf32, #tpu.memory_space<vmem>>, vector<1x512xf32>
    %39 = vector.broadcast %38 : vector<1x512xf32> to vector<4x512xf32>
    %40 = arith.mulf %37, %39 : vector<4x512xf32>
    %41 = arith.truncf %40 : vector<4x512xf32> to vector<4x512xbf16>
    %42 = tpu.concatenate %5, %10, %15, %20, %21, %26, %31, %36, %41 in 0 : vector<4x512xbf16>, vector<4x512xbf16>, vector<4x512xbf16>, vector<4x512xbf16>, vector<4x512xbf16>, vector<4x512xbf16>, vector<4x512xbf16>, vector<4x512xbf16>, vector<4x512xbf16> -> vector<36x512xbf16>
    %c0_10 = arith.constant 0 : index
    %c0_11 = arith.constant 0 : index
    %43 = vector.load %arg7[%c0_10, %c0_11] : memref<32x36xbf16, #tpu.memory_space<vmem>>, vector<32x36xbf16>
    %cst = arith.constant dense<0.000000e+00> : vector<32x512xf32>
    %44 = tpu.matmul %43, %42, %cst {dimension_numbers = #tpu.dot_dimension_numbers<[1], [0], [0], [1], [0, 0, 1, 1], [], []>} : vector<32x36xbf16>, vector<36x512xbf16>, vector<32x512xf32> -> vector<32x512xf32>
    %c0_12 = arith.constant 0 : index
    %c0_13 = arith.constant 0 : index
    %45 = vector.load %arg8[%c0_12, %c0_13] : memref<32x1xf32, #tpu.memory_space<vmem>>, vector<32x1xf32>
    %46 = vector.broadcast %45 : vector<32x1xf32> to vector<32x512xf32>
    %47 = arith.addf %44, %46 : vector<32x512xf32>
    %cst_14 = arith.constant 0.000000e+00 : f32
    %48 = vector.broadcast %cst_14 : f32 to vector<32x512xf32>
    %49 = arith.maximumf %47, %48 : vector<32x512xf32>
    %c17_i32_15 = arith.constant 17 : i32
    %50 = tpu.dynamic_rotate %49 by %c17_i32_15 dim 1 : vector<32x512xf32>, i32 -> vector<32x512xf32>
    %c0_16 = arith.constant 0 : index
    %c0_17 = arith.constant 0 : index
    %51 = vector.load %arg4[%c0_16, %c0_17] : memref<9x512xf32, #tpu.memory_space<vmem>>, vector<1x512xf32>
    %52 = vector.broadcast %51 : vector<1x512xf32> to vector<32x512xf32>
    %53 = arith.mulf %50, %52 : vector<32x512xf32>
    %54 = arith.truncf %53 : vector<32x512xf32> to vector<32x512xbf16>
    %c16_i32_18 = arith.constant 16 : i32
    %55 = tpu.dynamic_rotate %49 by %c16_i32_18 dim 1 : vector<32x512xf32>, i32 -> vector<32x512xf32>
    %c1_19 = arith.constant 1 : index
    %c0_20 = arith.constant 0 : index
    %56 = vector.load %arg4[%c1_19, %c0_20] : memref<9x512xf32, #tpu.memory_space<vmem>>, vector<1x512xf32>
    %57 = vector.broadcast %56 : vector<1x512xf32> to vector<32x512xf32>
    %58 = arith.mulf %55, %57 : vector<32x512xf32>
    %59 = arith.truncf %58 : vector<32x512xf32> to vector<32x512xbf16>
    %c15_i32_21 = arith.constant 15 : i32
    %60 = tpu.dynamic_rotate %49 by %c15_i32_21 dim 1 : vector<32x512xf32>, i32 -> vector<32x512xf32>
    %c2_22 = arith.constant 2 : index
    %c0_23 = arith.constant 0 : index
    %61 = vector.load %arg4[%c2_22, %c0_23] : memref<9x512xf32, #tpu.memory_space<vmem>>, vector<1x512xf32>
    %62 = vector.broadcast %61 : vector<1x512xf32> to vector<32x512xf32>
    %63 = arith.mulf %60, %62 : vector<32x512xf32>
    %64 = arith.truncf %63 : vector<32x512xf32> to vector<32x512xbf16>
    %c1_i32_24 = arith.constant 1 : i32
    %65 = tpu.dynamic_rotate %49 by %c1_i32_24 dim 1 : vector<32x512xf32>, i32 -> vector<32x512xf32>
    %c3_25 = arith.constant 3 : index
    %c0_26 = arith.constant 0 : index
    %66 = vector.load %arg4[%c3_25, %c0_26] : memref<9x512xf32, #tpu.memory_space<vmem>>, vector<1x512xf32>
    %67 = vector.broadcast %66 : vector<1x512xf32> to vector<32x512xf32>
    %68 = arith.mulf %65, %67 : vector<32x512xf32>
    %69 = arith.truncf %68 : vector<32x512xf32> to vector<32x512xbf16>
    %70 = arith.truncf %49 : vector<32x512xf32> to vector<32x512xbf16>
    %c511_i32_27 = arith.constant 511 : i32
    %71 = tpu.dynamic_rotate %49 by %c511_i32_27 dim 1 : vector<32x512xf32>, i32 -> vector<32x512xf32>
    %c5_28 = arith.constant 5 : index
    %c0_29 = arith.constant 0 : index
    %72 = vector.load %arg4[%c5_28, %c0_29] : memref<9x512xf32, #tpu.memory_space<vmem>>, vector<1x512xf32>
    %73 = vector.broadcast %72 : vector<1x512xf32> to vector<32x512xf32>
    %74 = arith.mulf %71, %73 : vector<32x512xf32>
    %75 = arith.truncf %74 : vector<32x512xf32> to vector<32x512xbf16>
    %c497_i32_30 = arith.constant 497 : i32
    %76 = tpu.dynamic_rotate %49 by %c497_i32_30 dim 1 : vector<32x512xf32>, i32 -> vector<32x512xf32>
    %c6_31 = arith.constant 6 : index
    %c0_32 = arith.constant 0 : index
    %77 = vector.load %arg4[%c6_31, %c0_32] : memref<9x512xf32, #tpu.memory_space<vmem>>, vector<1x512xf32>
    %78 = vector.broadcast %77 : vector<1x512xf32> to vector<32x512xf32>
    %79 = arith.mulf %76, %78 : vector<32x512xf32>
    %80 = arith.truncf %79 : vector<32x512xf32> to vector<32x512xbf16>
    %c496_i32_33 = arith.constant 496 : i32
    %81 = tpu.dynamic_rotate %49 by %c496_i32_33 dim 1 : vector<32x512xf32>, i32 -> vector<32x512xf32>
    %c7_34 = arith.constant 7 : index
    %c0_35 = arith.constant 0 : index
    %82 = vector.load %arg4[%c7_34, %c0_35] : memref<9x512xf32, #tpu.memory_space<vmem>>, vector<1x512xf32>
    %83 = vector.broadcast %82 : vector<1x512xf32> to vector<32x512xf32>
    %84 = arith.mulf %81, %83 : vector<32x512xf32>
    %85 = arith.truncf %84 : vector<32x512xf32> to vector<32x512xbf16>
    %c495_i32_36 = arith.constant 495 : i32
    %86 = tpu.dynamic_rotate %49 by %c495_i32_36 dim 1 : vector<32x512xf32>, i32 -> vector<32x512xf32>
    %c8_37 = arith.constant 8 : index
    %c0_38 = arith.constant 0 : index
    %87 = vector.load %arg4[%c8_37, %c0_38] : memref<9x512xf32, #tpu.memory_space<vmem>>, vector<1x512xf32>
    %88 = vector.broadcast %87 : vector<1x512xf32> to vector<32x512xf32>
    %89 = arith.mulf %86, %88 : vector<32x512xf32>
    %90 = arith.truncf %89 : vector<32x512xf32> to vector<32x512xbf16>
    %91 = tpu.concatenate %54, %59, %64, %69, %70, %75, %80, %85, %90 in 0 : vector<32x512xbf16>, vector<32x512xbf16>, vector<32x512xbf16>, vector<32x512xbf16>, vector<32x512xbf16>, vector<32x512xbf16>, vector<32x512xbf16>, vector<32x512xbf16>, vector<32x512xbf16> -> vector<288x512xbf16>
    %c0_39 = arith.constant 0 : index
    %c0_40 = arith.constant 0 : index
    %92 = vector.load %arg9[%c0_39, %c0_40] : memref<8x288xbf16, #tpu.memory_space<vmem>>, vector<8x288xbf16>
    %cst_41 = arith.constant dense<0.000000e+00> : vector<8x512xf32>
    %93 = tpu.matmul %92, %91, %cst_41 {dimension_numbers = #tpu.dot_dimension_numbers<[1], [0], [0], [1], [0, 0, 1, 1], [], []>} : vector<8x288xbf16>, vector<288x512xbf16>, vector<8x512xf32> -> vector<8x512xf32>
    %c0_42 = arith.constant 0 : index
    %c0_43 = arith.constant 0 : index
    %94 = vector.load %arg10[%c0_42, %c0_43] : memref<8x1xf32, #tpu.memory_space<vmem>>, vector<8x1xf32>
    %95 = vector.broadcast %94 : vector<8x1xf32> to vector<8x512xf32>
    %96 = arith.addf %93, %95 : vector<8x512xf32>
    %97 = vector.extract_strided_slice %96 {offsets = [0, 0], sizes = [4, 512], strides = [1, 1]} : vector<8x512xf32> to vector<4x512xf32>
    %98 = vector.extract_strided_slice %96 {offsets = [4, 0], sizes = [4, 512], strides = [1, 1]} : vector<8x512xf32> to vector<4x512xf32>
    %c0_44 = arith.constant 0 : index
    %c0_45 = arith.constant 0 : index
    %99 = vector.load %arg1[%c0_44, %c0_45] : memref<4x512xf32, #tpu.memory_space<vmem>>, vector<4x512xf32>
    %c0_46 = arith.constant 0 : index
    %c0_47 = arith.constant 0 : index
    %100 = vector.load %arg5[%c0_46, %c0_47] : memref<4x1xf32, #tpu.memory_space<vmem>>, vector<4x1xf32>
    %101 = vector.broadcast %100 : vector<4x1xf32> to vector<4x512xf32>
    %102 = arith.mulf %99, %101 : vector<4x512xf32>
    %c0_48 = arith.constant 0 : index
    %c0_49 = arith.constant 0 : index
    %103 = vector.load %arg6[%c0_48, %c0_49] : memref<4x1xf32, #tpu.memory_space<vmem>>, vector<4x1xf32>
    %104 = vector.broadcast %103 : vector<4x1xf32> to vector<4x512xf32>
    %105 = arith.addf %102, %104 : vector<4x512xf32>
    %cst_50 = arith.constant 1.000000e+00 : f32
    %106 = vector.broadcast %cst_50 : f32 to vector<4x512xf32>
    %107 = arith.addf %106, %97 : vector<4x512xf32>
    %108 = arith.mulf %105, %107 : vector<4x512xf32>
    %109 = arith.addf %108, %98 : vector<4x512xf32>
    %cst_51 = arith.constant 0.000000e+00 : f32
    %110 = vector.broadcast %cst_51 : f32 to vector<4x512xf32>
    %111 = arith.cmpf oge, %109, %110 : vector<4x512xf32>
    %cst_52 = arith.constant 2.000000e-01 : f32
    %112 = vector.broadcast %cst_52 : f32 to vector<4x512xf32>
    %113 = arith.mulf %112, %109 : vector<4x512xf32>
    %114 = arith.select %111, %109, %113 : vector<4x512xi1>, vector<4x512xf32>
    %c17_i32_53 = arith.constant 17 : i32
    %115 = tpu.dynamic_rotate %114 by %c17_i32_53 dim 1 : vector<4x512xf32>, i32 -> vector<4x512xf32>
    %c0_54 = arith.constant 0 : index
    %c0_55 = arith.constant 0 : index
    %116 = vector.load %arg4[%c0_54, %c0_55] : memref<9x512xf32, #tpu.memory_space<vmem>>, vector<1x512xf32>
    %117 = vector.broadcast %116 : vector<1x512xf32> to vector<4x512xf32>
    %118 = arith.mulf %115, %117 : vector<4x512xf32>
    %119 = arith.truncf %118 : vector<4x512xf32> to vector<4x512xbf16>
    %c16_i32_56 = arith.constant 16 : i32
    %120 = tpu.dynamic_rotate %114 by %c16_i32_56 dim 1 : vector<4x512xf32>, i32 -> vector<4x512xf32>
    %c1_57 = arith.constant 1 : index
    %c0_58 = arith.constant 0 : index
    %121 = vector.load %arg4[%c1_57, %c0_58] : memref<9x512xf32, #tpu.memory_space<vmem>>, vector<1x512xf32>
    %122 = vector.broadcast %121 : vector<1x512xf32> to vector<4x512xf32>
    %123 = arith.mulf %120, %122 : vector<4x512xf32>
    %124 = arith.truncf %123 : vector<4x512xf32> to vector<4x512xbf16>
    %c15_i32_59 = arith.constant 15 : i32
    %125 = tpu.dynamic_rotate %114 by %c15_i32_59 dim 1 : vector<4x512xf32>, i32 -> vector<4x512xf32>
    %c2_60 = arith.constant 2 : index
    %c0_61 = arith.constant 0 : index
    %126 = vector.load %arg4[%c2_60, %c0_61] : memref<9x512xf32, #tpu.memory_space<vmem>>, vector<1x512xf32>
    %127 = vector.broadcast %126 : vector<1x512xf32> to vector<4x512xf32>
    %128 = arith.mulf %125, %127 : vector<4x512xf32>
    %129 = arith.truncf %128 : vector<4x512xf32> to vector<4x512xbf16>
    %c1_i32_62 = arith.constant 1 : i32
    %130 = tpu.dynamic_rotate %114 by %c1_i32_62 dim 1 : vector<4x512xf32>, i32 -> vector<4x512xf32>
    %c3_63 = arith.constant 3 : index
    %c0_64 = arith.constant 0 : index
    %131 = vector.load %arg4[%c3_63, %c0_64] : memref<9x512xf32, #tpu.memory_space<vmem>>, vector<1x512xf32>
    %132 = vector.broadcast %131 : vector<1x512xf32> to vector<4x512xf32>
    %133 = arith.mulf %130, %132 : vector<4x512xf32>
    %134 = arith.truncf %133 : vector<4x512xf32> to vector<4x512xbf16>
    %135 = arith.truncf %114 : vector<4x512xf32> to vector<4x512xbf16>
    %c511_i32_65 = arith.constant 511 : i32
    %136 = tpu.dynamic_rotate %114 by %c511_i32_65 dim 1 : vector<4x512xf32>, i32 -> vector<4x512xf32>
    %c5_66 = arith.constant 5 : index
    %c0_67 = arith.constant 0 : index
    %137 = vector.load %arg4[%c5_66, %c0_67] : memref<9x512xf32, #tpu.memory_space<vmem>>, vector<1x512xf32>
    %138 = vector.broadcast %137 : vector<1x512xf32> to vector<4x512xf32>
    %139 = arith.mulf %136, %138 : vector<4x512xf32>
    %140 = arith.truncf %139 : vector<4x512xf32> to vector<4x512xbf16>
    %c497_i32_68 = arith.constant 497 : i32
    %141 = tpu.dynamic_rotate %114 by %c497_i32_68 dim 1 : vector<4x512xf32>, i32 -> vector<4x512xf32>
    %c6_69 = arith.constant 6 : index
    %c0_70 = arith.constant 0 : index
    %142 = vector.load %arg4[%c6_69, %c0_70] : memref<9x512xf32, #tpu.memory_space<vmem>>, vector<1x512xf32>
    %143 = vector.broadcast %142 : vector<1x512xf32> to vector<4x512xf32>
    %144 = arith.mulf %141, %143 : vector<4x512xf32>
    %145 = arith.truncf %144 : vector<4x512xf32> to vector<4x512xbf16>
    %c496_i32_71 = arith.constant 496 : i32
    %146 = tpu.dynamic_rotate %114 by %c496_i32_71 dim 1 : vector<4x512xf32>, i32 -> vector<4x512xf32>
    %c7_72 = arith.constant 7 : index
    %c0_73 = arith.constant 0 : index
    %147 = vector.load %arg4[%c7_72, %c0_73] : memref<9x512xf32, #tpu.memory_space<vmem>>, vector<1x512xf32>
    %148 = vector.broadcast %147 : vector<1x512xf32> to vector<4x512xf32>
    %149 = arith.mulf %146, %148 : vector<4x512xf32>
    %150 = arith.truncf %149 : vector<4x512xf32> to vector<4x512xbf16>
    %c495_i32_74 = arith.constant 495 : i32
    %151 = tpu.dynamic_rotate %114 by %c495_i32_74 dim 1 : vector<4x512xf32>, i32 -> vector<4x512xf32>
    %c8_75 = arith.constant 8 : index
    %c0_76 = arith.constant 0 : index
    %152 = vector.load %arg4[%c8_75, %c0_76] : memref<9x512xf32, #tpu.memory_space<vmem>>, vector<1x512xf32>
    %153 = vector.broadcast %152 : vector<1x512xf32> to vector<4x512xf32>
    %154 = arith.mulf %151, %153 : vector<4x512xf32>
    %155 = arith.truncf %154 : vector<4x512xf32> to vector<4x512xbf16>
    %156 = tpu.concatenate %119, %124, %129, %134, %135, %140, %145, %150, %155 in 0 : vector<4x512xbf16>, vector<4x512xbf16>, vector<4x512xbf16>, vector<4x512xbf16>, vector<4x512xbf16>, vector<4x512xbf16>, vector<4x512xbf16>, vector<4x512xbf16>, vector<4x512xbf16> -> vector<36x512xbf16>
    %c0_77 = arith.constant 0 : index
    %c0_78 = arith.constant 0 : index
    %157 = vector.load %arg3[%c0_77, %c0_78] : memref<4x512xf32, #tpu.memory_space<vmem>>, vector<4x512xf32>
    %158 = arith.truncf %157 : vector<4x512xf32> to vector<4x512xbf16>
    %159 = tpu.concatenate %156, %158 in 0 : vector<36x512xbf16>, vector<4x512xbf16> -> vector<40x512xbf16>
    %c0_79 = arith.constant 0 : index
    %c0_80 = arith.constant 0 : index
    %160 = vector.load %arg11[%c0_79, %c0_80] : memref<8x40xbf16, #tpu.memory_space<vmem>>, vector<8x40xbf16>
    %cst_81 = arith.constant dense<0.000000e+00> : vector<8x512xf32>
    %161 = tpu.matmul %160, %159, %cst_81 {dimension_numbers = #tpu.dot_dimension_numbers<[1], [0], [0], [1], [0, 0, 1, 1], [], []>} : vector<8x40xbf16>, vector<40x512xbf16>, vector<8x512xf32> -> vector<8x512xf32>
    %c0_82 = arith.constant 0 : index
    %c0_83 = arith.constant 0 : index
    %162 = vector.load %arg12[%c0_82, %c0_83] : memref<8x1xf32, #tpu.memory_space<vmem>>, vector<8x1xf32>
    %163 = vector.broadcast %162 : vector<8x1xf32> to vector<8x512xf32>
    %164 = arith.addf %161, %163 : vector<8x512xf32>
    %c0_84 = arith.constant 0 : index
    %c0_85 = arith.constant 0 : index
    %165 = vector.load %arg13[%c0_84, %c0_85] : memref<8x512xf32, #tpu.memory_space<vmem>>, vector<8x512xf32>
    tpu.vector_store %arg13[%c0_84, %c0_85], %164 {strides = array<i32>} : memref<8x512xf32, #tpu.memory_space<vmem>>, vector<8x512xf32>,
    return
  }
  func.func @transform_0(%arg0: i32) -> (i32, i32) {
    %c0_i32 = arith.constant 0 : i32
    %c0_i32_0 = arith.constant 0 : i32
    %c0_i32_1 = arith.constant 0 : i32
    return %c0_i32, %c0_i32_0 : i32, i32
  }
  func.func @transform_1(%arg0: i32) -> (i32, i32) {
    %c0_i32 = arith.constant 0 : i32
    %c0_i32_0 = arith.constant 0 : i32
    %c0_i32_1 = arith.constant 0 : i32
    return %c0_i32, %c0_i32_0 : i32, i32
  }
  func.func @transform_2(%arg0: i32) -> (i32, i32) {
    %c0_i32 = arith.constant 0 : i32
    %c0_i32_0 = arith.constant 0 : i32
    %c0_i32_1 = arith.constant 0 : i32
    return %c0_i32, %c0_i32_0 : i32, i32
  }
  func.func @transform_3(%arg0: i32) -> (i32, i32) {
    %c0_i32 = arith.constant 0 : i32
    %c0_i32_0 = arith.constant 0 : i32
    %c0_i32_1 = arith.constant 0 : i32
    return %c0_i32, %c0_i32_0 : i32, i32
  }
  func.func @transform_4(%arg0: i32) -> (i32, i32) {
    %c0_i32 = arith.constant 0 : i32
    %c0_i32_0 = arith.constant 0 : i32
    %c0_i32_1 = arith.constant 0 : i32
    return %c0_i32, %c0_i32_0 : i32, i32
  }
  func.func @transform_5(%arg0: i32) -> (i32, i32) {
    %c0_i32 = arith.constant 0 : i32
    %c0_i32_0 = arith.constant 0 : i32
    %c0_i32_1 = arith.constant 0 : i32
    return %c0_i32, %c0_i32_0 : i32, i32
  }
  func.func @transform_6(%arg0: i32) -> (i32, i32) {
    %c0_i32 = arith.constant 0 : i32
    %c0_i32_0 = arith.constant 0 : i32
    %c0_i32_1 = arith.constant 0 : i32
    return %c0_i32, %c0_i32_0 : i32, i32
  }
  func.func @transform_7(%arg0: i32) -> (i32, i32) {
    %c0_i32 = arith.constant 0 : i32
    %c0_i32_0 = arith.constant 0 : i32
    %c0_i32_1 = arith.constant 0 : i32
    return %c0_i32, %c0_i32_0 : i32, i32
  }
  func.func @transform_8(%arg0: i32) -> (i32, i32) {
    %c0_i32 = arith.constant 0 : i32
    %c0_i32_0 = arith.constant 0 : i32
    %c0_i32_1 = arith.constant 0 : i32
    return %c0_i32, %c0_i32_0 : i32, i32
  }
  func.func @transform_9(%arg0: i32) -> (i32, i32) {
    %c0_i32 = arith.constant 0 : i32
    %c0_i32_0 = arith.constant 0 : i32
    %c0_i32_1 = arith.constant 0 : i32
    return %c0_i32, %c0_i32_0 : i32, i32
  }
  func.func @transform_10(%arg0: i32) -> (i32, i32) {
    %c0_i32 = arith.constant 0 : i32
    %c0_i32_0 = arith.constant 0 : i32
    %c0_i32_1 = arith.constant 0 : i32
    return %c0_i32, %c0_i32_0 : i32, i32
  }
  func.func @transform_11(%arg0: i32) -> (i32, i32) {
    %c0_i32 = arith.constant 0 : i32
    %c0_i32_0 = arith.constant 0 : i32
    %c0_i32_1 = arith.constant 0 : i32
    return %c0_i32, %c0_i32_0 : i32, i32
  }
  func.func @transform_12(%arg0: i32) -> (i32, i32) {
    %c0_i32 = arith.constant 0 : i32
    %c0_i32_0 = arith.constant 0 : i32
    %c0_i32_1 = arith.constant 0 : i32
    return %c0_i32, %c0_i32_0 : i32, i32
  }
}

</mosaic_0001>

<bundles_post_ra>
// kernel: mul.8
= control target key start
LH: loop header
LB: loop body
LE: loop exit
PB: predicated region body
PF: predicated region fallthrough
CT: control target
= control target key end

     0   :  { %s34_s0 = inlined_call_operand.vmem [shape: f32[4,1], index: 0, kind: input, shape index: {}]   ;;  %s35_s1 = inlined_call_operand.vmem [shape: f32[4,1], index: 1, kind: input, shape index: {}]   ;;  %s36_s2 = inlined_call_operand.vmem [shape: f32[4,1], index: 2, kind: output, shape index: {}]  }
   0x1   :  { %v3_v0 = vld [vmem:[%s34_s0] sm:$0xf] }
   0x2   :  { %v4_v1 = vld [vmem:[%s35_s1] sm:$0xf] }
   0x3   :  { %v7_v2 = vmul.f32 %v4_v1, %v3_v0 }
   0x5   :  { %9 = vst [vmem:[%s36_s2] sm:$0xf] %v7_v2 }

// kernel: adaptive_block_forward.3
= control target key start
LH: loop header
LB: loop body
LE: loop exit
PB: predicated region body
PF: predicated region fallthrough
CT: control target
= control target key end

     0   :  { %s2013_s25 = smov 16   ;;  %s2015_s26 = smov 17   ;;  %v4048_v4 = vmov 0   ;;  %v58_v11 = vlaneseq  ;;  %vm455_vm4 = vcmask 1041408   ;;  %vm468_vm5 = vcmask 1043456   ;;  %s4035_s1 = inlined_call_operand.vmem [shape: f32[4,512], index: 1, kind: input, shape index: {}]   ;;  %s4036_s6 = inlined_call_operand.vmem [shape: bf16[32,36], index: 6, kind: input, shape index: {}]   ;;  %s4037_s7 = inlined_call_operand.vmem [shape: f32[32,1], index: 7, kind: input, shape index: {}]   ;;  %s4038_s3 = inlined_call_operand.vmem [shape: f32[9,512], index: 3, kind: input, shape index: {}]   ;;  %s4039_s8 = inlined_call_operand.vmem [shape: bf16[8,288], index: 8, kind: input, shape index: {}]   ;;  %s4040_s9 = inlined_call_operand.vmem [shape: f32[8,1], index: 9, kind: input, shape index: {}]   ;;  %s4041_s4 = inlined_call_operand.vmem [shape: f32[4,1], index: 4, kind: input, shape index: {}]   ;;  %s4042_s5 = inlined_call_operand.vmem [shape: f32[4,1], index: 5, kind: input, shape index: {}]   ;;  %s4043_s0 = inlined_call_operand.vmem [shape: f32[4,512], index: 0, kind: input, shape index: {}]   ;;  %s4044_s11 = inlined_call_operand.vmem [shape: f32[8,1], index: 11, kind: input, shape index: {}]   ;;  %s4045_s2 = inlined_call_operand.vmem [shape: f32[4,512], index: 2, kind: input, shape index: {}]   ;;  %s4046_s10 = inlined_call_operand.vmem [shape: bf16[8,40], index: 10, kind: input, shape index: {}]   ;;  %s4047_s12 = inlined_call_operand.vmem [shape: f32[8,512], index: 12, kind: output, shape index: {}]  }
   0x1   :  { %v2091_v0 = vld [vmem:[%s4035_s1 + $0x8] sm:$0xff]  ;;  %v2096_v1 = vld [vmem:[%s4035_s1] sm:$0xff]  ;;  %s2014_s1 = smov 15   ;;  %s2016_s27 = smov 1   ;;  %611 = vmatprep.mubr.bf16.mxu0 %v4048_v4  ;;  %664 = vmatprep.mubr.bf16.mxu1 %v4048_v4  ;;  %v528_v7 = vld [vmem:[%s4037_s7 + $0x10] sm:$0xff]  ;;  %vm477_vm6 = vcmask 1045504  }
   0x2   :  { %99 = vrot.lane.b32.xlu1 %v2091_v0, %s2013_s25  ;;  %95 = vrot.lane.b32.xlu0 %v2096_v1, %s2013_s25  ;;  %v2104_v2 = vcombine.high %v2091_v0, %v2091_v0  ;;  %v2108_v3 = vcombine.high %v2096_v1, %v2096_v1  ;;  %s2017_s28 = smov 127   ;;  %s2018_s29 = smov 113   ;;  %v527_v5 = vld [vmem:[%s4037_s7 + $0x8] sm:$0xff]  ;;  %v526_v6 = vld [vmem:[%s4037_s7] sm:$0xff]  ;;  %v2186_v12 = vshrl.u32 %v58_v11, 7  ;;  %v2188_v15 = vand.u32 127, %v58_v11 }
   0x3   :  { %s2019_s30 = smov 112   ;;  %2003 = vset.pattern.permute.xlu1 %v4048_v4  ;;  %2002 = vset.pattern.permute.xlu0 %v4048_v4  ;;  %s2021_s13 = smov 111   ;;  %v529_v8 = vld [vmem:[%s4037_s7 + $0x18] sm:$0xff]  ;;  %vm560_vm11 = vcmask 293888   ;;  %vm1303_vm12 = vcmask 261120   ;;  %vm1854_vm15 = vcmask 326656  }
   0x4   :  { %4156 = vst [vmem:[#allocation2_spill] sm:$0xff] %v2186_v12  ;;  %v2191_v16 = vsub.s32 0, %v2186_v12  ;;  %v1956_v19 = vld [vmem:[%s4038_s3 + $0x1] ss:$8 sm:$0xf]  ;;  %v2197_v20 = vsub.s32 3, %v2186_v12 }
   0x5   :  { %vm103_vm0 = vcmp.lt.s32.totalorder %v2188_v15, 16  ;;  %v2201_v21 = vsub.s32 1, %v2186_v12  ;;  %v2204_v22 = vsub.s32 2, %v2186_v12  ;;  %v1957_v24 = vld [vmem:[%s4038_s3 + $0x2] ss:$8 sm:$0xf] }
   0x6   :  { %101 = vrot.lane.b32.xlu1 %v2104_v2, %s2013_s25  ;;  %97 = vrot.lane.b32.xlu0 %v2108_v3, %s2013_s25  ;;  %v2207_v23 = vrot.slane %v1956_v19, %v2191_v16  ;;  %vm60_vm1 = vcmp.lt.s32.totalorder %v2188_v15, 17  ;;  %vm147_vm2 = vcmp.lt.s32.totalorder %v2188_v15, 15  ;;  %v65_v28 = vld [vmem:[%s4038_s3] ss:$8 sm:$0xf]  ;;  %v2220_v29 = vrot.slane %v1956_v19, %v2197_v20 }
   0x7   :  { %vm191_vm3 = vcmp.lt.s32.totalorder %v2188_v15, 1  ;;  %v2224_v30 = vrot.slane %v1956_v19, %v2201_v21  ;;  %v2227_v31 = vrot.slane %v1956_v19, %v2204_v22  ;;  %v2230_v32 = vrot.slane %v1957_v24, %v2191_v16  ;;  %v1958_v43 = vld [vmem:[%s4038_s3 + $0x3] ss:$8 sm:$0xf] }
   0x8   :  { %v2239_v36 = vrot.slane %v1957_v24, %v2201_v21  ;;  %v2245_v39 = vrot.slane %v1957_v24, %v2197_v20  ;;  %v2248_v41 = vrot.slane %v65_v28, %v2201_v21  ;;  %v2254_v44 = vrot.slane %v1957_v24, %v2204_v22 }
   0x9   :  { %v2259_v46 = vrot.slane %v65_v28, %v2191_v16  ;;  %v2262_v47 = vrot.slane %v65_v28, %v2204_v22  ;;  %v2268_v51 = vrot.slane %v65_v28, %v2197_v20  ;;  %v2272_v53 = vrot.slane %v1958_v43, %v2201_v21 }
   0xa   :  { %141 = vrot.lane.b32.xlu1 %v2108_v3, %s2014_s1  ;;  %139 = vrot.lane.b32.xlu0 %v2096_v1, %s2014_s1  ;;  %4157 = vst [vmem:[#allocation3_spill] sm:$0xff] %v2248_v41  ;;  %v2275_v54 = vrot.slane %v1958_v43, %v2191_v16  ;;  %v2281_v60 = vrot.slane %v1958_v43, %v2204_v22  ;;  %vm239_vm7 = vcmp.lt.s32.totalorder %v2188_v15, 127  ;;  %vm283_vm8 = vcmp.lt.s32.totalorder %v2188_v15, 113 }
   0xb   :  { %4158 = vst [vmem:[#allocation4_spill] sm:$0xff] %v2259_v46  ;;  %4159 = vst [vmem:[#allocation5_spill] sm:$0xff] %v2262_v47  ;;  %v2299_v28 = vrot.slane %v1958_v43, %v2197_v20  ;;  %vm327_vm9 = vcmp.lt.s32.totalorder %v2188_v15, 112  ;;  %vm371_vm10 = vcmp.lt.s32.totalorder %v2188_v15, 111 }
   0xc   :  { %4160 = vst [vmem:[#allocation6_spill] sm:$0xff] %v2268_v51  ;;  %4161 = vst [vmem:[#allocation7_spill] sm:$0xff] %v2275_v54 }
   0xd   :  { %4162 = vst [vmem:[#allocation8_spill] sm:$0xff] %v2299_v28 }
   0xe   :  { %145 = vrot.lane.b32.xlu1 %v2104_v2, %s2014_s1  ;;  %143 = vrot.lane.b32.xlu0 %v2091_v0, %s2014_s1 }
  0x12   :  { %52 = vrot.lane.b32.xlu1 %v2108_v3, %s2015_s26  ;;  %50 = vrot.lane.b32.xlu0 %v2096_v1, %s2015_s26 }
  0x16   :  { %56 = vrot.lane.b32.xlu1 %v2104_v2, %s2015_s26  ;;  %54 = vrot.lane.b32.xlu0 %v2091_v0, %s2015_s26 }
  0x1a   :  { %185 = vrot.lane.b32.xlu1 %v2108_v3, %s2016_s27  ;;  %183 = vrot.lane.b32.xlu0 %v2096_v1, %s2016_s27 }
  0x1e   :  { %189 = vrot.lane.b32.xlu1 %v2104_v2, %s2016_s27  ;;  %187 = vrot.lane.b32.xlu0 %v2091_v0, %s2016_s27 }
  0x22   :  { %233 = vrot.lane.b32.xlu1 %v2108_v3, %s2017_s28  ;;  %231 = vrot.lane.b32.xlu0 %v2096_v1, %s2017_s28 }
  0x26   :  { %237 = vrot.lane.b32.xlu1 %v2104_v2, %s2017_s28  ;;  %235 = vrot.lane.b32.xlu0 %v2091_v0, %s2017_s28 }
  0x2a   :  { %277 = vrot.lane.b32.xlu1 %v2108_v3, %s2018_s29  ;;  %275 = vrot.lane.b32.xlu0 %v2096_v1, %s2018_s29 }
  0x2e   :  { %281 = vrot.lane.b32.xlu1 %v2104_v2, %s2018_s29  ;;  %279 = vrot.lane.b32.xlu0 %v2091_v0, %s2018_s29 }
  0x32   :  { %321 = vrot.lane.b32.xlu1 %v2108_v3, %s2019_s30  ;;  %319 = vrot.lane.b32.xlu0 %v2096_v1, %s2019_s30 }
  0x36   :  { %325 = vrot.lane.b32.xlu1 %v2104_v2, %s2019_s30  ;;  %323 = vrot.lane.b32.xlu0 %v2091_v0, %s2019_s30 }
  0x3a   :  { %365 = vrot.lane.b32.xlu1 %v2108_v3, %s2021_s13  ;;  %363 = vrot.lane.b32.xlu0 %v2096_v1, %s2021_s13 }
  0x3e   :  { %369 = vrot.lane.b32.xlu1 %v2104_v2, %s2021_s13  ;;  %367 = vrot.lane.b32.xlu0 %v2091_v0, %s2021_s13 }
  0x42   :  { %537 = vperm.xlu1 %2003, %v527_v5   ;;  %532 = vperm.xlu0 %2002, %v526_v6  }
  0x46   :  { %542 = vperm.xlu1 %2003, %v528_v7   ;;  %547 = vperm.xlu0 %2002, %v529_v8  }
  0x74   :  { %v100_v9 = vpop.permute.xlu1 %99  ;;  %v96_v10 = vpop.permute.xlu0 %95 }
  0x78   :  { %v102_v13 = vpop.permute.xlu1 %101  ;;  %v98_v14 = vpop.permute.xlu0 %97 }
  0x79   :  { %v107_v27 = vsel %vm103_vm0, %v102_v13, %v96_v10  ;;  %v104_v33 = vsel %vm103_vm0, %v100_v9, %v102_v13  ;;  %v105_v34 = vsel %vm103_vm0, %v98_v14, %v100_v9  ;;  %v106_v35 = vsel %vm103_vm0, %v96_v10, %v98_v14 }
  0x7a   :  { %v131_v37 = vmul.f32 %v2207_v23, %v107_v27  ;;  %v134_v48 = vmul.f32 %v2220_v29, %v104_v33  ;;  %v132_v49 = vmul.f32 %v2224_v30, %v106_v35  ;;  %v133_v50 = vmul.f32 %v2227_v31, %v105_v34 }
  0x7c   :  { %v142_v17 = vpop.permute.xlu1 %141  ;;  %v140_v18 = vpop.permute.xlu0 %139  ;;  %v135_v55 = vpack.c.bf16 %v131_v37, %v131_v37  ;;  %v138_v6 = vpack.c.bf16 %v134_v48, %v134_v48  ;;  %v136_v7 = vpack.c.bf16 %v132_v49, %v132_v49  ;;  %v137_v8 = vpack.c.bf16 %v133_v50, %v133_v50 }
  0x7d   :  { %v150_v38 = vsel %vm147_vm2, %v140_v18, %v142_v17 }
  0x7e   :  { %v176_v52 = vmul.f32 %v2239_v36, %v150_v38  ;;  %v411_v33 = vrot.slane %v135_v55, 6  ;;  %v414_v34 = vrot.slane %v138_v6, 6  ;;  %v412_v35 = vrot.slane %v136_v7, 6 }
  0x7f   :  { %v413_v37 = vrot.slane %v137_v8, 6 }
  0x80   :  { %v146_v25 = vpop.permute.xlu1 %145  ;;  %v144_v26 = vpop.permute.xlu0 %143  ;;  %v180_v10 = vpack.c.bf16 %v176_v52, %v176_v52 }
  0x81   :  { %v151_v56 = vsel %vm147_vm2, %v146_v25, %v140_v18  ;;  %v149_v61 = vsel %vm147_vm2, %v142_v17, %v144_v26  ;;  %v148_v9 = vsel %vm147_vm2, %v144_v26, %v146_v25 }
  0x82   :  { %v175_v17 = vmul.f32 %v2230_v32, %v151_v56  ;;  %v177_v18 = vmul.f32 %v2254_v44, %v149_v61  ;;  %v178_v25 = vmul.f32 %v2245_v39, %v148_v9 }
  0x84   :  { %v53_v40 = vpop.permute.xlu1 %52  ;;  %v51_v42 = vpop.permute.xlu0 %50  ;;  %v179_v49 = vpack.c.bf16 %v175_v17, %v175_v17  ;;  %v181_v50 = vpack.c.bf16 %v177_v18, %v177_v18 }
  0x85   :  { %v63_v45 = vsel %vm60_vm1, %v51_v42, %v53_v40 }
  0x86   :  { %v88_v57 = vmul.f32 %v2248_v41, %v63_v45 }
  0x88   :  { %v57_v58 = vpop.permute.xlu1 %56  ;;  %v55_v59 = vpop.permute.xlu0 %54  ;;  %v92_v19 = vpack.c.bf16 %v88_v57, %v88_v57  ;;  %v182_v57 = vpack.c.bf16 %v178_v25, %v178_v25 }
  0x89   :  { %v64_v62 = vsel %vm60_vm1, %v57_v58, %v51_v42  ;;  %v61_v63 = vsel %vm60_vm1, %v55_v59, %v57_v58  ;;  %v62_v5 = vsel %vm60_vm1, %v53_v40, %v55_v59  ;;  %v420_v40 = vrot.slane %v180_v10, 4 }
  0x8a   :  { %v87_v11 = vmul.f32 %v2259_v46, %v64_v62  ;;  %v89_v13 = vmul.f32 %v2262_v47, %v62_v5  ;;  %v90_v14 = vmul.f32 %v2268_v51, %v61_v63  ;;  %v461_v56 = vsel %vm455_vm4, %v92_v19, %v412_v35 }
  0x8b   :  { %v472_v7 = vsel %vm468_vm5, %v461_v56, %v420_v40  ;;  %v422_v25 = vrot.slane %v182_v57, 4 }
  0x8c   :  { %v186_v24 = vpop.permute.xlu1 %185  ;;  %v184_v27 = vpop.permute.xlu0 %183  ;;  %v91_v42 = vpack.c.bf16 %v87_v11, %v87_v11  ;;  %v93_v45 = vpack.c.bf16 %v89_v13, %v89_v13  ;;  %v94_v48 = vpack.c.bf16 %v90_v14, %v90_v14 }
  0x8d   :  { %v194_v26 = vsel %vm191_vm3, %v184_v27, %v186_v24 }
  0x8e   :  { %v220_v38 = vmul.f32 %v2272_v53, %v194_v26  ;;  %v458_v8 = vsel %vm455_vm4, %v91_v42, %v411_v33  ;;  %v467_v9 = vsel %vm455_vm4, %v94_v48, %v414_v34  ;;  %v464_v10 = vsel %vm455_vm4, %v93_v45, %v413_v37  ;;  %v1959_v33 = vld [vmem:[%s4038_s3 + $0x5] ss:$8 sm:$0xf] }
  0x8f   :  { %v476_v37 = vsel %vm468_vm5, %v467_v9, %v422_v25  ;;  %v2340_v56 = vrot.slane %v1959_v33, %v2197_v20  ;;  %v2343_v57 = vrot.slane %v1959_v33, %v2201_v21  ;;  %v228_v25 = vpack.c.bf16 %v2108_v3, %v2108_v3  ;;  %v1962_v3 = vld [vmem:[%s4038_s3 + $0x20] ss:$8 sm:$0xf] }
  0x90   :  { %v190_v43 = vpop.permute.xlu1 %189  ;;  %v188_v52 = vpop.permute.xlu0 %187  ;;  %v224_v55 = vpack.c.bf16 %v220_v38, %v220_v38 }
  0x91   :  { %v195_v58 = vsel %vm191_vm3, %v190_v43, %v184_v27  ;;  %v192_v59 = vsel %vm191_vm3, %v188_v52, %v190_v43  ;;  %v193_v61 = vsel %vm191_vm3, %v186_v24, %v188_v52  ;;  %v419_v24 = vrot.slane %v179_v49, 4  ;;  %v1960_v52 = vld [vmem:[%s4038_s3 + $0x6] ss:$8 sm:$0xf]  ;;  %4164 = vst [vmem:[#allocation10_spill] sm:$0xff] %v2340_v56  ;;  %4165 = vst [vmem:[#allocation11_spill] sm:$0xff] %v2343_v57 }
  0x92   :  { %v219_v62 = vmul.f32 %v2275_v54, %v195_v58  ;;  %v221_v63 = vmul.f32 %v2281_v60, %v193_v61  ;;  %v222_v5 = vmul.f32 %v2299_v28, %v192_v59  ;;  %v428_v6 = vrot.slane %v224_v55, 2  ;;  %v1488_v28 = vld [vmem:[%s4042_s5] sm:$0xf] }
  0x93   :  { %v421_v27 = vrot.slane %v181_v50, 4  ;;  %v470_v34 = vsel %vm468_vm5, %v458_v8, %v419_v24  ;;  %v2331_v43 = vrot.slane %v1959_v33, %v2191_v16  ;;  %v2346_v58 = vrot.slane %v1959_v33, %v2204_v22 }
  0x94   :  { %v223_v11 = vpack.c.bf16 %v219_v62, %v219_v62  ;;  %v225_v13 = vpack.c.bf16 %v221_v63, %v221_v63  ;;  %v234_v14 = vpop.permute.xlu1 %233  ;;  %v232_v17 = vpop.permute.xlu0 %231  ;;  %v482_v18 = vsel %vm477_vm6, %v472_v7, %v428_v6  ;;  %v226_v19 = vpack.c.bf16 %v222_v5, %v222_v5 }
  0x95   :  { %579 = vmatprep.subr.bf16.mxu0 %v482_v18  ;;  %v474_v40 = vsel %vm468_vm5, %v464_v10, %v421_v27  ;;  %4163 = vst [vmem:[#allocation9_spill] sm:$0xff] %v2331_v43  ;;  %v242_v55 = vsel %vm239_vm7, %v232_v17, %v234_v14  ;;  %4166 = vst [vmem:[#allocation12_spill] sm:$0xff] %v2346_v58  ;;  %v2355_v6 = vrot.slane %v1960_v52, %v2191_v16 }
  0x96   :  { %v427_v26 = vrot.slane %v223_v11, 2  ;;  %v430_v35 = vrot.slane %v226_v19, 2  ;;  %v429_v38 = vrot.slane %v225_v13, 2  ;;  %v267_v7 = vmul.f32 %v2331_v43, %v242_v55  ;;  %v1961_v13 = vld [vmem:[%s4038_s3 + $0x7] ss:$8 sm:$0xf] }
  0x97   :  { %4167 = vst [vmem:[#allocation13_spill] sm:$0xff] %v2355_v6  ;;  %v2362_v9 = vrot.slane %v1960_v52, %v2197_v20  ;;  %v2365_v10 = vrot.slane %v1960_v52, %v2201_v21  ;;  %v2368_v11 = vrot.slane %v1960_v52, %v2204_v22 }
  0x98   :  { %v238_v42 = vpop.permute.xlu1 %237  ;;  %v236_v45 = vpop.permute.xlu0 %235  ;;  %v479_v48 = vsel %vm477_vm6, %v470_v34, %v427_v26  ;;  %v488_v49 = vsel %vm477_vm6, %v476_v37, %v430_v35  ;;  %v485_v50 = vsel %vm477_vm6, %v474_v40, %v429_v38  ;;  %v271_v33 = vpack.c.bf16 %v267_v7, %v267_v7 }
  0x99   :  { %580 = vmatpush1.bf16.msra.mxu0 %v479_v48  ;;  %632 = vmatprep.subr.bf16.mxu1 %v488_v49  ;;  %v243_v62 = vsel %vm239_vm7, %v238_v42, %v232_v17  ;;  %v240_v63 = vsel %vm239_vm7, %v236_v45, %v238_v42  ;;  %v241_v5 = vsel %vm239_vm7, %v234_v14, %v236_v45 }
  0x9a   :  { %633 = vmatpush1.bf16.msra.mxu1 %v485_v50  ;;  %4168 = vst [vmem:[#allocation14_spill] sm:$0xff] %v2362_v9  ;;  %4169 = vst [vmem:[#allocation15_spill] sm:$0xff] %v2365_v10  ;;  %v227_v14 = vpack.c.bf16 %v2096_v1, %v2096_v1  ;;  %v270_v17 = vmul.f32 %v2340_v56, %v243_v62  ;;  %v268_v18 = vmul.f32 %v2343_v57, %v241_v5 }
  0x9b   :  { %4170 = vst [vmem:[#allocation16_spill] sm:$0xff] %v2368_v11  ;;  %v269_v19 = vmul.f32 %v2346_v58, %v240_v63  ;;  %v2389_v34 = vrot.slane %v1961_v13, %v2191_v16  ;;  %v230_v37 = vpack.c.bf16 %v2104_v2, %v2104_v2  ;;  %v229_v40 = vpack.c.bf16 %v2091_v0, %v2091_v0 }
  0x9c   :  { %v278_v59 = vpop.permute.xlu1 %277  ;;  %v276_v61 = vpop.permute.xlu0 %275  ;;  %v2402_v49 = vrot.slane %v1961_v13, %v2197_v20  ;;  %v274_v50 = vpack.c.bf16 %v270_v17, %v270_v17  ;;  %v272_v52 = vpack.c.bf16 %v268_v18, %v268_v18  ;;  %v2405_v62 = vrot.slane %v1961_v13, %v2201_v21 }
  0x9d   :  { %v286_v8 = vsel %vm283_vm8, %v276_v61, %v278_v59  ;;  %4171 = vst [vmem:[#allocation17_spill] sm:$0xff] %v2389_v34  ;;  %v273_v55 = vpack.c.bf16 %v269_v19, %v269_v19  ;;  %v2410_v63 = vrot.slane %v1961_v13, %v2204_v22  ;;  %v2413_v5 = vrot.slane %v1962_v3, %v2191_v16 }
  0x9e   :  { %v311_v26 = vmul.f32 %v2355_v6, %v286_v8  ;;  %4172 = vst [vmem:[#allocation18_spill] sm:$0xff] %v2402_v49  ;;  %4173 = vst [vmem:[#allocation19_spill] sm:$0xff] %v2405_v62  ;;  %v435_v7 = vrot.slane %v271_v33, 6  ;;  %v2417_v17 = vrot.slane %v1962_v3, %v2197_v20  ;;  %v2420_v18 = vrot.slane %v1962_v3, %v2201_v21 }
  0x9f   :  { %4174 = vst [vmem:[#allocation20_spill] sm:$0xff] %v2410_v63  ;;  %4175 = vst [vmem:[#allocation21_spill] sm:$0xff] %v2413_v5  ;;  %v438_v13 = vrot.slane %v274_v50, 6 }
  0xa0   :  { %v282_v24 = vpop.permute.xlu1 %281  ;;  %v280_v27 = vpop.permute.xlu0 %279  ;;  %v315_v2 = vpack.c.bf16 %v311_v26, %v311_v26  ;;  %4176 = vst [vmem:[#allocation22_spill] sm:$0xff] %v2417_v17  ;;  %4177 = vst [vmem:[#allocation23_spill] sm:$0xff] %v2420_v18  ;;  %v2423_v26 = vrot.slane %v1962_v3, %v2204_v22 }
  0xa1   :  { %v287_v35 = vsel %vm283_vm8, %v282_v24, %v276_v61  ;;  %v284_v38 = vsel %vm283_vm8, %v280_v27, %v282_v24  ;;  %v285_v1 = vsel %vm283_vm8, %v278_v59, %v280_v27 }
  0xa2   :  { %v314_v42 = vmul.f32 %v2362_v9, %v287_v35  ;;  %v312_v45 = vmul.f32 %v2365_v10, %v285_v1  ;;  %v313_v48 = vmul.f32 %v2368_v11, %v284_v38  ;;  %4178 = vst [vmem:[#allocation24_spill] sm:$0xff] %v2423_v26  ;;  %v436_v35 = vrot.slane %v272_v52, 6 }
  0xa3   :  { %v437_v38 = vrot.slane %v273_v55, 6  ;;  %v443_v4 = vrot.slane %v315_v2, 4 }
  0xa4   :  { %v322_v59 = vpop.permute.xlu1 %321  ;;  %v320_v61 = vpop.permute.xlu0 %319  ;;  %v318_v19 = vpack.c.bf16 %v314_v42, %v314_v42  ;;  %v316_v24 = vpack.c.bf16 %v312_v45, %v312_v45  ;;  %v317_v27 = vpack.c.bf16 %v313_v48, %v313_v48  ;;  %v492_v48 = vsel %vm455_vm4, %v227_v14, %v435_v7 }
  0xa5   :  { %v330_v0 = vsel %vm327_vm9, %v320_v61, %v322_v59  ;;  %v498_v14 = vsel %vm455_vm4, %v229_v40, %v437_v38 }
  0xa6   :  { %v355_v8 = vmul.f32 %v2389_v34, %v330_v0  ;;  %v446_v50 = vrot.slane %v318_v19, 4  ;;  %v444_v52 = vrot.slane %v316_v24, 4  ;;  %v445_v55 = vrot.slane %v317_v27, 4 }
  0xa7   :  { %v495_v34 = vsel %vm455_vm4, %v228_v25, %v436_v35 }
  0xa8   :  { %v359_v16 = vpack.c.bf16 %v355_v8, %v355_v8  ;;  %v326_v1 = vpop.permute.xlu1 %325  ;;  %v324_v33 = vpop.permute.xlu0 %323  ;;  %v507_v35 = vsel %vm468_vm5, %v498_v14, %v445_v55 }
  0xa9   :  { %v331_v20 = vsel %vm327_vm9, %v326_v1, %v320_v61  ;;  %v328_v21 = vsel %vm327_vm9, %v324_v33, %v326_v1  ;;  %v329_v42 = vsel %vm327_vm9, %v322_v59, %v324_v33  ;;  %v501_v33 = vsel %vm455_vm4, %v230_v37, %v438_v13 }
  0xaa   :  { %v358_v45 = vmul.f32 %v2402_v49, %v331_v20  ;;  %v356_v22 = vmul.f32 %v2405_v62, %v329_v42  ;;  %v357_v3 = vmul.f32 %v2410_v63, %v328_v21  ;;  %v451_v2 = vrot.slane %v359_v16, 2 }
  0xab   :  { %v503_v20 = vsel %vm468_vm5, %v492_v48, %v443_v4  ;;  %v505_v16 = vsel %vm468_vm5, %v495_v34, %v444_v52  ;;  %v509_v21 = vsel %vm468_vm5, %v501_v33, %v446_v50 }
  0xac   :  { %v362_v0 = vpack.c.bf16 %v358_v45, %v358_v45  ;;  %v360_v61 = vpack.c.bf16 %v356_v22, %v356_v22  ;;  %v361_v8 = vpack.c.bf16 %v357_v3, %v357_v3  ;;  %v366_v12 = vpop.permute.xlu1 %365  ;;  %v364_v1 = vpop.permute.xlu0 %363  ;;  %v511_v25 = vsel %vm477_vm6, %v503_v20, %v451_v2 }
  0xad   :  { %v374_v59 = vsel %vm371_vm10, %v364_v1, %v366_v12 }
  0xae   :  { %v454_v7 = vrot.slane %v362_v0, 2  ;;  %v452_v19 = vrot.slane %v360_v61, 2  ;;  %v453_v24 = vrot.slane %v361_v8, 2  ;;  %v399_v27 = vmul.f32 %v2413_v5, %v374_v59  ;;  %v2006_v61 = vld [vmem:[%s4036_s6] sm:$0xff]  }
  0xaf   :  { %v4179_v8 = vmov 0  }
  0xb0   :  { %v370_v42 = vpop.permute.xlu1 %369  ;;  %v368_v45 = vpop.permute.xlu0 %367  ;;  %v514_v37 = vsel %vm477_vm6, %v505_v16, %v452_v19  ;;  %v520_v4 = vsel %vm477_vm6, %v509_v21, %v454_v7  ;;  %v517_v40 = vsel %vm477_vm6, %v507_v35, %v453_v24  ;;  %v403_v13 = vpack.c.bf16 %v399_v27, %v399_v27 }
  0xb1   :  { %v375_v38 = vsel %vm371_vm10, %v370_v42, %v364_v1  ;;  %v372_v34 = vsel %vm371_vm10, %v368_v45, %v370_v42  ;;  %v373_v22 = vsel %vm371_vm10, %v366_v12, %v368_v45  ;;  %581 = vmatprep.subr.bf16.mxu0 %v514_v37  ;;  %634 = vmatprep.subr.bf16.mxu1 %v520_v4  ;;  %v2007_v1 = vld [vmem:[%s4036_s6 + $0x8] sm:$0xff]  }
  0xb2   :  { %v402_v3 = vmul.f32 %v2417_v17, %v375_v38  ;;  %v400_v48 = vmul.f32 %v2420_v18, %v373_v22  ;;  %582 = vmatpush1.bf16.msra.mxu0 %v511_v25  ;;  %635 = vmatpush1.bf16.msra.mxu1 %v517_v40  ;;  %v401_v50 = vmul.f32 %v2423_v26, %v372_v34  ;;  %v568_v0 = vsel %vm455_vm4, %v403_v13, 0 }
  0xb4   :  { %v406_v52 = vpack.c.bf16 %v402_v3, %v402_v3  ;;  %v404_v55 = vpack.c.bf16 %v400_v48, %v400_v48  ;;  %v405_v2 = vpack.c.bf16 %v401_v50, %v401_v50 }
  0xb6   :  { %1965 = vmatprep.subr.msk.bf16.mxu0 %vm455_vm4, %v404_v55  ;;  %1968 = vmatprep.subr.msk.bf16.mxu1 %vm455_vm4, %v406_v52  ;;  %v574_v12 = vsel %vm455_vm4, %v405_v2, 0 }
  0xb7   :  { %584 = vmatpush1.bf16.msra.mxu0 %v568_v0  ;;  %637 = vmatpush1.bf16.msra.mxu1 %v574_v12 }
  0xba   :  { %1966 = vmatmul.mubr.msk.bf16.vlgmr.msra.gmra.mrb[0].mxu0 %vm560_vm11, %v2006_v61  ;;  %1969 = vmatmul.mubr.msk.bf16.vlgmr.msra.gmra.mrb[0].mxu1 %vm560_vm11, %v2006_v61 }
  0xbb   :  { %621 = vmatprep.mubr.bf16.mxu0 %v4179_v8  ;;  %674 = vmatprep.mubr.bf16.mxu1 %v4179_v8 }
  0xc1   :  { %v2470_v59 = vpop.permute.xlu1 %537  ;;  %v533_v33 = vpop.permute.xlu0 %532 }
  0xc2   :  { %1967 = vmatmul.mubr.msk.bf16.gmra.mrb[4].mxu0 %vm560_vm11, %v2007_v1  ;;  %1970 = vmatmul.mubr.msk.bf16.gmra.mrb[4].mxu1 %vm560_vm11, %v2007_v1 }
 0x18d   :  { %v613_v20 = vpop.f32.mrb[0].mxu0  ;;  %v666_v14 = vpop.f32.mrb[0].mxu1 }
 0x18e   :  { %v614_v7 = vadd.f32 %v613_v20, %v533_v33  ;;  %v667_v19 = vadd.f32 %v666_v14, %v533_v33  ;;  %v615_v24 = vpop.f32.mrb[1].mxu0  ;;  %v668_v27 = vpop.f32.mrb[1].mxu1 }
 0x18f   :  { %v670_v16 = vpop.f32.mrb[2].mxu1  ;;  %v617_v21 = vpop.f32.mrb[2].mxu0  ;;  %v616_v12 = vadd.f32 %v615_v24, %v533_v33  ;;  %v669_v20 = vadd.f32 %v668_v27, %v533_v33 }
 0x190   :  { %v2472_v25 = vmax.f32 %v614_v7, 0.0  ;;  %v2474_v35 = vmax.f32 %v667_v19, 0.0  ;;  %v671_v42 = vadd.f32 %v670_v16, %v2470_v59  ;;  %v618_v45 = vadd.f32 %v617_v21, %v2470_v59  ;;  %v619_v37 = vpop.f32.mrb[3].mxu0  ;;  %v672_v4 = vpop.f32.mrb[3].mxu1 }
 0x191   :  { %v620_v61 = vadd.f32 %v619_v37, %v2470_v59  ;;  %v2565_v1 = vmax.f32 %v616_v12, 0.0  ;;  %v673_v7 = vadd.f32 %v672_v4, %v2470_v59  ;;  %v2574_v19 = vmax.f32 %v669_v20, 0.0  ;;  %v2622_v59 = vpop.permute.xlu1 %542  ;;  %v2626_v33 = vpop.permute.xlu0 %547 }
 0x192   :  { %4180 = vst [vmem:[#allocation25_spill] sm:$0xff] %v2472_v25  ;;  %4181 = vst [vmem:[#allocation26_spill] sm:$0xff] %v2474_v35  ;;  %v2478_v40 = vmax.f32 %v671_v42, 0.0  ;;  %v2480_v13 = vmax.f32 %v618_v45, 0.0  ;;  %701 = vrot.lane.b32.xlu1 %v2472_v25, %s2015_s26 }
 0x193   :  { %v2569_v14 = vmax.f32 %v620_v61, 0.0  ;;  %v2578_v24 = vmax.f32 %v673_v7, 0.0 }
 0x194   :  { %4182 = vst [vmem:[#allocation27_spill] sm:$0xff] %v2478_v40  ;;  %4183 = vst [vmem:[#allocation28_spill] sm:$0xff] %v2480_v13  ;;  %703 = vrot.lane.b32.xlu0 %v2480_v13, %s2015_s26 }
 0x195   :  { %v2490_v22 = vpop.f32.mrb[4].mxu0  ;;  %v2492_v3 = vpop.f32.mrb[4].mxu1 }
 0x196   :  { %v2494_v48 = vpop.f32.mrb[5].mxu0  ;;  %v2496_v50 = vpop.f32.mrb[5].mxu1  ;;  %717 = vrot.lane.b32.xlu1 %v2474_v35, %s2015_s26  ;;  %v624_v21 = vadd.f32 %v2490_v22, %v2622_v59  ;;  %v677_v12 = vadd.f32 %v2492_v3, %v2622_v59 }
 0x197   :  { %v2500_v52 = vpop.f32.mrb[6].mxu0  ;;  %v2502_v55 = vpop.f32.mrb[6].mxu1 }
 0x198   :  { %v2504_v2 = vpop.f32.mrb[7].mxu0  ;;  %v2506_v0 = vpop.f32.mrb[7].mxu1  ;;  %719 = vrot.lane.b32.xlu0 %v2478_v40, %s2015_s26  ;;  %v628_v45 = vadd.f32 %v2500_v52, %v2626_v33  ;;  %v2650_v4 = vmax.f32 %v624_v21, 0.0  ;;  %v681_v52 = vadd.f32 %v2502_v55, %v2626_v33  ;;  %v2666_v7 = vmax.f32 %v677_v12, 0.0 }
 0x19a   :  { %773 = vrot.lane.b32.xlu1 %v2472_v25, %s2013_s25  ;;  %4184 = vst [vmem:[#allocation29_spill] sm:$0xff] %v2650_v4  ;;  %v2658_v61 = vmax.f32 %v628_v45, 0.0  ;;  %4186 = vst [vmem:[#allocation31_spill] sm:$0xff] %v2666_v7  ;;  %v2672_v21 = vmax.f32 %v681_v52, 0.0 }
 0x19c   :  { %775 = vrot.lane.b32.xlu0 %v2480_v13, %s2013_s25  ;;  %4185 = vst [vmem:[#allocation30_spill] sm:$0xff] %v2658_v61  ;;  %4187 = vst [vmem:[#allocation32_spill] sm:$0xff] %v2672_v21 }
 0x19e   :  { %789 = vrot.lane.b32.xlu1 %v2474_v35, %s2013_s25 }
 0x1a0   :  { %791 = vrot.lane.b32.xlu0 %v2478_v40, %s2013_s25 }
 0x1a2   :  { %845 = vrot.lane.b32.xlu1 %v2472_v25, %s2014_s1 }
 0x1a4   :  { %847 = vrot.lane.b32.xlu0 %v2480_v13, %s2014_s1 }
 0x1a6   :  { %861 = vrot.lane.b32.xlu1 %v2474_v35, %s2014_s1 }
 0x1a8   :  { %863 = vrot.lane.b32.xlu0 %v2478_v40, %s2014_s1 }
 0x1aa   :  { %917 = vrot.lane.b32.xlu1 %v2472_v25, %s2016_s27 }
 0x1ac   :  { %919 = vrot.lane.b32.xlu0 %v2480_v13, %s2016_s27 }
 0x1ae   :  { %933 = vrot.lane.b32.xlu1 %v2474_v35, %s2016_s27 }
 0x1b0   :  { %935 = vrot.lane.b32.xlu0 %v2478_v40, %s2016_s27 }
 0x1b2   :  { %997 = vrot.lane.b32.xlu1 %v2472_v25, %s2017_s28 }
 0x1b4   :  { %999 = vrot.lane.b32.xlu0 %v2480_v13, %s2017_s28 }
 0x1b6   :  { %1013 = vrot.lane.b32.xlu1 %v2474_v35, %s2017_s28 }
 0x1b8   :  { %1015 = vrot.lane.b32.xlu0 %v2478_v40, %s2017_s28 }
 0x1ba   :  { %1069 = vrot.lane.b32.xlu1 %v2472_v25, %s2018_s29 }
 0x1bc   :  { %1071 = vrot.lane.b32.xlu0 %v2480_v13, %s2018_s29 }
 0x1be   :  { %1085 = vrot.lane.b32.xlu1 %v2474_v35, %s2018_s29 }
 0x1c0   :  { %1087 = vrot.lane.b32.xlu0 %v2478_v40, %s2018_s29 }
 0x1c2   :  { %1141 = vrot.lane.b32.xlu1 %v2472_v25, %s2019_s30 }
 0x1c4   :  { %1143 = vrot.lane.b32.xlu0 %v2480_v13, %s2019_s30 }
 0x1c6   :  { %1157 = vrot.lane.b32.xlu1 %v2474_v35, %s2019_s30 }
 0x1c8   :  { %1159 = vrot.lane.b32.xlu0 %v2478_v40, %s2019_s30 }
 0x1ca   :  { %1213 = vrot.lane.b32.xlu1 %v2472_v25, %s2021_s13 }
 0x1cc   :  { %1215 = vrot.lane.b32.xlu0 %v2480_v13, %s2021_s13 }
 0x1ce   :  { %1229 = vrot.lane.b32.xlu1 %v2474_v35, %s2021_s13 }
 0x1d0   :  { %1231 = vrot.lane.b32.xlu0 %v2478_v40, %s2021_s13 }
 0x1d2   :  { %709 = vrot.lane.b32.xlu1 %v2565_v1, %s2015_s26 }
 0x1d4   :  { %711 = vrot.lane.b32.xlu0 %v2569_v14, %s2015_s26 }
 0x1d6   :  { %725 = vrot.lane.b32.xlu1 %v2574_v19, %s2015_s26 }
 0x1d8   :  { %727 = vrot.lane.b32.xlu0 %v2578_v24, %s2015_s26 }
 0x1da   :  { %781 = vrot.lane.b32.xlu1 %v2565_v1, %s2013_s25 }
 0x1dc   :  { %783 = vrot.lane.b32.xlu0 %v2569_v14, %s2013_s25 }
 0x1de   :  { %797 = vrot.lane.b32.xlu1 %v2574_v19, %s2013_s25 }
 0x1e0   :  { %799 = vrot.lane.b32.xlu0 %v2578_v24, %s2013_s25 }
 0x1e2   :  { %853 = vrot.lane.b32.xlu1 %v2565_v1, %s2014_s1 }
 0x1e4   :  { %855 = vrot.lane.b32.xlu0 %v2569_v14, %s2014_s1 }
 0x1e6   :  { %869 = vrot.lane.b32.xlu1 %v2574_v19, %s2014_s1 }
 0x1e8   :  { %871 = vrot.lane.b32.xlu0 %v2578_v24, %s2014_s1 }
 0x1ea   :  { %925 = vrot.lane.b32.xlu1 %v2565_v1, %s2016_s27 }
 0x1ec   :  { %927 = vrot.lane.b32.xlu0 %v2569_v14, %s2016_s27 }
 0x1ee   :  { %941 = vrot.lane.b32.xlu1 %v2574_v19, %s2016_s27 }
 0x1f0   :  { %943 = vrot.lane.b32.xlu0 %v2578_v24, %s2016_s27 }
 0x1f2   :  { %1005 = vrot.lane.b32.xlu1 %v2565_v1, %s2017_s28 }
 0x1f4   :  { %1007 = vrot.lane.b32.xlu0 %v2569_v14, %s2017_s28 }
 0x1f6   :  { %1021 = vrot.lane.b32.xlu1 %v2574_v19, %s2017_s28 }
 0x1f8   :  { %1023 = vrot.lane.b32.xlu0 %v2578_v24, %s2017_s28 }
 0x1fa   :  { %1077 = vrot.lane.b32.xlu1 %v2565_v1, %s2018_s29 }
 0x1fc   :  { %1079 = vrot.lane.b32.xlu0 %v2569_v14, %s2018_s29 }
 0x1fe   :  { %1093 = vrot.lane.b32.xlu1 %v2574_v19, %s2018_s29 }
 0x200   :  { %1095 = vrot.lane.b32.xlu0 %v2578_v24, %s2018_s29 }
 0x202   :  { %1149 = vrot.lane.b32.xlu1 %v2565_v1, %s2019_s30 }
 0x204   :  { %1151 = vrot.lane.b32.xlu0 %v2569_v14, %s2019_s30  ;;  %v2632_v27 = vpop.permute.xlu1 %701 }
 0x206   :  { %v2634_v16 = vpop.permute.xlu0 %703  ;;  %1165 = vrot.lane.b32.xlu1 %v2574_v19, %s2019_s30 }
 0x208   :  { %1167 = vrot.lane.b32.xlu0 %v2578_v24, %s2019_s30  ;;  %v2642_v42 = vpop.permute.xlu1 %717 }
 0x20a   :  { %v2646_v37 = vpop.permute.xlu0 %719  ;;  %1221 = vrot.lane.b32.xlu1 %v2565_v1, %s2021_s13 }
 0x20c   :  { %1223 = vrot.lane.b32.xlu0 %v2569_v14, %s2021_s13  ;;  %v2656_v22 = vpop.permute.xlu1 %773 }
 0x20e   :  { %v2662_v20 = vpop.permute.xlu0 %775  ;;  %705 = vrot.lane.b32.xlu1 %v2650_v4, %s2015_s26 }
 0x210   :  { %707 = vrot.lane.b32.xlu0 %v2658_v61, %s2015_s26  ;;  %v2670_v3 = vpop.permute.xlu1 %789 }
 0x212   :  { %v2674_v34 = vpop.permute.xlu0 %791  ;;  %721 = vrot.lane.b32.xlu1 %v2666_v7, %s2015_s26 }
 0x214   :  { %723 = vrot.lane.b32.xlu0 %v2672_v21, %s2015_s26  ;;  %v2680_v55 = vpop.permute.xlu1 %845 }
 0x216   :  { %v2682_v45 = vpop.permute.xlu0 %847  ;;  %777 = vrot.lane.b32.xlu1 %v2650_v4, %s2013_s25 }
 0x218   :  { %779 = vrot.lane.b32.xlu0 %v2658_v61, %s2013_s25  ;;  %v2688_v12 = vpop.permute.xlu1 %861 }
 0x21a   :  { %v2690_v52 = vpop.permute.xlu0 %863  ;;  %793 = vrot.lane.b32.xlu1 %v2666_v7, %s2013_s25 }
 0x21c   :  { %795 = vrot.lane.b32.xlu0 %v2672_v21, %s2013_s25  ;;  %v2696_v38 = vpop.permute.xlu1 %917 }
 0x21e   :  { %v2698_v8 = vpop.permute.xlu0 %919  ;;  %849 = vrot.lane.b32.xlu1 %v2650_v4, %s2014_s1 }
 0x220   :  { %851 = vrot.lane.b32.xlu0 %v2658_v61, %s2014_s1  ;;  %v2704_v26 = vpop.permute.xlu1 %933 }
 0x222   :  { %v2706_v5 = vpop.permute.xlu0 %935  ;;  %865 = vrot.lane.b32.xlu1 %v2666_v7, %s2014_s1 }
 0x224   :  { %867 = vrot.lane.b32.xlu0 %v2672_v21, %s2014_s1  ;;  %v2712_v17 = vpop.permute.xlu1 %997 }
 0x225   :  { %4188 = vst [vmem:[#allocation33_spill] sm:$0xff] %v2712_v17  ;;  %v1287_v17 = vld [vmem:[%s4040_s9] sm:$0xff] }
 0x226   :  { %v2714_v18 = vpop.permute.xlu0 %999  ;;  %921 = vrot.lane.b32.xlu1 %v2650_v4, %s2016_s27 }
 0x227   :  { %4189 = vst [vmem:[#allocation34_spill] sm:$0xff] %v2714_v18 }
 0x228   :  { %923 = vrot.lane.b32.xlu0 %v2658_v61, %s2016_s27  ;;  %v2720_v49 = vpop.permute.xlu1 %1013 }
 0x229   :  { %4190 = vst [vmem:[#allocation35_spill] sm:$0xff] %v2720_v49  ;;  %v1473_v49 = vld [vmem:[%s4041_s4] sm:$0xf] }
 0x22a   :  { %v2722_v63 = vpop.permute.xlu0 %1015  ;;  %937 = vrot.lane.b32.xlu1 %v2666_v7, %s2016_s27 }
 0x22b   :  { %4191 = vst [vmem:[#allocation36_spill] sm:$0xff] %v2722_v63 }
 0x22c   :  { %939 = vrot.lane.b32.xlu0 %v2672_v21, %s2016_s27  ;;  %v2728_v62 = vpop.permute.xlu1 %1069 }
 0x22d   :  { %4192 = vst [vmem:[#allocation37_spill] sm:$0xff] %v2728_v62 }
 0x22e   :  { %v2730_v35 = vpop.permute.xlu0 %1071  ;;  %1001 = vrot.lane.b32.xlu1 %v2650_v4, %s2017_s28 }
 0x22f   :  { %4193 = vst [vmem:[#allocation38_spill] sm:$0xff] %v2730_v35 }
 0x230   :  { %1003 = vrot.lane.b32.xlu0 %v2658_v61, %s2017_s28  ;;  %v2736_v40 = vpop.permute.xlu1 %1085 }
 0x231   :  { %4194 = vst [vmem:[#allocation39_spill] sm:$0xff] %v2736_v40 }
 0x232   :  { %v2738_v25 = vpop.permute.xlu0 %1087  ;;  %1017 = vrot.lane.b32.xlu1 %v2666_v7, %s2017_s28 }
 0x233   :  { %4195 = vst [vmem:[#allocation40_spill] sm:$0xff] %v2738_v25 }
 0x234   :  { %1019 = vrot.lane.b32.xlu0 %v2672_v21, %s2017_s28  ;;  %v2744_v13 = vpop.permute.xlu1 %1141 }
 0x235   :  { %4196 = vst [vmem:[#allocation41_spill] sm:$0xff] %v2744_v13 }
 0x236   :  { %v2746_v9 = vpop.permute.xlu0 %1143  ;;  %1073 = vrot.lane.b32.xlu1 %v2650_v4, %s2018_s29 }
 0x237   :  { %4197 = vst [vmem:[#allocation42_spill] sm:$0xff] %v2746_v9  ;;  %v626_v9 = vadd.f32 %v2494_v48, %v2622_v59 }
 0x238   :  { %1075 = vrot.lane.b32.xlu0 %v2658_v61, %s2018_s29  ;;  %v2752_v11 = vpop.permute.xlu1 %1157 }
 0x239   :  { %4198 = vst [vmem:[#allocation43_spill] sm:$0xff] %v2752_v11  ;;  %v630_v11 = vadd.f32 %v2504_v2, %v2626_v33  ;;  %v683_v2 = vadd.f32 %v2506_v0, %v2626_v33 }
 0x23a   :  { %v2754_v10 = vpop.permute.xlu0 %1159  ;;  %1089 = vrot.lane.b32.xlu1 %v2666_v7, %s2018_s29 }
 0x23b   :  { %4199 = vst [vmem:[#allocation44_spill] sm:$0xff] %v2754_v10  ;;  %v2787_v25 = vmax.f32 %v630_v11, 0.0  ;;  %v2811_v56 = vmax.f32 %v683_v2, 0.0 }
 0x23c   :  { %1091 = vrot.lane.b32.xlu0 %v2672_v21, %s2018_s29  ;;  %v2760_v6 = vpop.permute.xlu1 %1213 }
 0x23d   :  { %4200 = vst [vmem:[#allocation45_spill] sm:$0xff] %v2760_v6  ;;  %v679_v6 = vadd.f32 %v2496_v50, %v2622_v59 }
 0x23e   :  { %v2762_v13 = vpop.permute.xlu0 %1215  ;;  %1145 = vrot.lane.b32.xlu1 %v2650_v4, %s2019_s30 }
 0x23f   :  { %4201 = vst [vmem:[#allocation46_spill] sm:$0xff] %v2762_v13  ;;  %v2778_v13 = vmax.f32 %v626_v9, 0.0  ;;  %v2796_v50 = vmax.f32 %v679_v6, 0.0 }
 0x240   :  { %1147 = vrot.lane.b32.xlu0 %v2658_v61, %s2019_s30  ;;  %v2770_v10 = vpop.permute.xlu1 %1229 }
 0x241   :  { %4202 = vst [vmem:[#allocation47_spill] sm:$0xff] %v2770_v10 }
 0x242   :  { %v2774_v40 = vpop.permute.xlu0 %1231  ;;  %1161 = vrot.lane.b32.xlu1 %v2666_v7, %s2019_s30 }
 0x243   :  { %4203 = vst [vmem:[#allocation48_spill] sm:$0xff] %v2774_v40 }
 0x244   :  { %1163 = vrot.lane.b32.xlu0 %v2672_v21, %s2019_s30  ;;  %v710_v48 = vpop.permute.xlu1 %709 }
 0x245   :  { %v741_v10 = vsel %vm60_vm1, %v2632_v27, %v710_v48 }
 0x246   :  { %v712_v40 = vpop.permute.xlu0 %711  ;;  %713 = vrot.lane.b32.xlu1 %v2778_v13, %s2015_s26  ;;  %v750_v59 = vmul.f32 %v741_v10, %v2248_v41  ;;  %v737_v10 = vsel %vm60_vm1, %v710_v48, %v2642_v42 }
 0x247   :  { %v742_v9 = vsel %vm60_vm1, %v2634_v16, %v712_v40  ;;  %v738_v11 = vsel %vm60_vm1, %v712_v40, %v2646_v37 }
 0x248   :  { %v754_v62 = vmul.f32 %v742_v9, %v2248_v41  ;;  %715 = vrot.lane.b32.xlu0 %v2787_v25, %s2015_s26  ;;  %v726_v0 = vpop.permute.xlu1 %725  ;;  %v755_v35 = vmul.f32 %v738_v11, %v2262_v47 }
 0x249   :  { %v733_v33 = vsel %vm60_vm1, %v2642_v42, %v726_v0  ;;  %v745_v6 = vsel %vm60_vm1, %v726_v0, %v2632_v27 }
 0x24a   :  { %v728_v40 = vpop.permute.xlu0 %727  ;;  %729 = vrot.lane.b32.xlu1 %v2796_v50, %s2015_s26  ;;  %v766_v9 = vpack.c.bf16 %v754_v62, %v750_v59  ;;  %v749_v58 = vmul.f32 %v745_v6, %v2259_v46  ;;  %v752_v2 = vmul.f32 %v733_v33, %v2268_v51  ;;  %v751_v59 = vmul.f32 %v737_v10, %v2262_v47 }
 0x24b   :  { %v734_v57 = vsel %vm60_vm1, %v2646_v37, %v728_v40  ;;  %v746_v27 = vsel %vm60_vm1, %v728_v40, %v2634_v16 }
 0x24c   :  { %v753_v42 = vmul.f32 %v746_v27, %v2259_v46  ;;  %v756_v48 = vmul.f32 %v734_v57, %v2268_v51  ;;  %731 = vrot.lane.b32.xlu0 %v2811_v56, %s2015_s26  ;;  %1307 = vmatprep.subr.bf16.mxu0 %v766_v9  ;;  %v2831_v62 = vpop.permute.xlu1 %781  ;;  %v767_v0 = vpack.c.bf16 %v755_v35, %v751_v59 }
 0x24e   :  { %v765_v11 = vpack.c.bf16 %v753_v42, %v749_v58  ;;  %v2834_v37 = vpop.permute.xlu0 %783  ;;  %785 = vrot.lane.b32.xlu1 %v2778_v13, %s2013_s25  ;;  %v768_v16 = vpack.c.bf16 %v756_v48, %v752_v2 }
 0x250   :  { %787 = vrot.lane.b32.xlu0 %v2787_v25, %s2013_s25  ;;  %1308 = vmatpush1.bf16.msra.mxu0 %v765_v11  ;;  %v2840_v57 = vpop.permute.xlu1 %797 }
 0x251   :  { %1389 = vmatprep.subr.bf16.mxu1 %v768_v16 }
 0x252   :  { %1390 = vmatpush1.bf16.msra.mxu1 %v767_v0  ;;  %v2842_v33 = vpop.permute.xlu0 %799  ;;  %801 = vrot.lane.b32.xlu1 %v2796_v50, %s2013_s25 }
 0x254   :  { %803 = vrot.lane.b32.xlu0 %v2811_v56, %s2013_s25  ;;  %v2848_v58 = vpop.permute.xlu1 %853 }
 0x256   :  { %v2850_v6 = vpop.permute.xlu0 %855  ;;  %857 = vrot.lane.b32.xlu1 %v2778_v13, %s2014_s1 }
 0x258   :  { %859 = vrot.lane.b32.xlu0 %v2787_v25, %s2014_s1  ;;  %v2856_v35 = vpop.permute.xlu1 %869 }
 0x25a   :  { %v2858_v10 = vpop.permute.xlu0 %871  ;;  %873 = vrot.lane.b32.xlu1 %v2796_v50, %s2014_s1 }
 0x25c   :  { %875 = vrot.lane.b32.xlu0 %v2811_v56, %s2014_s1  ;;  %v2864_v40 = vpop.permute.xlu1 %925 }
 0x25e   :  { %v2866_v9 = vpop.permute.xlu0 %927  ;;  %929 = vrot.lane.b32.xlu1 %v2778_v13, %s2016_s27 }
 0x260   :  { %931 = vrot.lane.b32.xlu0 %v2787_v25, %s2016_s27  ;;  %v2872_v27 = vpop.permute.xlu1 %941 }
 0x261   :  { %4204 = vst [vmem:[#allocation49_spill] sm:$0xff] %v2872_v27 }
 0x262   :  { %v2874_v2 = vpop.permute.xlu0 %943  ;;  %945 = vrot.lane.b32.xlu1 %v2796_v50, %s2016_s27 }
 0x263   :  { %4205 = vst [vmem:[#allocation50_spill] sm:$0xff] %v2874_v2 }
 0x264   :  { %947 = vrot.lane.b32.xlu0 %v2811_v56, %s2016_s27  ;;  %v2880_v42 = vpop.permute.xlu1 %1005 }
 0x265   :  { %4206 = vst [vmem:[#allocation51_spill] sm:$0xff] %v2880_v42 }
 0x266   :  { %v2882_v48 = vpop.permute.xlu0 %1007  ;;  %1237 = vrot.lane.b32.xlu1 %v2574_v19, %s2021_s13 }
 0x267   :  { %4207 = vst [vmem:[#allocation52_spill] sm:$0xff] %v2882_v48 }
 0x268   :  { %1239 = vrot.lane.b32.xlu0 %v2578_v24, %s2021_s13  ;;  %v2888_v59 = vpop.permute.xlu1 %1021 }
 0x269   :  { %4208 = vst [vmem:[#allocation53_spill] sm:$0xff] %v2888_v59 }
 0x26a   :  { %v2890_v11 = vpop.permute.xlu0 %1023  ;;  %1009 = vrot.lane.b32.xlu1 %v2778_v13, %s2017_s28 }
 0x26b   :  { %4209 = vst [vmem:[#allocation54_spill] sm:$0xff] %v2890_v11 }
 0x26c   :  { %1219 = vrot.lane.b32.xlu0 %v2658_v61, %s2021_s13  ;;  %v2896_v16 = vpop.permute.xlu1 %1077 }
 0x26d   :  { %4210 = vst [vmem:[#allocation55_spill] sm:$0xff] %v2896_v16 }
 0x26e   :  { %v2898_v0 = vpop.permute.xlu0 %1079  ;;  %1025 = vrot.lane.b32.xlu1 %v2796_v50, %s2017_s28 }
 0x26f   :  { %4211 = vst [vmem:[#allocation56_spill] sm:$0xff] %v2898_v0 }
 0x270   :  { %1011 = vrot.lane.b32.xlu0 %v2787_v25, %s2017_s28  ;;  %v2904_v18 = vpop.permute.xlu1 %1093 }
 0x271   :  { %4212 = vst [vmem:[#allocation57_spill] sm:$0xff] %v2904_v18 }
 0x272   :  { %v2906_v59 = vpop.permute.xlu0 %1095  ;;  %1081 = vrot.lane.b32.xlu1 %v2778_v13, %s2018_s29 }
 0x273   :  { %4213 = vst [vmem:[#allocation58_spill] sm:$0xff] %v2906_v59 }
 0x274   :  { %1027 = vrot.lane.b32.xlu0 %v2811_v56, %s2017_s28  ;;  %v2912_v11 = vpop.permute.xlu1 %1149 }
 0x275   :  { %4214 = vst [vmem:[#allocation59_spill] sm:$0xff] %v2912_v11 }
 0x276   :  { %v2914_v16 = vpop.permute.xlu0 %1151  ;;  %1097 = vrot.lane.b32.xlu1 %v2796_v50, %s2018_s29 }
 0x277   :  { %4215 = vst [vmem:[#allocation60_spill] sm:$0xff] %v2914_v16  ;;  %v2933_v16 = vld [vmem:[%s4039_s8] sm:$0xff] }
 0x278   :  { %1083 = vrot.lane.b32.xlu0 %v2787_v25, %s2018_s29  ;;  %v2920_v0 = vpop.permute.xlu1 %1165  ;;  %4219 = vst [vmem:[#allocation64_spill] sm:$0xff] %v2933_v16  ;;  %v1972_v11 = vcombine.high %v2933_v16, %v2933_v16 }
 0x279   :  { %4216 = vst [vmem:[#allocation61_spill] sm:$0xff] %v2920_v0 }
 0x27a   :  { %v2922_v18 = vpop.permute.xlu0 %1167  ;;  %1153 = vrot.lane.b32.xlu1 %v2778_v13, %s2019_s30  ;;  %1339 = vmatprep.mubr.bf16.mxu0 %v1972_v11 }
 0x27b   :  { %4217 = vst [vmem:[#allocation62_spill] sm:$0xff] %v2922_v18  ;;  %1421 = vmatprep.mubr.bf16.mxu1 %v1972_v11 }
 0x27c   :  { %1099 = vrot.lane.b32.xlu0 %v2811_v56, %s2018_s29  ;;  %v2928_v59 = vpop.permute.xlu1 %1221 }
 0x27d   :  { %4218 = vst [vmem:[#allocation63_spill] sm:$0xff] %v2928_v59 }
 0x27e   :  { %v2937_v48 = vpop.permute.xlu0 %1223  ;;  %1169 = vrot.lane.b32.xlu1 %v2796_v50, %s2019_s30 }
 0x27f   :  { %4220 = vst [vmem:[#allocation65_spill] sm:$0xff] %v2937_v48 }
 0x280   :  { %1155 = vrot.lane.b32.xlu0 %v2787_v25, %s2019_s30  ;;  %v2943_v18 = vpop.permute.xlu1 %705 }
 0x282   :  { %v2945_v59 = vpop.permute.xlu0 %707  ;;  %1217 = vrot.lane.b32.xlu1 %v2650_v4, %s2021_s13 }
 0x284   :  { %1171 = vrot.lane.b32.xlu0 %v2811_v56, %s2019_s30  ;;  %v2951_v16 = vpop.permute.xlu1 %721 }
 0x286   :  { %v2953_v48 = vpop.permute.xlu0 %723  ;;  %1225 = vrot.lane.b32.xlu1 %v2778_v13, %s2021_s13 }
 0x288   :  { %1235 = vrot.lane.b32.xlu0 %v2672_v21, %s2021_s13  ;;  %v2959_v11 = vpop.permute.xlu1 %777 }
 0x289   :  { %4221 = vst [vmem:[#allocation66_spill] sm:$0xff] %v2959_v11 }
 0x28a   :  { %v2961_v0 = vpop.permute.xlu0 %779  ;;  %1233 = vrot.lane.b32.xlu1 %v2666_v7, %s2021_s13 }
 0x28b   :  { %4222 = vst [vmem:[#allocation67_spill] sm:$0xff] %v2961_v0 }
 0x28c   :  { %1227 = vrot.lane.b32.xlu0 %v2787_v25, %s2021_s13  ;;  %v2967_v63 = vpop.permute.xlu1 %793 }
 0x28d   :  { %4223 = vst [vmem:[#allocation68_spill] sm:$0xff] %v2967_v63 }
 0x28e   :  { %v2969_v43 = vpop.permute.xlu0 %795  ;;  %1241 = vrot.lane.b32.xlu1 %v2796_v50, %s2021_s13 }
 0x28f   :  { %4224 = vst [vmem:[#allocation69_spill] sm:$0xff] %v2969_v43 }
 0x290   :  { %1243 = vrot.lane.b32.xlu0 %v2811_v56, %s2021_s13  ;;  %v2978_v42 = vpop.permute.xlu1 %849 }
 0x291   :  { %4225 = vst [vmem:[#allocation70_spill] sm:$0xff] %v2978_v42 }
 0x292   :  { %v2983_v2 = vpop.permute.xlu0 %851  ;;  %1290 = vperm.xlu1 %2003, %v1287_v17  }
 0x293   :  { %4226 = vst [vmem:[#allocation71_spill] sm:$0xff] %v2983_v2 }
 0x294   :  { %1476 = vperm.xlu0 %2002, %v1473_v49   ;;  %v2988_v63 = vpop.permute.xlu1 %865 }
 0x295   :  { %4227 = vst [vmem:[#allocation72_spill] sm:$0xff] %v2988_v63 }
 0x296   :  { %v2990_v54 = vpop.permute.xlu0 %867  ;;  %1491 = vperm.xlu1 %2003, %v1488_v28  }
 0x297   :  { %4228 = vst [vmem:[#allocation73_spill] sm:$0xff] %v2990_v54 }
 0x298   :  { %v2992_v43 = vpop.permute.xlu1 %921 }
 0x29a   :  { %v2994_v42 = vpop.permute.xlu0 %923 }
 0x29c   :  { %v2996_v0 = vpop.permute.xlu1 %937 }
 0x29d   :  { %4229 = vst [vmem:[#allocation74_spill] sm:$0xff] %v2996_v0  ;;  %v810_v0 = vsel %vm103_vm0, %v2834_v37, %v2674_v34 }
 0x29e   :  { %v2998_v27 = vpop.permute.xlu0 %939 }
 0x29f   :  { %4230 = vst [vmem:[#allocation75_spill] sm:$0xff] %v2998_v27 }
 0x2a0   :  { %v3000_v2 = vpop.permute.xlu1 %1001 }
 0x2a1   :  { %4231 = vst [vmem:[#allocation76_spill] sm:$0xff] %v3000_v2  ;;  %v809_v2 = vsel %vm103_vm0, %v2831_v62, %v2670_v3 }
 0x2a2   :  { %v3002_v17 = vpop.permute.xlu0 %1003 }
 0x2a3   :  { %4232 = vst [vmem:[#allocation77_spill] sm:$0xff] %v3002_v17 }
 0x2a4   :  { %v3004_v11 = vpop.permute.xlu1 %1017 }
 0x2a5   :  { %4233 = vst [vmem:[#allocation78_spill] sm:$0xff] %v3004_v11 }
 0x2a6   :  { %v3006_v49 = vpop.permute.xlu0 %1019 }
 0x2a7   :  { %4234 = vst [vmem:[#allocation79_spill] sm:$0xff] %v3006_v49  ;;  %v806_v49 = vsel %vm103_vm0, %v2674_v34, %v2842_v33  ;;  %v886_v34 = vsel %vm147_vm2, %v2682_v45, %v2850_v6 }
 0x2a8   :  { %v3008_v63 = vpop.permute.xlu1 %1073 }
 0x2a9   :  { %4235 = vst [vmem:[#allocation80_spill] sm:$0xff] %v3008_v63  ;;  %v818_v63 = vsel %vm103_vm0, %v2842_v33, %v2662_v20 }
 0x2aa   :  { %v3010_v54 = vpop.permute.xlu0 %1075 }
 0x2ab   :  { %4236 = vst [vmem:[#allocation81_spill] sm:$0xff] %v3010_v54  ;;  %v813_v54 = vsel %vm103_vm0, %v2656_v22, %v2831_v62  ;;  %v885_v62 = vsel %vm147_vm2, %v2680_v55, %v2848_v58 }
 0x2ac   :  { %v3012_v28 = vpop.permute.xlu1 %1089  ;;  %v3067_v11 = vmul.f32 %v813_v54, %v2224_v30  ;;  %v805_v54 = vsel %vm103_vm0, %v2670_v3, %v2840_v57 }
 0x2ad   :  { %4237 = vst [vmem:[#allocation82_spill] sm:$0xff] %v3012_v28  ;;  %v3037_v28 = vmul.f32 %v810_v0, %v2227_v31  ;;  %v3054_v0 = vmul.f32 %v809_v2, %v2227_v31  ;;  %v817_v2 = vsel %vm103_vm0, %v2840_v57, %v2656_v22  ;;  %v881_v22 = vsel %vm147_vm2, %v2848_v58, %v2688_v12 }
 0x2ae   :  { %v3018_v27 = vpop.permute.xlu0 %1091  ;;  %v3112_v57 = vmul.f32 %v817_v2, %v2207_v23  ;;  %v877_v58 = vsel %vm147_vm2, %v2688_v12, %v2856_v35  ;;  %v878_v2 = vsel %vm147_vm2, %v2690_v52, %v2858_v10 }
 0x2af   :  { %4238 = vst [vmem:[#allocation83_spill] sm:$0xff] %v3018_v27  ;;  %v814_v27 = vsel %vm103_vm0, %v2662_v20, %v2834_v37  ;;  %v882_v20 = vsel %vm147_vm2, %v2850_v6, %v2690_v52  ;;  %v3096_v6 = vmul.f32 %v806_v49, %v2220_v29  ;;  %v3115_v49 = vmul.f32 %v886_v34, %v2239_v36 }
 0x2b0   :  { %v3024_v17 = vpop.permute.xlu1 %1145  ;;  %v3070_v37 = vmul.f32 %v814_v27, %v2224_v30  ;;  %v3089_v27 = vmul.f32 %v818_v63, %v2207_v23  ;;  %v890_v63 = vsel %vm147_vm2, %v2858_v10, %v2682_v45  ;;  %v3126_v45 = vmul.f32 %v805_v54, %v2220_v29 }
 0x2b1   :  { %4239 = vst [vmem:[#allocation84_spill] sm:$0xff] %v3024_v17 }
 0x2b2   :  { %v3045_v17 = vpop.permute.xlu0 %1147  ;;  %v838_v12 = vpack.c.bf16 %v3070_v37, %v3067_v11  ;;  %v3154_v11 = vmul.f32 %v877_v58, %v2245_v39  ;;  %v953_v58 = vsel %vm191_vm3, %v2864_v40, %v2704_v26 }
 0x2b3   :  { %4240 = vst [vmem:[#allocation85_spill] sm:$0xff] %v3045_v17  ;;  %v3103_v17 = vmul.f32 %v882_v20, %v2254_v44  ;;  %v889_v20 = vsel %vm147_vm2, %v2856_v35, %v2680_v55  ;;  %v3140_v55 = vmul.f32 %v885_v62, %v2239_v36  ;;  %v3143_v35 = vmul.f32 %v890_v63, %v2230_v32 }
 0x2b4   :  { %v3080_v33 = vpop.permute.xlu1 %1161  ;;  %v3151_v10 = vmul.f32 %v889_v20, %v2230_v32  ;;  %v840_v62 = vpack.c.bf16 %v3096_v6, %v3126_v45  ;;  %v957_v63 = vsel %vm191_vm3, %v2696_v38, %v2864_v40  ;;  %v954_v6 = vsel %vm191_vm3, %v2866_v9, %v2706_v5 }
 0x2b5   :  { %4241 = vst [vmem:[#allocation86_spill] sm:$0xff] %v3080_v33  ;;  %v3202_v4 = vmul.f32 %v954_v6, %v2281_v60  ;;  %v3216_v6 = vmul.f32 %v953_v58, %v2281_v60 }
 0x2b6   :  { %v3109_v3 = vpop.permute.xlu0 %1163 }
 0x2b7   :  { %4242 = vst [vmem:[#allocation87_spill] sm:$0xff] %v3109_v3  ;;  %v3129_v3 = vmul.f32 %v881_v22, %v2254_v44  ;;  %v3159_v22 = vmul.f32 %v878_v2, %v2245_v39 }
 0x2b8   :  { %v714_v34 = vpop.permute.xlu1 %713 }
 0x2b9   :  { %v743_v54 = vsel %vm60_vm1, %v2943_v18, %v714_v34  ;;  %v739_v40 = vsel %vm60_vm1, %v714_v34, %v2951_v16 }
 0x2ba   :  { %v716_v37 = vpop.permute.xlu0 %715  ;;  %v758_v45 = vmul.f32 %v743_v54, %v2248_v41 }
 0x2bb   :  { %v744_v20 = vsel %vm60_vm1, %v2945_v59, %v716_v37  ;;  %v740_v2 = vsel %vm60_vm1, %v716_v37, %v2953_v48  ;;  %v3192_v37 = vmul.f32 %v957_v63, %v2272_v53 }
 0x2bc   :  { %v762_v52 = vmul.f32 %v744_v20, %v2248_v41  ;;  %v730_v33 = vpop.permute.xlu1 %729  ;;  %v958_v20 = vsel %vm191_vm3, %v2698_v8, %v2866_v9  ;;  %v763_v61 = vmul.f32 %v740_v2, %v2262_v47 }
 0x2bd   :  { %v735_v21 = vsel %vm60_vm1, %v2951_v16, %v730_v33  ;;  %v747_v54 = vsel %vm60_vm1, %v730_v33, %v2943_v18 }
 0x2be   :  { %v732_v7 = vpop.permute.xlu0 %731  ;;  %v770_v41 = vpack.c.bf16 %v762_v52, %v758_v45  ;;  %v757_v9 = vmul.f32 %v747_v54, %v2259_v46  ;;  %v760_v63 = vmul.f32 %v735_v21, %v2268_v51  ;;  %v759_v45 = vmul.f32 %v739_v40, %v2262_v47  ;;  %v4245_v47 = vld [vmem:[#allocation67_spill] sm:$0xff] }
 0x2bf   :  { %v736_v18 = vsel %vm60_vm1, %v2953_v48, %v732_v7  ;;  %v748_v33 = vsel %vm60_vm1, %v732_v7, %v2945_v59  ;;  %v4243_v48 = vld [vmem:[#allocation66_spill] sm:$0xff]  ;;  %v3225_v21 = vmul.f32 %v958_v20, %v2272_v53  ;;  %v4244_v59 = vld [vmem:[#allocation49_spill] sm:$0xff]  ;;  %v983_v40 = vpack.c.bf16 %v3202_v4, %v3216_v6 }
 0x2c0   :  { %v761_v16 = vmul.f32 %v748_v33, %v2259_v46  ;;  %v764_v34 = vmul.f32 %v736_v18, %v2268_v51  ;;  %1309 = vmatprep.subr.bf16.mxu0 %v770_v41  ;;  %v786_v52 = vpop.permute.xlu1 %785  ;;  %v961_v41 = vsel %vm191_vm3, %v4244_v59, %v2696_v38  ;;  %v949_v33 = vsel %vm191_vm3, %v2704_v26, %v4244_v59  ;;  %v4246_v46 = vld [vmem:[#allocation69_spill] sm:$0xff]  ;;  %v4248_v26 = vld [vmem:[#allocation68_spill] sm:$0xff]  ;;  %v4280_v6 = vld [vmem:[#allocation58_spill] sm:$0xff] }
 0x2c1   :  { %v815_v2 = vsel %vm103_vm0, %v4243_v48, %v786_v52  ;;  %v771_v7 = vpack.c.bf16 %v763_v61, %v759_v45 }
 0x2c2   :  { %v769_v54 = vpack.c.bf16 %v761_v16, %v757_v9  ;;  %v788_v58 = vpop.permute.xlu0 %787  ;;  %v772_v18 = vpack.c.bf16 %v764_v34, %v760_v63  ;;  %v830_v51 = vmul.f32 %v815_v2, %v2224_v30  ;;  %v4247_v16 = vld [vmem:[#allocation7_spill] sm:$0xff]  ;;  %v4249_v2 = vld [vmem:[#allocation8_spill] sm:$0xff] }
 0x2c3   :  { %v816_v20 = vsel %vm103_vm0, %v4245_v47, %v788_v58  ;;  %v812_v38 = vsel %vm103_vm0, %v788_v58, %v4246_v46  ;;  %v3246_v34 = vmul.f32 %v961_v41, %v4247_v16  ;;  %v3255_v59 = vmul.f32 %v949_v33, %v4249_v2 }
 0x2c4   :  { %v834_v9 = vmul.f32 %v816_v20, %v2224_v30  ;;  %1310 = vmatpush1.bf16.msra.mxu0 %v769_v54  ;;  %1391 = vmatprep.subr.bf16.mxu1 %v772_v18  ;;  %v802_v63 = vpop.permute.xlu1 %801  ;;  %v4250_v54 = vld [vmem:[#allocation50_spill] sm:$0xff]  ;;  %v811_v41 = vsel %vm103_vm0, %v786_v52, %v4248_v26 }
 0x2c5   :  { %v807_v61 = vsel %vm103_vm0, %v4248_v26, %v802_v63  ;;  %v819_v45 = vsel %vm103_vm0, %v802_v63, %v4243_v48  ;;  %1311 = vmatprep.subr.bf16.mxu0 %v838_v12  ;;  %1392 = vmatpush1.bf16.msra.mxu1 %v771_v7  ;;  %v962_v58 = vsel %vm191_vm3, %v4250_v54, %v2698_v8  ;;  %v4252_v63 = vld [vmem:[#allocation70_spill] sm:$0xff] }
 0x2c6   :  { %v804_v18 = vpop.permute.xlu0 %803  ;;  %1393 = vmatprep.subr.bf16.mxu1 %v840_v62  ;;  %v842_v20 = vpack.c.bf16 %v834_v9, %v830_v51  ;;  %v950_v12 = vsel %vm191_vm3, %v2706_v5, %v4250_v54  ;;  %v835_v48 = vmul.f32 %v812_v38, %v2227_v31  ;;  %v829_v52 = vmul.f32 %v819_v45, %v2207_v23 }
 0x2c7   :  { %v808_v7 = vsel %vm103_vm0, %v4246_v46, %v804_v18  ;;  %v820_v8 = vsel %vm103_vm0, %v804_v18, %v4245_v47  ;;  %v832_v62 = vmul.f32 %v807_v61, %v2220_v29  ;;  %v4251_v5 = vpack.c.bf16 %v3089_v27, %v3112_v57 }
 0x2c8   :  { %v833_v51 = vmul.f32 %v820_v8, %v2207_v23  ;;  %v836_v33 = vmul.f32 %v808_v7, %v2220_v29  ;;  %v858_v38 = vpop.permute.xlu1 %857  ;;  %v3283_v9 = vmul.f32 %v962_v58, %v4247_v16  ;;  %v831_v46 = vmul.f32 %v811_v41, %v2227_v31  ;;  %v4254_v58 = vld [vmem:[#allocation35_spill] sm:$0xff] }
 0x2c9   :  { %1312 = vmatpush1.bf16.msra.mxu0 %v4251_v5  ;;  %v887_v47 = vsel %vm147_vm2, %v4252_v63, %v858_v38  ;;  %v4253_v26 = vpack.c.bf16 %v3037_v28, %v3054_v0  ;;  %v3293_v61 = vmul.f32 %v950_v12, %v4249_v2  ;;  %v982_v54 = vpack.c.bf16 %v3225_v21, %v3192_v37  ;;  %v4255_v41 = vld [vmem:[#allocation51_spill] sm:$0xff] }
 0x2ca   :  { %1313 = vmatprep.subr.bf16.mxu0 %v842_v20  ;;  %v841_v27 = vpack.c.bf16 %v833_v51, %v829_v52  ;;  %v860_v57 = vpop.permute.xlu0 %859  ;;  %v844_v45 = vpack.c.bf16 %v836_v33, %v832_v62  ;;  %v1033_v18 = vsel %vm239_vm7, %v4255_v41, %v4254_v58  ;;  %v4256_v20 = vld [vmem:[#allocation33_spill] sm:$0xff]  ;;  %v843_v0 = vpack.c.bf16 %v835_v48, %v831_v46  ;;  %v4257_v7 = vld [vmem:[#allocation71_spill] sm:$0xff]  ;;  %v4259_v33 = vld [vmem:[#allocation72_spill] sm:$0xff] }
 0x2cb   :  { %1394 = vmatpush1.bf16.msra.mxu1 %v4253_v26  ;;  %v1037_v28 = vsel %vm239_vm7, %v4256_v20, %v4255_v41  ;;  %v888_v12 = vsel %vm147_vm2, %v4257_v7, %v860_v57  ;;  %v902_v8 = vmul.f32 %v887_v47, %v2239_v36  ;;  %v4258_v52 = vld [vmem:[#allocation73_spill] sm:$0xff]  ;;  %v981_v51 = vpack.c.bf16 %v3283_v9, %v3246_v34 }
 0x2cc   :  { %v884_v37 = vsel %vm147_vm2, %v860_v57, %v4258_v52  ;;  %v906_v21 = vmul.f32 %v888_v12, %v2239_v36  ;;  %1395 = vmatprep.subr.bf16.mxu1 %v844_v45  ;;  %v874_v62 = vpop.permute.xlu1 %873  ;;  %v4260_v46 = vpack.c.bf16 %v3115_v49, %v3140_v55  ;;  %v4261_v47 = vld [vmem:[#allocation9_spill] sm:$0xff]  ;;  %v4263_v57 = vld [vmem:[#allocation52_spill] sm:$0xff]  ;;  %v883_v9 = vsel %vm147_vm2, %v858_v38, %v4259_v33  ;;  %v4265_v55 = vld [vmem:[#allocation34_spill] sm:$0xff] }
 0x2cd   :  { %1314 = vmatpush1.bf16.msra.mxu0 %v841_v27  ;;  %v879_v48 = vsel %vm147_vm2, %v4259_v33, %v874_v62  ;;  %v891_v5 = vsel %vm147_vm2, %v874_v62, %v4252_v63  ;;  %v3325_v26 = vmul.f32 %v1037_v28, %v4261_v47  ;;  %v4262_v27 = vld [vmem:[#allocation36_spill] sm:$0xff]  ;;  %v4264_v63 = vpack.c.bf16 %v3159_v22, %v3154_v11  ;;  %v4267_v62 = vld [vmem:[#allocation11_spill] sm:$0xff] }
 0x2ce   :  { %1315 = vmatprep.subr.bf16.mxu0 %v4260_v46  ;;  %v1034_v34 = vsel %vm239_vm7, %v4263_v57, %v4262_v27  ;;  %v876_v45 = vpop.permute.xlu0 %875  ;;  %v914_v49 = vpack.c.bf16 %v906_v21, %v902_v8  ;;  %v1038_v41 = vsel %vm239_vm7, %v4265_v55, %v4263_v57  ;;  %v907_v28 = vmul.f32 %v884_v37, %v2254_v44 }
 0x2cf   :  { %1396 = vmatpush1.bf16.msra.mxu1 %v843_v0  ;;  %v880_v0 = vsel %vm147_vm2, %v4258_v52, %v876_v45  ;;  %v892_v38 = vsel %vm147_vm2, %v876_v45, %v4257_v7  ;;  %v901_v12 = vmul.f32 %v891_v5, %v2230_v32  ;;  %v904_v11 = vmul.f32 %v879_v48, %v2245_v39 }
 0x2d0   :  { %1397 = vmatprep.subr.bf16.mxu1 %v4264_v63  ;;  %v905_v22 = vmul.f32 %v892_v38, %v2230_v32  ;;  %v908_v8 = vmul.f32 %v880_v0, %v2245_v39  ;;  %v4266_v21 = vpack.c.bf16 %v3143_v35, %v3151_v10  ;;  %v930_v37 = vpop.permute.xlu1 %929  ;;  %v3356_v33 = vmul.f32 %v1033_v18, %v4267_v62  ;;  %v4310_v38 = vld [vmem:[#allocation29_spill] sm:$0xff] }
 0x2d1   :  { %v903_v52 = vmul.f32 %v883_v9, %v2254_v44  ;;  %v959_v7 = vsel %vm191_vm3, %v2992_v43, %v930_v37  ;;  %v4268_v48 = vpack.c.bf16 %v3103_v17, %v3129_v3  ;;  %v3366_v5 = vmul.f32 %v1038_v41, %v4261_v47  ;;  %v4269_v9 = vld [vmem:[#allocation53_spill] sm:$0xff] }
 0x2d2   :  { %1316 = vmatpush1.bf16.msra.mxu0 %v4266_v21  ;;  %v913_v35 = vpack.c.bf16 %v905_v22, %v901_v12  ;;  %v932_v10 = vpop.permute.xlu0 %931  ;;  %v916_v46 = vpack.c.bf16 %v908_v8, %v904_v11  ;;  %v984_v18 = vpack.c.bf16 %v3293_v61, %v3255_v59  ;;  %v3371_v57 = vmul.f32 %v1034_v34, %v4267_v62  ;;  %v4271_v34 = vld [vmem:[#allocation74_spill] sm:$0xff] }
 0x2d3   :  { %1317 = vmatprep.subr.bf16.mxu0 %v914_v49  ;;  %1398 = vmatpush1.bf16.msra.mxu1 %v4268_v48  ;;  %v1029_v45 = vsel %vm239_vm7, %v4254_v58, %v4269_v9  ;;  %v915_v63 = vpack.c.bf16 %v907_v28, %v903_v52  ;;  %v960_v17 = vsel %vm191_vm3, %v2994_v42, %v932_v10  ;;  %v4270_v49 = vld [vmem:[#allocation75_spill] sm:$0xff]  ;;  %v4272_v12 = vld [vmem:[#allocation54_spill] sm:$0xff] }
 0x2d4   :  { %v974_v3 = vmul.f32 %v959_v7, %v2272_v53  ;;  %v956_v41 = vsel %vm191_vm3, %v932_v10, %v4270_v49  ;;  %v978_v59 = vmul.f32 %v960_v17, %v2272_v53  ;;  %1399 = vmatprep.subr.bf16.mxu1 %v916_v46  ;;  %v946_v61 = vpop.permute.xlu1 %945  ;;  %v1041_v58 = vsel %vm239_vm7, %v4269_v9, %v4256_v20  ;;  %v4274_v46 = vld [vmem:[#allocation56_spill] sm:$0xff] }
 0x2d5   :  { %v951_v28 = vsel %vm191_vm3, %v4271_v34, %v946_v61  ;;  %v963_v0 = vsel %vm191_vm3, %v946_v61, %v2992_v43  ;;  %v1030_v11 = vsel %vm239_vm7, %v4262_v27, %v4272_v12  ;;  %v955_v20 = vsel %vm191_vm3, %v930_v37, %v4271_v34  ;;  %v4279_v34 = vld [vmem:[#allocation40_spill] sm:$0xff] }
 0x2d6   :  { %1318 = vmatpush1.bf16.msra.mxu0 %v913_v35  ;;  %v948_v22 = vpop.permute.xlu0 %947  ;;  %v986_v8 = vpack.c.bf16 %v978_v59, %v974_v3  ;;  %v1042_v43 = vsel %vm239_vm7, %v4272_v12, %v4265_v55  ;;  %v973_v37 = vmul.f32 %v963_v0, %v4247_v16  ;;  %v976_v52 = vmul.f32 %v951_v28, %v4249_v2  ;;  %v4273_v35 = vld [vmem:[#allocation12_spill] sm:$0xff]  ;;  %v4278_v59 = vld [vmem:[#allocation37_spill] sm:$0xff]  ;;  %v4281_v0 = vld [vmem:[#allocation39_spill] sm:$0xff] }
 0x2d7   :  { %1319 = vmatprep.subr.bf16.mxu0 %v982_v54  ;;  %1400 = vmatpush1.bf16.msra.mxu1 %v915_v63  ;;  %v979_v54 = vmul.f32 %v956_v41, %v2281_v60  ;;  %v952_v21 = vsel %vm191_vm3, %v4270_v49, %v948_v22  ;;  %v964_v27 = vsel %vm191_vm3, %v948_v22, %v2994_v42  ;;  %v4277_v41 = vld [vmem:[#allocation55_spill] sm:$0xff] }
 0x2d8   :  { %1401 = vmatprep.subr.bf16.mxu1 %v984_v18  ;;  %v977_v7 = vmul.f32 %v964_v27, %v4247_v16  ;;  %v980_v48 = vmul.f32 %v952_v21, %v4249_v2  ;;  %v3419_v55 = vpop.permute.xlu1 %1237  ;;  %v3422_v10 = vmul.f32 %v1029_v45, %v4273_v35  ;;  %v4275_v18 = vld [vmem:[#allocation38_spill] sm:$0xff]  ;;  %v975_v42 = vmul.f32 %v955_v20, %v2281_v60  ;;  %v4283_v21 = vld [vmem:[#allocation57_spill] sm:$0xff] }
 0x2d9   :  { %v1110_v9 = vsel %vm283_vm8, %v4275_v18, %v4274_v46  ;;  %v3433_v63 = vmul.f32 %v1030_v11, %v4273_v35  ;;  %v1109_v61 = vsel %vm283_vm8, %v4278_v59, %v4277_v41  ;;  %v1106_v4 = vsel %vm283_vm8, %v4274_v46, %v4279_v34  ;;  %v4282_v11 = vld [vmem:[#allocation13_spill] sm:$0xff]  ;;  %v4286_v46 = vld [vmem:[#allocation16_spill] sm:$0xff] }
 0x2da   :  { %1320 = vmatpush1.bf16.msra.mxu0 %v981_v51  ;;  %v4276_v51 = vld [vmem:[#allocation10_spill] sm:$0xff]  ;;  %v985_v45 = vpack.c.bf16 %v977_v7, %v973_v37  ;;  %v3438_v3 = vpop.permute.xlu0 %1239  ;;  %v988_v49 = vpack.c.bf16 %v980_v48, %v976_v52  ;;  %v987_v28 = vpack.c.bf16 %v979_v54, %v975_v42  ;;  %v1105_v12 = vsel %vm283_vm8, %v4277_v41, %v4281_v0  ;;  %v4285_v7 = vld [vmem:[#allocation15_spill] sm:$0xff] }
 0x2db   :  { %1321 = vmatprep.subr.bf16.mxu0 %v986_v8  ;;  %1402 = vmatpush1.bf16.msra.mxu1 %v983_v40  ;;  %v3436_v17 = vmul.f32 %v1042_v43, %v4276_v51  ;;  %v1102_v40 = vsel %vm283_vm8, %v4279_v34, %v4280_v6  ;;  %v3457_v20 = vmul.f32 %v1110_v9, %v4282_v11  ;;  %v4288_v9 = vld [vmem:[#allocation14_spill] sm:$0xff]  ;;  %v4293_v34 = vld [vmem:[#allocation25_spill] sm:$0xff] }
 0x2dc   :  { %v1114_v22 = vsel %vm283_vm8, %v4280_v6, %v4275_v18  ;;  %1403 = vmatprep.subr.bf16.mxu1 %v988_v49  ;;  %v1010_v8 = vpop.permute.xlu1 %1009  ;;  %v1048_v43 = vmul.f32 %v1041_v58, %v4276_v51  ;;  %v1101_v54 = vsel %vm283_vm8, %v4281_v0, %v4283_v21  ;;  %v4284_v27 = vpack.c.bf16 %v2569_v14, %v2565_v1  ;;  %v4290_v49 = vld [vmem:[#allocation41_spill] sm:$0xff]  ;;  %v4296_v0 = vld [vmem:[#allocation42_spill] sm:$0xff] }
 0x2dd   :  { %v1062_v37 = vpack.c.bf16 %v3371_v57, %v3356_v33  ;;  %v3474_v52 = vmul.f32 %v1109_v61, %v4282_v11  ;;  %v3477_v48 = vmul.f32 %v1106_v4, %v4285_v7  ;;  %v1113_v58 = vsel %vm283_vm8, %v4283_v21, %v4278_v59  ;;  %v4292_v61 = vld [vmem:[#allocation28_spill] sm:$0xff]  ;;  %v4309_v59 = vld [vmem:[#allocation30_spill] sm:$0xff] }
 0x2de   :  { %1322 = vmatpush1.bf16.msra.mxu0 %v985_v45  ;;  %v3484_v18 = vmul.f32 %v1102_v40, %v4286_v46  ;;  %v3486_v1 = vpop.permute.xlu0 %1219  ;;  %v4287_v14 = vpack.c.bf16 %v2578_v24, %v2574_v19  ;;  %v1063_v33 = vpack.c.bf16 %v3433_v63, %v3422_v10  ;;  %v3494_v57 = vmul.f32 %v1105_v12, %v4285_v7  ;;  %v4289_v45 = vld [vmem:[#allocation59_spill] sm:$0xff] }
 0x2df   :  { %1323 = vmatprep.subr.bf16.mxu0 %v4284_v27  ;;  %1404 = vmatpush1.bf16.msra.mxu1 %v987_v28  ;;  %v3497_v42 = vmul.f32 %v1114_v22, %v4288_v9  ;;  %v1181_v41 = vsel %vm327_vm9, %v4290_v49, %v4289_v45  ;;  %v3506_v19 = vmul.f32 %v1101_v54, %v4286_v46  ;;  %v4291_v24 = vld [vmem:[#allocation43_spill] sm:$0xff]  ;;  %v4295_v28 = vld [vmem:[#allocation60_spill] sm:$0xff]  ;;  %v4297_v22 = vld [vmem:[#allocation78_spill] sm:$0xff] }
 0x2e0   :  { %1405 = vmatprep.subr.bf16.mxu1 %v4287_v14  ;;  %v1177_v10 = vsel %vm327_vm9, %v4289_v45, %v4291_v24  ;;  %v1026_v63 = vpop.permute.xlu1 %1025  ;;  %v4294_v4 = vpack.c.bf16 %v4292_v61, %v4293_v34  ;;  %v1064_v6 = vpack.c.bf16 %v3436_v17, %v1048_v43  ;;  %v3517_v40 = vmul.f32 %v1113_v58, %v4288_v9  ;;  %v4299_v27 = vld [vmem:[#allocation27_spill] sm:$0xff]  ;;  %v4300_v14 = vld [vmem:[#allocation26_spill] sm:$0xff]  ;;  %v4302_v43 = vld [vmem:[#allocation17_spill] sm:$0xff] }
 0x2e1   :  { %v1182_v12 = vsel %vm327_vm9, %v4296_v0, %v4295_v28  ;;  %v1035_v21 = vsel %vm239_vm7, %v1010_v8, %v4297_v22  ;;  %v4298_v54 = vpack.c.bf16 %v2787_v25, %v2778_v13  ;;  %v4301_v45 = vpack.c.bf16 %v4299_v27, %v4300_v14  ;;  %v4303_v61 = vld [vmem:[#allocation44_spill] sm:$0xff]  ;;  %v4306_v14 = vld [vmem:[#allocation79_spill] sm:$0xff] }
 0x2e2   :  { %1324 = vmatpush1.bf16.msra.mxu0 %v4294_v4  ;;  %v3535_v58 = vmul.f32 %v1181_v41, %v4302_v43  ;;  %v1178_v34 = vsel %vm327_vm9, %v4295_v28, %v4303_v61  ;;  %v1012_v4 = vpop.permute.xlu0 %1011  ;;  %v4304_v25 = vpack.c.bf16 %v2811_v56, %v2796_v50  ;;  %v1134_v13 = vpack.c.bf16 %v3477_v48, %v3494_v57  ;;  %v4308_v50 = vld [vmem:[#allocation76_spill] sm:$0xff] }
 0x2e3   :  { %1325 = vmatprep.subr.bf16.mxu0 %v4298_v54  ;;  %1406 = vmatpush1.bf16.msra.mxu1 %v4301_v45  ;;  %v4305_v54 = vld [vmem:[#allocation19_spill] sm:$0xff]  ;;  %v1036_v41 = vsel %vm239_vm7, %v1012_v4, %v4306_v14  ;;  %v4307_v45 = vld [vmem:[#allocation77_spill] sm:$0xff]  ;;  %v1136_v28 = vpack.c.bf16 %v3497_v42, %v3517_v40  ;;  %v3558_v56 = vmul.f32 %v1182_v12, %v4302_v43  ;;  %v4312_v40 = vld [vmem:[#allocation32_spill] sm:$0xff] }
 0x2e4   :  { %1407 = vmatprep.subr.bf16.mxu1 %v4304_v25  ;;  %v3547_v27 = vmul.f32 %v1177_v10, %v4305_v54  ;;  %v1040_v17 = vsel %vm239_vm7, %v4307_v45, %v1012_v4  ;;  %v1039_v48 = vsel %vm239_vm7, %v4308_v50, %v1010_v8  ;;  %v1054_v57 = vmul.f32 %v1035_v21, %v4267_v62  ;;  %v1082_v25 = vpop.permute.xlu1 %1081  ;;  %v4313_v12 = vld [vmem:[#allocation31_spill] sm:$0xff] }
 0x2e5   :  { %v1058_v10 = vmul.f32 %v1036_v41, %v4267_v62  ;;  %v4311_v2 = vpack.c.bf16 %v4309_v59, %v4310_v38  ;;  %v3569_v4 = vmul.f32 %v1178_v34, %v4305_v54  ;;  %v1031_v42 = vsel %vm239_vm7, %v4297_v22, %v1026_v63  ;;  %v4315_v41 = vld [vmem:[#allocation61_spill] sm:$0xff] }
 0x2e6   :  { %v1043_v8 = vsel %vm239_vm7, %v1026_v63, %v4308_v50  ;;  %v4314_v21 = vpack.c.bf16 %v4312_v40, %v4313_v12  ;;  %v1185_v38 = vsel %vm327_vm9, %v4315_v41, %v4290_v49  ;;  %v1057_v59 = vmul.f32 %v1040_v17, %v4261_v47  ;;  %v1028_v22 = vpop.permute.xlu0 %1027 }
 0x2e7   :  { %1326 = vmatpush1.bf16.msra.mxu0 %v4311_v2  ;;  %v1173_v2 = vsel %vm327_vm9, %v4291_v24, %v4315_v41  ;;  %v1066_v63 = vpack.c.bf16 %v1058_v10, %v1054_v57  ;;  %v1053_v50 = vmul.f32 %v1039_v48, %v4261_v47  ;;  %v1032_v24 = vsel %vm239_vm7, %v4306_v14, %v1028_v22  ;;  %v4318_v48 = vld [vmem:[#allocation20_spill] sm:$0xff] }
 0x2e8   :  { %1327 = vmatprep.subr.bf16.mxu0 %v1062_v37  ;;  %1408 = vmatpush1.bf16.msra.mxu1 %v4314_v21  ;;  %v4316_v37 = vld [vmem:[#allocation62_spill] sm:$0xff]  ;;  %v1044_v49 = vsel %vm239_vm7, %v1028_v22, %v4307_v45  ;;  %v1055_v17 = vmul.f32 %v1031_v42, %v4273_v35  ;;  %v1059_v57 = vmul.f32 %v1032_v24, %v4273_v35  ;;  %v1098_v40 = vpop.permute.xlu1 %1097  ;;  %v4323_v14 = vld [vmem:[#allocation80_spill] sm:$0xff] }
 0x2e9   :  { %1409 = vmatprep.subr.bf16.mxu1 %v1064_v6  ;;  %v1174_v34 = vsel %vm327_vm9, %v4303_v61, %v4316_v37  ;;  %v1056_v6 = vmul.f32 %v1043_v8, %v4276_v51  ;;  %v1060_v10 = vmul.f32 %v1044_v49, %v4276_v51  ;;  %v4317_v61 = vpack.c.bf16 %v3366_v5, %v3325_v26  ;;  %v4319_v45 = vld [vmem:[#allocation82_spill] sm:$0xff]  ;;  %v4321_v49 = vld [vmem:[#allocation83_spill] sm:$0xff] }
 0x2ea   :  { %v3610_v12 = vmul.f32 %v1173_v2, %v4318_v48  ;;  %v1107_v42 = vsel %vm283_vm8, %v1082_v25, %v4319_v45  ;;  %v1186_v8 = vsel %vm327_vm9, %v4316_v37, %v4296_v0  ;;  %v1065_v21 = vpack.c.bf16 %v1057_v59, %v1053_v50  ;;  %v1084_v5 = vpop.permute.xlu0 %1083  ;;  %v4320_v22 = vld [vmem:[#allocation18_spill] sm:$0xff] }
 0x2eb   :  { %1328 = vmatpush1.bf16.msra.mxu0 %v4317_v61  ;;  %v1067_v26 = vpack.c.bf16 %v1059_v57, %v1055_v17  ;;  %v1068_v41 = vpack.c.bf16 %v1060_v10, %v1056_v6  ;;  %v1192_v24 = vmul.f32 %v1185_v38, %v4320_v22  ;;  %v3621_v2 = vmul.f32 %v1174_v34, %v4318_v48  ;;  %v4325_v6 = vld [vmem:[#allocation63_spill] sm:$0xff] }
 0x2ec   :  { %1329 = vmatprep.subr.bf16.mxu0 %v1066_v63  ;;  %1410 = vmatpush1.bf16.msra.mxu1 %v1063_v33  ;;  %v1108_v61 = vsel %vm283_vm8, %v1084_v5, %v4321_v49  ;;  %v4322_v63 = vld [vmem:[#allocation81_spill] sm:$0xff]  ;;  %v1111_v0 = vsel %vm283_vm8, %v4323_v14, %v1082_v25  ;;  %v1126_v59 = vmul.f32 %v1107_v42, %v4285_v7  ;;  %v1154_v38 = vpop.permute.xlu1 %1153  ;;  %v4324_v25 = vld [vmem:[#allocation47_spill] sm:$0xff] }
 0x2ed   :  { %v1112_v33 = vsel %vm283_vm8, %v4322_v63, %v1084_v5  ;;  %v1130_v37 = vmul.f32 %v1108_v61, %v4285_v7  ;;  %1411 = vmatprep.subr.bf16.mxu1 %v1068_v41  ;;  %v1196_v34 = vmul.f32 %v1186_v8, %v4320_v22  ;;  %v1103_v50 = vsel %vm283_vm8, %v4319_v45, %v1098_v40  ;;  %v4326_v45 = vld [vmem:[#allocation45_spill] sm:$0xff] }
 0x2ee   :  { %v1115_v17 = vsel %vm283_vm8, %v1098_v40, %v4323_v14  ;;  %v1249_v57 = vsel %vm371_vm10, %v4325_v6, %v4324_v25  ;;  %v1129_v10 = vmul.f32 %v1112_v33, %v4282_v11  ;;  %v1100_v42 = vpop.permute.xlu0 %1099  ;;  %v3652_v40 = vsel %vm371_vm10, %v4326_v45, %v4325_v6  ;;  %v4328_v33 = vld [vmem:[#allocation86_spill] sm:$0xff] }
 0x2ef   :  { %1330 = vmatpush1.bf16.msra.mxu0 %v1065_v21  ;;  %v1138_v8 = vpack.c.bf16 %v1130_v37, %v1126_v59  ;;  %v1206_v21 = vpack.c.bf16 %v3569_v4, %v3547_v27  ;;  %v1104_v14 = vsel %vm283_vm8, %v4321_v49, %v1100_v42  ;;  %v1128_v27 = vmul.f32 %v1115_v17, %v4288_v9  ;;  %v4330_v37 = vld [vmem:[#allocation48_spill] sm:$0xff] }
 0x2f0   :  { %1331 = vmatprep.subr.bf16.mxu0 %v1134_v13  ;;  %1412 = vmatpush1.bf16.msra.mxu1 %v1067_v26  ;;  %v1125_v13 = vmul.f32 %v1111_v0, %v4282_v11  ;;  %v1127_v26 = vmul.f32 %v1103_v50, %v4286_v46  ;;  %v1131_v4 = vmul.f32 %v1104_v14, %v4286_v46  ;;  %v1170_v41 = vpop.permute.xlu1 %1169  ;;  %v4331_v50 = vld [vmem:[#allocation65_spill] sm:$0xff] }
 0x2f1   :  { %1413 = vmatprep.subr.bf16.mxu1 %v1136_v28  ;;  %v1116_v28 = vsel %vm283_vm8, %v1100_v42, %v4322_v63  ;;  %v4327_v61 = vpack.c.bf16 %v3457_v20, %v3474_v52  ;;  %v1207_v49 = vpack.c.bf16 %v3621_v2, %v3610_v12  ;;  %v1179_v63 = vsel %vm327_vm9, %v1154_v38, %v4328_v33  ;;  %v4332_v12 = vld [vmem:[#allocation46_spill] sm:$0xff] }
 0x2f2   :  { %v1132_v5 = vmul.f32 %v1116_v28, %v4288_v9  ;;  %v4329_v0 = vpack.c.bf16 %v3484_v18, %v3506_v19  ;;  %v1208_v59 = vpack.c.bf16 %v1196_v34, %v1192_v24  ;;  %v1250_v17 = vsel %vm371_vm10, %v4331_v50, %v4330_v37  ;;  %v1156_v6 = vpop.permute.xlu0 %1155  ;;  %v4333_v19 = vld [vmem:[#allocation87_spill] sm:$0xff]  ;;  %v4334_v34 = vld [vmem:[#allocation85_spill] sm:$0xff] }
 0x2f3   :  { %1332 = vmatpush1.bf16.msra.mxu0 %v4327_v61  ;;  %v1137_v20 = vpack.c.bf16 %v1129_v10, %v1125_v13  ;;  %v1139_v52 = vpack.c.bf16 %v1131_v4, %v1127_v26  ;;  %v1254_v2 = vsel %vm371_vm10, %v4332_v12, %v4331_v50  ;;  %v1258_v18 = vsel %vm371_vm10, %v3438_v3, %v4332_v12 }
 0x2f4   :  { %1333 = vmatprep.subr.bf16.mxu0 %v1138_v8  ;;  %1414 = vmatpush1.bf16.msra.mxu1 %v4329_v0  ;;  %v1140_v42 = vpack.c.bf16 %v1132_v5, %v1128_v27  ;;  %v1180_v24 = vsel %vm327_vm9, %v1156_v6, %v4333_v19  ;;  %v1184_v10 = vsel %vm327_vm9, %v4334_v34, %v1156_v6  ;;  %v4335_v8 = vld [vmem:[#allocation84_spill] sm:$0xff]  ;;  %v1218_v26 = vpop.permute.xlu1 %1217  ;;  %v4336_v27 = vld [vmem:[#allocation23_spill] sm:$0xff] }
 0x2f5   :  { %v1183_v13 = vsel %vm327_vm9, %v4335_v8, %v1154_v38  ;;  %v1198_v14 = vmul.f32 %v1179_v63, %v4305_v54  ;;  %v1202_v28 = vmul.f32 %v1180_v24, %v4305_v54  ;;  %v1266_v4 = vmul.f32 %v1250_v17, %v4336_v27  ;;  %v4337_v17 = vld [vmem:[#allocation22_spill] sm:$0xff] }
 0x2f6   :  { %1415 = vmatprep.subr.bf16.mxu1 %v1140_v42  ;;  %v1175_v5 = vsel %vm327_vm9, %v4328_v33, %v1170_v41  ;;  %v1187_v61 = vsel %vm327_vm9, %v1170_v41, %v4335_v8  ;;  %v1257_v38 = vsel %vm371_vm10, %v3419_v55, %v4326_v45  ;;  %v1246_v63 = vsel %vm371_vm10, %v4330_v37, %v3438_v3  ;;  %v1172_v50 = vpop.permute.xlu0 %1171 }
 0x2f7   :  { %1334 = vmatpush1.bf16.msra.mxu0 %v1137_v20  ;;  %v1201_v0 = vmul.f32 %v1184_v10, %v4302_v43  ;;  %v1210_v33 = vpack.c.bf16 %v1202_v28, %v1198_v14  ;;  %v1268_v20 = vmul.f32 %v1258_v18, %v4337_v17  ;;  %v1176_v41 = vsel %vm327_vm9, %v4333_v19, %v1172_v50  ;;  %v4339_v18 = vld [vmem:[#allocation21_spill] sm:$0xff]  ;;  %v4340_v28 = vld [vmem:[#allocation24_spill] sm:$0xff] }
 0x2f8   :  { %1335 = vmatprep.subr.bf16.mxu0 %v1206_v21  ;;  %1416 = vmatpush1.bf16.msra.mxu1 %v1139_v52  ;;  %v1197_v21 = vmul.f32 %v1183_v13, %v4302_v43  ;;  %v1188_v45 = vsel %vm327_vm9, %v1172_v50, %v4334_v34  ;;  %v1199_v52 = vmul.f32 %v1175_v5, %v4318_v48  ;;  %v1226_v6 = vpop.permute.xlu1 %1225  ;;  %v4341_v5 = vld [vmem:[#allocation64_spill] sm:$0xff] }
 0x2f9   :  { %1417 = vmatprep.subr.bf16.mxu1 %v1208_v59  ;;  %v1200_v3 = vmul.f32 %v1187_v61, %v4320_v22  ;;  %v1203_v37 = vmul.f32 %v1176_v41, %v4318_v48  ;;  %v1204_v59 = vmul.f32 %v1188_v45, %v4320_v22  ;;  %v4338_v42 = vpack.c.bf16 %v3558_v56, %v3535_v58 }
 0x2fa   :  { %v1262_v12 = vmul.f32 %v1249_v57, %v4336_v27  ;;  %v1265_v19 = vmul.f32 %v1254_v2, %v4339_v18  ;;  %v1245_v24 = vsel %vm371_vm10, %v4324_v25, %v3419_v55  ;;  %v1264_v34 = vmul.f32 %v1257_v38, %v4337_v17  ;;  %v1236_v13 = vpop.permute.xlu0 %1235 }
 0x2fb   :  { %1336 = vmatpush1.bf16.msra.mxu0 %v4338_v42  ;;  %v1209_v10 = vpack.c.bf16 %v1201_v0, %v1197_v21  ;;  %v1211_v8 = vpack.c.bf16 %v1203_v37, %v1199_v52  ;;  %v1212_v14 = vpack.c.bf16 %v1204_v59, %v1200_v3  ;;  %v1267_v58 = vmul.f32 %v1246_v63, %v4340_v28 }
 0x2fc   :  { %1337 = vmatprep.subr.bf16.mxu0 %v1210_v33  ;;  %1418 = vmatpush1.bf16.msra.mxu1 %v1207_v49  ;;  %v1278_v56 = vpack.c.bf16 %v1266_v4, %v1262_v12  ;;  %v1971_v57 = vcombine.low %v4341_v5, %v4341_v5  ;;  %v1261_v2 = vmul.f32 %v3652_v40, %v4339_v18  ;;  %v1234_v25 = vpop.permute.xlu1 %1233  ;;  %v4342_v37 = vmov 0  }
 0x2fd   :  { %v1255_v55 = vsel %vm371_vm10, %v1218_v26, %v1226_v6  ;;  %1419 = vmatprep.subr.bf16.mxu1 %v1212_v14  ;;  %v1280_v49 = vpack.c.bf16 %v1268_v20, %v1264_v34  ;;  %v1263_v61 = vmul.f32 %v1245_v24, %v4340_v28  ;;  %v1251_v38 = vsel %vm371_vm10, %v1226_v6, %v1234_v25 }
 0x2fe   :  { %v1277_v4 = vpack.c.bf16 %v1265_v19, %v1261_v2  ;;  %v1228_v63 = vpop.permute.xlu0 %1227  ;;  %v1269_v40 = vmul.f32 %v1255_v55, %v4339_v18  ;;  %v1270_v20 = vmul.f32 %v1251_v38, %v4336_v27  ;;  %v1472_v38 = vld [vmem:[%s4043_s0 + $0x8] sm:$0xff] }
 0x2ff   :  { %1338 = vmatpush1.bf16.msra.mxu0 %v1209_v10  ;;  %v1279_v0 = vpack.c.bf16 %v1267_v58, %v1263_v61  ;;  %v1252_v50 = vsel %vm371_vm10, %v1228_v63, %v1236_v13  ;;  %v1256_v33 = vsel %vm371_vm10, %v3486_v1, %v1228_v63 }
 0x300   :  { %1348 = vmatprep.subr.bf16.mxu0 %v1278_v56  ;;  %1420 = vmatpush1.bf16.msra.mxu1 %v1211_v8  ;;  %v1273_v21 = vmul.f32 %v1256_v33, %v4339_v18  ;;  %v1274_v41 = vmul.f32 %v1252_v50, %v4336_v27  ;;  %v1242_v45 = vpop.permute.xlu1 %1241 }
 0x301   :  { %1430 = vmatprep.subr.bf16.mxu1 %v1280_v49  ;;  %v1247_v52 = vsel %vm371_vm10, %v1234_v25, %v1242_v45  ;;  %v1259_v3 = vsel %vm371_vm10, %v1242_v45, %v1218_v26  ;;  %v1471_v49 = vld [vmem:[%s4043_s0] sm:$0xff] }
 0x302   :  { %1340 = vmatmul.mubr.bf16.vlgmr.msra.gmra.mrb[8].mxu0 %v1971_v57  ;;  %v1281_v59 = vpack.c.bf16 %v1273_v21, %v1269_v40  ;;  %v1244_v6 = vpop.permute.xlu0 %1243  ;;  %v1282_v42 = vpack.c.bf16 %v1274_v41, %v1270_v20  ;;  %v1271_v24 = vmul.f32 %v1247_v52, %v4340_v28  ;;  %v1272_v34 = vmul.f32 %v1259_v3, %v4337_v17 }
 0x303   :  { %1422 = vmatmul.mubr.bf16.vlgmr.msra.gmra.mrb[8].mxu1 %v1971_v57  ;;  %1349 = vmatpush1.bf16.msra.mxu0 %v1277_v4  ;;  %v1248_v12 = vsel %vm371_vm10, %v1236_v13, %v1244_v6  ;;  %v1260_v19 = vsel %vm371_vm10, %v1244_v6, %v3486_v1  ;;  %v2010_v13 = vld [vmem:[%s4039_s8 + $0x8] ss:$0 sps:$4 sm:$0xff]   ;;  %v2022_v1 = vmov 839922192   ;;  %v4343_v57 = vld [vmem:[#allocation2_spill] sm:$0xff] }
 0x304   :  { %1431 = vmatpush1.bf16.msra.mxu1 %v1279_v0  ;;  %1380 = vmatprep.mubr.bf16.mxu0 %v4342_v37  ;;  %v1275_v26 = vmul.f32 %v1248_v12, %v4340_v28  ;;  %v1276_v10 = vmul.f32 %v1260_v19, %v4337_v17  ;;  %v1479_v58 = vunpack.c.l.s4 %v2022_v1 }
 0x305   :  { %1462 = vmatprep.mubr.bf16.mxu1 %v4342_v37  ;;  %1350 = vmatprep.subr.bf16.mxu0 %v1282_v42 }
 0x306   :  { %v1283_v8 = vpack.c.bf16 %v1275_v26, %v1271_v24  ;;  %v1284_v14 = vpack.c.bf16 %v1276_v10, %v1272_v34  ;;  %v1480_v56 = vunpack.c.0.s8 %v1479_v58 }
 0x307   :  { %1351 = vmatpush1.bf16.msra.mxu0 %v1281_v59 }
 0x308   :  { %1432 = vmatprep.subr.bf16.mxu1 %v1284_v14  ;;  %v1483_v2 = vsub.s32 %v1480_v56, %v4343_v57 }
 0x309   :  { %1433 = vmatpush1.bf16.msra.mxu1 %v1283_v8 }
 0x30e   :  { %1974 = vmatmul.mubr.msk.bf16.vlgmr.msra.gmra.mrb[8].mxu0 %vm1303_vm12, %v2010_v13 }
 0x30f   :  { %1975 = vmatmul.mubr.msk.bf16.vlgmr.msra.gmra.mrb[8].mxu1 %vm1303_vm12, %v2010_v13  ;;  %1898 = vmatprep.mubr.bf16.mxu0 %v4342_v37 }
 0x310   :  { %1939 = vmatprep.mubr.bf16.mxu1 %v4342_v37 }
 0x311   :  { %v1291_v5 = vpop.permute.xlu1 %1290 }
 0x313   :  { %v1477_v55 = vpop.permute.xlu0 %1476 }
 0x314   :  { %v1484_v25 = vrot.slane %v1477_v55, %v1483_v2 }
 0x315   :  { %v1492_v61 = vpop.permute.xlu1 %1491 }
 0x316   :  { %v1486_v50 = vmul.f32 %v1484_v25, %v1471_v49  ;;  %v1499_v33 = vrot.slane %v1492_v61, %v1483_v2  ;;  %v1487_v52 = vmul.f32 %v1484_v25, %v1472_v38  ;;  %v1848_v38 = vld [vmem:[%s4044_s11] sm:$0xff] }
 0x318   :  { %v1501_v10 = vadd.f32 %v1499_v33, %v1486_v50  ;;  %v1502_v14 = vadd.f32 %v1499_v33, %v1487_v52 }
 0x3e1   :  { %v1382_v4 = vpop.f32.mrb[8].mxu0 }
 0x3e2   :  { %v1980_v63 = vadd.f32 %v1382_v4, %v1291_v5  ;;  %v1384_v0 = vpop.f32.mrb[9].mxu0  ;;  %v1464_v40 = vpop.f32.mrb[8].mxu1 }
 0x3e3   :  { %v1981_v20 = vadd.f32 %v1384_v0, %v1291_v5  ;;  %v1982_v21 = vadd.f32 %v1464_v40, %v1291_v5  ;;  %v1386_v41 = vpop.f32.mrb[10].mxu0  ;;  %v1466_v45 = vpop.f32.mrb[9].mxu1 }
 0x3e4   :  { %v1503_v3 = vadd.f32 1.0, %v1980_v63  ;;  %v1983_v37 = vadd.f32 %v1466_v45, %v1291_v5  ;;  %v1387_v59 = vpop.f32.mrb[11].mxu0  ;;  %v1468_v6 = vpop.f32.mrb[10].mxu1 }
 0x3e5   :  { %v1504_v42 = vadd.f32 1.0, %v1981_v20  ;;  %v1521_v12 = vcombine.high %v1980_v63, %v1981_v20  ;;  %v1505_v19 = vadd.f32 1.0, %v1982_v21  ;;  %v1469_v24 = vpop.f32.mrb[11].mxu1 }
 0x3e6   :  { %v1506_v34 = vadd.f32 1.0, %v1983_v37  ;;  %v1522_v26 = vcombine.high %v1982_v21, %v1983_v37 }
 0x3e7   :  { %v1511_v8 = vcombine.low %v1503_v3, %v1504_v42 }
 0x3e8   :  { %v1512_v13 = vcombine.low %v1505_v19, %v1506_v34 }
 0x3e9   :  { %v1515_v1 = vmul.f32 %v1511_v8, %v1501_v10 }
 0x3ea   :  { %v1516_v58 = vmul.f32 %v1512_v13, %v1502_v14  ;;  %v4344_v14 = vld [vmem:[#allocation3_spill] sm:$0xff] }
 0x3eb   :  { %v1525_v56 = vadd.f32 %v1521_v12, %v1515_v1 }
 0x3ec   :  { %v1526_v57 = vadd.f32 %v1522_v26, %v1516_v58 }
 0x3ed   :  { %vm1527_vm13 = vcmp.ge.f32.partialorder %v1525_v56, 0.0  ;;  %v1529_v2 = vmul.f32 0.2, %v1525_v56 }
 0x3ee   :  { %vm1528_vm14 = vcmp.ge.f32.partialorder %v1526_v57, 0.0  ;;  %v1530_v5 = vmul.f32 0.2, %v1526_v57 }
 0x3ef   :  { %v3783_v55 = vsel %vm1527_vm13, %v1525_v56, %v1529_v2 }
 0x3f0   :  { %v3787_v25 = vcombine.high %v3783_v55, %v3783_v55  ;;  %1559 = vrot.lane.b32.xlu0 %v3783_v55, %s2013_s25  ;;  %v3791_v49 = vsel %vm1528_vm14, %v1526_v57, %v1530_v5 }
 0x3f1   :  { %v3797_v61 = vcombine.high %v3791_v49, %v3791_v49 }
 0x3f2   :  { %1561 = vrot.lane.b32.xlu1 %v3787_v25, %s2013_s25 }
 0x3f4   :  { %1563 = vrot.lane.b32.xlu0 %v3791_v49, %s2013_s25 }
 0x3f6   :  { %1565 = vrot.lane.b32.xlu1 %v3797_v61, %s2013_s25 }
 0x3f8   :  { %1579 = vrot.lane.b32.xlu0 %v3783_v55, %s2014_s1 }
 0x3fa   :  { %1581 = vrot.lane.b32.xlu1 %v3787_v25, %s2014_s1 }
 0x3fc   :  { %1583 = vrot.lane.b32.xlu0 %v3791_v49, %s2014_s1 }
 0x3fe   :  { %1585 = vrot.lane.b32.xlu1 %v3797_v61, %s2014_s1 }
 0x400   :  { %1539 = vrot.lane.b32.xlu0 %v3783_v55, %s2015_s26 }
 0x402   :  { %1541 = vrot.lane.b32.xlu1 %v3787_v25, %s2015_s26 }
 0x404   :  { %1543 = vrot.lane.b32.xlu0 %v3791_v49, %s2015_s26 }
 0x406   :  { %1545 = vrot.lane.b32.xlu1 %v3797_v61, %s2015_s26 }
 0x408   :  { %1599 = vrot.lane.b32.xlu0 %v3783_v55, %s2016_s27 }
 0x40a   :  { %1601 = vrot.lane.b32.xlu1 %v3787_v25, %s2016_s27 }
 0x40c   :  { %1603 = vrot.lane.b32.xlu0 %v3791_v49, %s2016_s27 }
 0x40e   :  { %1605 = vrot.lane.b32.xlu1 %v3797_v61, %s2016_s27 }
 0x410   :  { %1623 = vrot.lane.b32.xlu0 %v3783_v55, %s2017_s28 }
 0x412   :  { %1625 = vrot.lane.b32.xlu1 %v3787_v25, %s2017_s28 }
 0x414   :  { %1627 = vrot.lane.b32.xlu0 %v3791_v49, %s2017_s28 }
 0x416   :  { %1629 = vrot.lane.b32.xlu1 %v3797_v61, %s2017_s28 }
 0x418   :  { %1643 = vrot.lane.b32.xlu0 %v3783_v55, %s2018_s29 }
 0x41a   :  { %1645 = vrot.lane.b32.xlu1 %v3787_v25, %s2018_s29 }
 0x41c   :  { %1647 = vrot.lane.b32.xlu0 %v3791_v49, %s2018_s29 }
 0x41e   :  { %1649 = vrot.lane.b32.xlu1 %v3797_v61, %s2018_s29 }
 0x420   :  { %1663 = vrot.lane.b32.xlu0 %v3783_v55, %s2019_s30 }
 0x422   :  { %1665 = vrot.lane.b32.xlu1 %v3787_v25, %s2019_s30 }
 0x424   :  { %1667 = vrot.lane.b32.xlu0 %v3791_v49, %s2019_s30 }
 0x426   :  { %1669 = vrot.lane.b32.xlu1 %v3797_v61, %s2019_s30 }
 0x428   :  { %1683 = vrot.lane.b32.xlu0 %v3783_v55, %s2021_s13 }
 0x42a   :  { %1685 = vrot.lane.b32.xlu1 %v3787_v25, %s2021_s13 }
 0x42c   :  { %1687 = vrot.lane.b32.xlu0 %v3791_v49, %s2021_s13 }
 0x42e   :  { %1689 = vrot.lane.b32.xlu1 %v3797_v61, %s2021_s13 }
 0x430   :  { %1851 = vperm.xlu0 %2002, %v1848_v38  }
 0x462   :  { %v1560_v4 = vpop.permute.xlu0 %1559 }
 0x464   :  { %v1562_v63 = vpop.permute.xlu1 %1561 }
 0x465   :  { %v1569_v41 = vsel %vm103_vm0, %v1560_v4, %v1562_v63 }
 0x466   :  { %v1564_v0 = vpop.permute.xlu0 %1563  ;;  %v1572_v59 = vmul.f32 %v1569_v41, %v2224_v30 }
 0x467   :  { %v1568_v19 = vsel %vm103_vm0, %v1562_v63, %v1564_v0  ;;  %v4345_v63 = vld [vmem:[#allocation4_spill] sm:$0xff] }
 0x468   :  { %v1566_v40 = vpop.permute.xlu1 %1565  ;;  %v1576_v10 = vpack.c.bf16 %v1572_v59, %v1572_v59  ;;  %v1573_v1 = vmul.f32 %v1568_v19, %v2227_v31 }
 0x469   :  { %v1570_v45 = vsel %vm103_vm0, %v1566_v40, %v1560_v4  ;;  %v1567_v3 = vsel %vm103_vm0, %v1564_v0, %v1566_v40 }
 0x46a   :  { %v1580_v50 = vpop.permute.xlu0 %1579  ;;  %v1571_v42 = vmul.f32 %v1570_v45, %v2207_v23  ;;  %v1574_v24 = vmul.f32 %v1567_v3, %v2220_v29  ;;  %v1708_v40 = vrot.slane %v1576_v10, 6 }
 0x46c   :  { %v1582_v33 = vpop.permute.xlu1 %1581  ;;  %v1575_v58 = vpack.c.bf16 %v1571_v42, %v1571_v42 }
 0x46d   :  { %v1589_v37 = vsel %vm147_vm2, %v1580_v50, %v1582_v33 }
 0x46e   :  { %v1584_v20 = vpop.permute.xlu0 %1583  ;;  %v1592_v34 = vmul.f32 %v1589_v37, %v2239_v36  ;;  %v1578_v36 = vpack.c.bf16 %v1574_v24, %v1574_v24  ;;  %v4347_v37 = vld [vmem:[#allocation5_spill] sm:$0xff]  ;;  %v1707_v59 = vrot.slane %v1575_v58, 6 }
 0x46f   :  { %v1588_v8 = vsel %vm147_vm2, %v1582_v33, %v1584_v20  ;;  %v4346_v33 = vld [vmem:[#allocation6_spill] sm:$0xff] }
 0x470   :  { %v1586_v21 = vpop.permute.xlu1 %1585  ;;  %v1596_v57 = vpack.c.bf16 %v1592_v34, %v1592_v34  ;;  %v1593_v4 = vmul.f32 %v1588_v8, %v2254_v44 }
 0x471   :  { %v1590_v30 = vsel %vm147_vm2, %v1586_v21, %v1580_v50  ;;  %v1587_v2 = vsel %vm147_vm2, %v1584_v20, %v1586_v21 }
 0x472   :  { %v1540_v52 = vpop.permute.xlu0 %1539  ;;  %v1591_v31 = vmul.f32 %v1590_v30, %v2230_v32  ;;  %v1594_v3 = vmul.f32 %v1587_v2, %v2245_v39  ;;  %v1716_v44 = vrot.slane %v1596_v57, 4 }
 0x474   :  { %v1542_v6 = vpop.permute.xlu1 %1541  ;;  %v1595_v19 = vpack.c.bf16 %v1591_v31, %v1591_v31 }
 0x475   :  { %v1549_v12 = vsel %vm60_vm1, %v1540_v52, %v1542_v6 }
 0x476   :  { %v1544_v26 = vpop.permute.xlu0 %1543  ;;  %v1552_v23 = vmul.f32 %v1549_v12, %v4344_v14  ;;  %v1597_v12 = vpack.c.bf16 %v1593_v4, %v1593_v4  ;;  %v1598_v14 = vpack.c.bf16 %v1594_v3, %v1594_v3 }
 0x477   :  { %v1548_v5 = vsel %vm60_vm1, %v1542_v6, %v1544_v26  ;;  %v1710_v6 = vrot.slane %v1578_v36, 6 }
 0x478   :  { %v1546_v13 = vpop.permute.xlu1 %1545  ;;  %v1556_v50 = vpack.c.bf16 %v1552_v23, %v1552_v23  ;;  %v1553_v20 = vmul.f32 %v1548_v5, %v4347_v37 }
 0x479   :  { %v1547_v56 = vsel %vm60_vm1, %v1544_v26, %v1546_v13  ;;  %v1550_v29 = vsel %vm60_vm1, %v1546_v13, %v1540_v52  ;;  %v1577_v52 = vpack.c.bf16 %v1573_v1, %v1573_v1 }
 0x47a   :  { %v1600_v38 = vpop.permute.xlu0 %1599  ;;  %v1551_v0 = vmul.f32 %v1550_v29, %v4345_v63  ;;  %v1554_v41 = vmul.f32 %v1547_v56, %v4346_v33  ;;  %v1756_v30 = vsel %vm455_vm4, %v1556_v50, %v1708_v40  ;;  %v1557_v23 = vpack.c.bf16 %v1553_v20, %v1553_v20  ;;  %v4348_v29 = vld [vmem:[#allocation8_spill] sm:$0xff] }
 0x47b   :  { %v1709_v2 = vrot.slane %v1577_v52, 6  ;;  %v1766_v5 = vsel %vm468_vm5, %v1756_v30, %v1716_v44  ;;  %v1718_v50 = vrot.slane %v1598_v14, 4 }
 0x47c   :  { %v1602_v45 = vpop.permute.xlu1 %1601  ;;  %v1555_v24 = vpack.c.bf16 %v1551_v0, %v1551_v0  ;;  %v1558_v26 = vpack.c.bf16 %v1554_v41, %v1554_v41  ;;  %v1717_v41 = vrot.slane %v1597_v12, 4 }
 0x47d   :  { %v1609_v21 = vsel %vm191_vm3, %v1600_v38, %v1602_v45  ;;  %v1759_v33 = vsel %vm455_vm4, %v1557_v23, %v1709_v2 }
 0x47e   :  { %v1612_v32 = vmul.f32 %v1609_v21, %v2272_v53  ;;  %v1604_v42 = vpop.permute.xlu0 %1603  ;;  %v1762_v40 = vsel %vm455_vm4, %v1558_v26, %v1710_v6  ;;  %v1768_v6 = vsel %vm468_vm5, %v1759_v33, %v1717_v41 }
 0x47f   :  { %v1608_v34 = vsel %vm191_vm3, %v1602_v45, %v1604_v42  ;;  %v1770_v20 = vsel %vm468_vm5, %v1762_v40, %v1718_v50 }
 0x480   :  { %v1616_v10 = vpack.c.bf16 %v1612_v32, %v1612_v32  ;;  %v1613_v39 = vmul.f32 %v1608_v34, %v2281_v60  ;;  %v1606_v8 = vpop.permute.xlu1 %1605  ;;  %v1753_v60 = vsel %vm455_vm4, %v1555_v24, %v1707_v59 }
 0x481   :  { %v1607_v13 = vsel %vm191_vm3, %v1604_v42, %v1606_v8  ;;  %v1610_v53 = vsel %vm191_vm3, %v1606_v8, %v1600_v38  ;;  %v1715_v38 = vrot.slane %v1595_v19, 4  ;;  %v1815_v42 = vld [vmem:[%s4045_s2] sm:$0xff] }
 0x482   :  { %v1724_v1 = vrot.slane %v1616_v10, 2  ;;  %v1617_v58 = vpack.c.bf16 %v1613_v39, %v1613_v39  ;;  %v1611_v56 = vmul.f32 %v1610_v53, %v4247_v16  ;;  %v1614_v36 = vmul.f32 %v1607_v13, %v4348_v29  ;;  %v1624_v57 = vpop.permute.xlu0 %1623  ;;  %v3942_v53 = vld [vmem:[%s4045_s2 + $0x8] sm:$0xff] }
 0x483   :  { %v1764_v37 = vsel %vm468_vm5, %v1753_v60, %v1715_v38  ;;  %v1819_v26 = vcombine.high %v1815_v42, %v1815_v42  ;;  %v1823_v29 = vpack.c.bf16 %v1815_v42, %v1815_v42 }
 0x484   :  { %v1615_v4 = vpack.c.bf16 %v1611_v56, %v1611_v56  ;;  %v1618_v31 = vpack.c.bf16 %v1614_v36, %v1614_v36  ;;  %v1626_v63 = vpop.permute.xlu1 %1625  ;;  %v1775_v0 = vsel %vm477_vm6, %v1766_v5, %v1724_v1  ;;  %v1725_v16 = vrot.slane %v1617_v58, 2 }
 0x485   :  { %1866 = vmatprep.subr.bf16.mxu0 %v1775_v0  ;;  %v1633_v19 = vsel %vm239_vm7, %v1624_v57, %v1626_v63  ;;  %v3966_v50 = vrot.slane %v1823_v29, 6 }
 0x486   :  { %v1723_v45 = vrot.slane %v1615_v4, 2  ;;  %v1726_v52 = vrot.slane %v1618_v31, 2  ;;  %v1628_v3 = vpop.permute.xlu0 %1627  ;;  %v1778_v32 = vsel %vm477_vm6, %v1768_v6, %v1725_v16  ;;  %v1635_v8 = vmul.f32 %v1633_v19, %v4261_v47 }
 0x487   :  { %v1632_v24 = vsel %vm239_vm7, %v1626_v63, %v1628_v3  ;;  %v1824_v47 = vpack.c.bf16 %v1819_v26, %v1819_v26  ;;  %v3958_v4 = vcombine.high %v3942_v53, %v3942_v53  ;;  %v1620_v63 = vpack.c.bf16 %v3787_v25, %v3787_v25 }
 0x488   :  { %v1630_v21 = vpop.permute.xlu1 %1629  ;;  %v1772_v59 = vsel %vm477_vm6, %v1764_v37, %v1723_v45  ;;  %v1781_v44 = vsel %vm477_vm6, %v1770_v20, %v1726_v52  ;;  %v1636_v23 = vmul.f32 %v1632_v24, %v4267_v62  ;;  %v1639_v60 = vpack.c.bf16 %v1635_v8, %v1635_v8 }
 0x489   :  { %1867 = vmatpush1.bf16.msra.mxu0 %v1772_v59  ;;  %1907 = vmatprep.subr.bf16.mxu1 %v1781_v44  ;;  %v1631_v10 = vsel %vm239_vm7, %v1628_v3, %v1630_v21  ;;  %v1634_v39 = vsel %vm239_vm7, %v1630_v21, %v1624_v57  ;;  %v3970_v41 = vrot.slane %v1824_v47, 6  ;;  %v1826_v25 = vpack.c.bf16 %v3958_v4, %v3958_v4 }
 0x48a   :  { %v1644_v12 = vpop.permute.xlu0 %1643  ;;  %1908 = vmatpush1.bf16.msra.mxu1 %v1778_v32  ;;  %v1637_v1 = vmul.f32 %v1631_v10, %v4273_v35  ;;  %v1638_v58 = vmul.f32 %v1634_v39, %v4276_v51  ;;  %v1619_v35 = vpack.c.bf16 %v3783_v55, %v3783_v55  ;;  %v1621_v51 = vpack.c.bf16 %v3791_v49, %v3791_v49 }
 0x48b   :  { %v1622_v55 = vpack.c.bf16 %v3797_v61, %v3797_v61  ;;  %v1825_v52 = vpack.c.bf16 %v3942_v53, %v3942_v53 }
 0x48c   :  { %v1646_v34 = vpop.permute.xlu1 %1645  ;;  %v1641_v0 = vpack.c.bf16 %v1637_v1, %v1637_v1  ;;  %v1642_v40 = vpack.c.bf16 %v1638_v58, %v1638_v58 }
 0x48d   :  { %v1653_v30 = vsel %vm283_vm8, %v1644_v12, %v1646_v34 }
 0x48e   :  { %v1648_v14 = vpop.permute.xlu0 %1647  ;;  %v1655_v36 = vmul.f32 %v1653_v30, %v4282_v11  ;;  %v1640_v11 = vpack.c.bf16 %v1636_v23, %v1636_v23  ;;  %v1733_v21 = vrot.slane %v1641_v0, 6  ;;  %v1734_v59 = vrot.slane %v1642_v40, 6 }
 0x48f   :  { %v1652_v13 = vsel %vm283_vm8, %v1646_v34, %v1648_v14  ;;  %v1834_v40 = vrot.slane %v1826_v25, 6 }
 0x490   :  { %v1650_v56 = vpop.permute.xlu1 %1649  ;;  %v1656_v57 = vmul.f32 %v1652_v13, %v4285_v7  ;;  %v1659_v49 = vpack.c.bf16 %v1655_v36, %v1655_v36  ;;  %v1732_v61 = vrot.slane %v1640_v11, 6  ;;  %v1794_v58 = vsel %vm455_vm4, %v1622_v55, %v1734_v59 }
 0x491   :  { %v1651_v62 = vsel %vm283_vm8, %v1648_v14, %v1650_v56  ;;  %v1654_v2 = vsel %vm283_vm8, %v1650_v56, %v1644_v12  ;;  %v1791_v47 = vsel %vm455_vm4, %v1621_v51, %v1733_v21 }
 0x492   :  { %v1664_v5 = vpop.permute.xlu0 %1663  ;;  %v1657_v7 = vmul.f32 %v1651_v62, %v4286_v46  ;;  %v1658_v31 = vmul.f32 %v1654_v2, %v4288_v9  ;;  %v1660_v33 = vpack.c.bf16 %v1656_v57, %v1656_v57  ;;  %v1731_v46 = vrot.slane %v1639_v60, 6 }
 0x493   :  { %v1788_v14 = vsel %vm455_vm4, %v1620_v63, %v1732_v61 }
 0x494   :  { %v1666_v38 = vpop.permute.xlu1 %1665  ;;  %v1661_v3 = vpack.c.bf16 %v1657_v7, %v1657_v7  ;;  %v1662_v37 = vpack.c.bf16 %v1658_v31, %v1658_v31  ;;  %v1740_v42 = vrot.slane %v1660_v33, 4  ;;  %v1785_v39 = vsel %vm455_vm4, %v1619_v35, %v1731_v46 }
 0x495   :  { %v1673_v16 = vsel %vm327_vm9, %v1664_v5, %v1666_v38 }
 0x496   :  { %v1675_v9 = vmul.f32 %v1673_v16, %v4302_v43  ;;  %v1668_v45 = vpop.permute.xlu0 %1667  ;;  %v1739_v43 = vrot.slane %v1659_v49, 4  ;;  %v1741_v8 = vrot.slane %v1661_v3, 4  ;;  %v1742_v30 = vrot.slane %v1662_v37, 4 }
 0x497   :  { %v1672_v20 = vsel %vm327_vm9, %v1666_v38, %v1668_v45  ;;  %v1833_v38 = vrot.slane %v1825_v52, 6 }
 0x498   :  { %v1679_v44 = vpack.c.bf16 %v1675_v9, %v1675_v9  ;;  %v1676_v6 = vmul.f32 %v1672_v20, %v4305_v54  ;;  %v1670_v32 = vpop.permute.xlu1 %1669  ;;  %v1802_v35 = vsel %vm468_vm5, %v1794_v58, %v1742_v30  ;;  %v1800_v4 = vsel %vm468_vm5, %v1791_v47, %v1741_v8 }
 0x499   :  { %v1671_v12 = vsel %vm327_vm9, %v1668_v45, %v1670_v32  ;;  %v1674_v19 = vsel %vm327_vm9, %v1670_v32, %v1664_v5 }
 0x49a   :  { %v1680_v24 = vpack.c.bf16 %v1676_v6, %v1676_v6  ;;  %v1677_v34 = vmul.f32 %v1671_v12, %v4318_v48  ;;  %v1678_v26 = vmul.f32 %v1674_v19, %v4320_v22  ;;  %v1684_v10 = vpop.permute.xlu0 %1683  ;;  %v1747_v54 = vrot.slane %v1679_v44, 2 }
 0x49b   :  { %v1798_v48 = vsel %vm468_vm5, %v1788_v14, %v1740_v42  ;;  %v1796_v22 = vsel %vm468_vm5, %v1785_v39, %v1739_v43 }
 0x49c   :  { %v1748_v23 = vrot.slane %v1680_v24, 2  ;;  %v1681_v13 = vpack.c.bf16 %v1677_v34, %v1677_v34  ;;  %v1682_v53 = vpack.c.bf16 %v1678_v26, %v1678_v26  ;;  %v1686_v1 = vpop.permute.xlu1 %1685  ;;  %v1804_v5 = vsel %vm477_vm6, %v1796_v22, %v1747_v54 }
 0x49d   :  { %v1693_v56 = vsel %vm371_vm10, %v1684_v10, %v1686_v1 }
 0x49e   :  { %v1749_v29 = vrot.slane %v1681_v13, 2  ;;  %v1750_v36 = vrot.slane %v1682_v53, 2  ;;  %v1695_v57 = vmul.f32 %v1693_v56, %v4339_v18  ;;  %v1688_v62 = vpop.permute.xlu0 %1687  ;;  %v1807_v2 = vsel %vm477_vm6, %v1798_v48, %v1748_v23 }
 0x49f   :  { %v1692_v60 = vsel %vm371_vm10, %v1686_v1, %v1688_v62  ;;  %1868 = vmatprep.subr.bf16.mxu0 %v1807_v2 }
 0x4a0   :  { %v1699_v11 = vpack.c.bf16 %v1695_v57, %v1695_v57  ;;  %v1696_v51 = vmul.f32 %v1692_v60, %v4336_v27  ;;  %v1690_v7 = vpop.permute.xlu1 %1689  ;;  %1869 = vmatpush1.bf16.msra.mxu0 %v1804_v5  ;;  %v1813_v18 = vsel %vm477_vm6, %v1802_v35, %v1750_v36  ;;  %v1810_v31 = vsel %vm477_vm6, %v1800_v4, %v1749_v29 }
 0x4a1   :  { %v1691_v63 = vsel %vm371_vm10, %v1688_v62, %v1690_v7  ;;  %v1694_v0 = vsel %vm371_vm10, %v1690_v7, %v1684_v10  ;;  %1909 = vmatprep.subr.bf16.mxu1 %v1813_v18 }
 0x4a2   :  { %v1700_v55 = vpack.c.bf16 %v1696_v51, %v1696_v51  ;;  %v1697_v49 = vmul.f32 %v1691_v63, %v4340_v28  ;;  %v1698_v27 = vmul.f32 %v1694_v0, %v4337_v17  ;;  %1910 = vmatpush1.bf16.msra.mxu1 %v1810_v31  ;;  %v1837_v33 = vsel %vm455_vm4, %v1699_v11, %v3966_v50  ;;  %v1847_v17 = vld [vmem:[%s4046_s10] sm:$0xf] }
 0x4a3   :  { %v1858_v15 = vsel %vm468_vm5, %v1837_v33, 0 }
 0x4a4   :  { %v1701_v16 = vpack.c.bf16 %v1697_v49, %v1697_v49  ;;  %v1702_v46 = vpack.c.bf16 %v1698_v27, %v1698_v27  ;;  %v1840_v9 = vsel %vm455_vm4, %v1700_v55, %v3970_v41 }
 0x4a5   :  { %1976 = vmatprep.subr.msk.bf16.mxu0 %vm468_vm5, %v1840_v9 }
 0x4a6   :  { %1871 = vmatpush1.bf16.msra.mxu0 %v1858_v15  ;;  %v1846_v45 = vsel %vm455_vm4, %v1702_v46, %v1834_v40  ;;  %v1843_v28 = vsel %vm455_vm4, %v1701_v16, %v1833_v38 }
 0x4a7   :  { %1978 = vmatprep.subr.msk.bf16.mxu1 %vm468_vm5, %v1846_v45  ;;  %v1862_v50 = vsel %vm468_vm5, %v1843_v28, 0 }
 0x4a8   :  { %1912 = vmatpush1.bf16.msra.mxu1 %v1862_v50 }
 0x4a9   :  { %1977 = vmatmul.mubr.msk.bf16.vlgmr.msra.gmra.mrb[12].mxu0 %vm1854_vm15, %v1847_v17 }
 0x4ab   :  { %1979 = vmatmul.mubr.msk.bf16.vlgmr.msra.gmra.mrb[12].mxu1 %vm1854_vm15, %v1847_v17 }
 0x4af   :  { %v1852_v41 = vpop.permute.xlu0 %1851 }
 0x57c   :  { %v1900_v25 = vpop.f32.mrb[12].mxu0 }
 0x57d   :  { %v1901_v52 = vadd.f32 %v1900_v25, %v1852_v41  ;;  %v1902_v61 = vpop.f32.mrb[13].mxu0 }
 0x57e   :  { %v1903_v3 = vadd.f32 %v1902_v61, %v1852_v41  ;;  %v1904_v37 = vpop.f32.mrb[14].mxu0  ;;  %v1941_v20 = vpop.f32.mrb[12].mxu1 }
 0x57f   :  { %1948 = vst [vmem:[%s4047_s12] sm:$0xff] %v1901_v52  ;;  %v1942_v21 = vadd.f32 %v1941_v20, %v1852_v41  ;;  %v1905_v59 = vpop.f32.mrb[15].mxu0  ;;  %v1943_v44 = vpop.f32.mrb[13].mxu1 }
 0x580   :  { %1949 = vst [vmem:[%s4047_s12 + $0x8] sm:$0xff] %v1903_v3  ;;  %v1944_v6 = vadd.f32 %v1943_v44, %v1852_v41  ;;  %v1945_v32 = vpop.f32.mrb[14].mxu1 }
 0x581   :  { %1950 = vst [vmem:[%s4047_s12 + $0x10] sm:$0xff] %v1942_v21  ;;  %v1946_v43 = vpop.f32.mrb[15].mxu1 }
 0x582   :  { %1951 = vst [vmem:[%s4047_s12 + $0x18] sm:$0xff] %v1944_v6 }

// kernel: adaptive_block_forward.2
= control target key start
LH: loop header
LB: loop body
LE: loop exit
PB: predicated region body
PF: predicated region fallthrough
CT: control target
= control target key end

     0   :  { %s2031_s29 = smov 16   ;;  %s2033_s30 = smov 17   ;;  %v4134_v4 = vmov 0   ;;  %v58_v9 = vlaneseq  ;;  %vm455_vm4 = vcmask 1041408   ;;  %vm468_vm5 = vcmask 1043456   ;;  %s4120_s1 = inlined_call_operand.vmem [shape: f32[4,512], index: 1, kind: input, shape index: {}]   ;;  %s4121_s5 = inlined_call_operand.vmem [shape: bf16[32,36], index: 5, kind: input, shape index: {}]   ;;  %s4122_s6 = inlined_call_operand.vmem [shape: f32[32,1], index: 6, kind: input, shape index: {}]   ;;  %s4123_s2 = inlined_call_operand.vmem [shape: f32[9,512], index: 2, kind: input, shape index: {}]   ;;  %s4124_s7 = inlined_call_operand.vmem [shape: bf16[8,288], index: 7, kind: input, shape index: {}]   ;;  %s4125_s8 = inlined_call_operand.vmem [shape: f32[8,1], index: 8, kind: input, shape index: {}]   ;;  %s4126_s3 = inlined_call_operand.vmem [shape: f32[4,1], index: 3, kind: input, shape index: {}]   ;;  %s4127_s4 = inlined_call_operand.vmem [shape: f32[4,1], index: 4, kind: input, shape index: {}]   ;;  %s4128_s0 = inlined_call_operand.vmem [shape: f32[4,512], index: 0, kind: input, shape index: {}]   ;;  %s4129_s10 = inlined_call_operand.vmem [shape: f32[4,1], index: 10, kind: input, shape index: {}]   ;;  %s4130_s9 = inlined_call_operand.vmem [shape: bf16[4,36], index: 9, kind: input, shape index: {}]   ;;  %s4131_s11 = inlined_call_operand.vmem [shape: f32[4,512], index: 11, kind: output, shape index: {0}]   ;;  %s4132_s12 = inlined_call_operand.vmem [shape: f32[4,1], index: 12, kind: output, shape index: {1}]   ;;  %s4133_s13 = inlined_call_operand.vmem [shape: f32[4,1], index: 13, kind: output, shape index: {2}]  }
   0x1   :  { %v2114_v0 = vld [vmem:[%s4120_s1 + $0x8] sm:$0xff]  ;;  %v2119_v1 = vld [vmem:[%s4120_s1] sm:$0xff]  ;;  %s2032_s1 = smov 15   ;;  %s2034_s14 = smov 1   ;;  %611 = vmatprep.mubr.bf16.mxu0 %v4134_v4  ;;  %664 = vmatprep.mubr.bf16.mxu1 %v4134_v4  ;;  %v528_v7 = vld [vmem:[%s4122_s6 + $0x10] sm:$0xff]  ;;  %vm477_vm6 = vcmask 1045504  }
   0x2   :  { %99 = vrot.lane.b32.xlu1 %v2114_v0, %s2031_s29  ;;  %95 = vrot.lane.b32.xlu0 %v2119_v1, %s2031_s29  ;;  %v2127_v2 = vcombine.high %v2114_v0, %v2114_v0  ;;  %v2131_v3 = vcombine.high %v2119_v1, %v2119_v1  ;;  %s2035_s15 = smov 127   ;;  %s2036_s16 = smov 113   ;;  %v527_v5 = vld [vmem:[%s4122_s6 + $0x8] sm:$0xff]  ;;  %v526_v6 = vld [vmem:[%s4122_s6] sm:$0xff]  ;;  %v2209_v12 = vshrl.u32 %v58_v9, 7  ;;  %v2211_v13 = vand.u32 127, %v58_v9 }
   0x3   :  { %s2037_s17 = smov 112   ;;  %2021 = vset.pattern.permute.xlu1 %v4134_v4  ;;  %2020 = vset.pattern.permute.xlu0 %v4134_v4  ;;  %s2039_s18 = smov 111   ;;  %v529_v8 = vld [vmem:[%s4122_s6 + $0x18] sm:$0xff]  ;;  %vm560_vm11 = vcmask 293888   ;;  %vm1303_vm12 = vcmask 261120   ;;  %vm1957_vm15 = vcmask 3072  }
   0x4   :  { %4242 = vst [vmem:[#allocation2_spill] sm:$0xff] %v2209_v12  ;;  %v2214_v16 = vsub.s32 1, %v2209_v12  ;;  %v2217_v17 = vsub.s32 0, %v2209_v12  ;;  %v1974_v18 = vld [vmem:[%s4123_s2 + $0x1] ss:$8 sm:$0xf] }
   0x5   :  { %vm103_vm0 = vcmp.lt.s32.totalorder %v2211_v13, 16  ;;  %v1975_v21 = vld [vmem:[%s4123_s2 + $0x2] ss:$8 sm:$0xf]  ;;  %vm60_vm1 = vcmp.lt.s32.totalorder %v2211_v13, 17  ;;  %vm147_vm2 = vcmp.lt.s32.totalorder %v2211_v13, 15 }
   0x6   :  { %101 = vrot.lane.b32.xlu1 %v2127_v2, %s2031_s29  ;;  %97 = vrot.lane.b32.xlu0 %v2131_v3, %s2031_s29  ;;  %v65_v22 = vld [vmem:[%s4123_s2] ss:$8 sm:$0xf]  ;;  %v2232_v23 = vrot.slane %v1974_v18, %v2214_v16  ;;  %v2235_v24 = vsub.s32 3, %v2209_v12  ;;  %v2238_v25 = vrot.slane %v1974_v18, %v2217_v17  ;;  %v2241_v26 = vsub.s32 2, %v2209_v12 }
   0x7   :  { %v2248_v29 = vrot.slane %v1975_v21, %v2214_v16  ;;  %v2251_v31 = vrot.slane %v65_v22, %v2214_v16  ;;  %vm191_vm3 = vcmp.lt.s32.totalorder %v2211_v13, 1  ;;  %v2267_v39 = vrot.slane %v1975_v21, %v2217_v17  ;;  %v1976_v40 = vld [vmem:[%s4123_s2 + $0x3] ss:$8 sm:$0xf] }
   0x8   :  { %v2260_v36 = vrot.slane %v1974_v18, %v2235_v24  ;;  %v2264_v38 = vrot.slane %v1974_v18, %v2241_v26  ;;  %v2279_v47 = vrot.slane %v1975_v21, %v2241_v26  ;;  %v2282_v48 = vrot.slane %v1975_v21, %v2235_v24 }
   0x9   :  { %4243 = vst [vmem:[#allocation3_spill] sm:$0xff] %v2251_v31  ;;  %v2285_v50 = vrot.slane %v1976_v40, %v2214_v16  ;;  %v2288_v51 = vrot.slane %v65_v22, %v2217_v17  ;;  %v2291_v52 = vrot.slane %v65_v22, %v2241_v26  ;;  %v2296_v56 = vrot.slane %v65_v22, %v2235_v24 }
   0xa   :  { %141 = vrot.lane.b32.xlu1 %v2131_v3, %s2032_s1  ;;  %139 = vrot.lane.b32.xlu0 %v2119_v1, %s2032_s1  ;;  %vm239_vm7 = vcmp.lt.s32.totalorder %v2211_v13, 127  ;;  %vm283_vm8 = vcmp.lt.s32.totalorder %v2211_v13, 113  ;;  %vm327_vm9 = vcmp.lt.s32.totalorder %v2211_v13, 112  ;;  %vm371_vm10 = vcmp.lt.s32.totalorder %v2211_v13, 111 }
   0xb   :  { %4244 = vst [vmem:[#allocation4_spill] sm:$0xff] %v2288_v51  ;;  %4245 = vst [vmem:[#allocation5_spill] sm:$0xff] %v2291_v52 }
   0xc   :  { %4246 = vst [vmem:[#allocation6_spill] sm:$0xff] %v2296_v56 }
   0xe   :  { %52 = vrot.lane.b32.xlu1 %v2131_v3, %s2033_s30  ;;  %50 = vrot.lane.b32.xlu0 %v2119_v1, %s2033_s30 }
  0x12   :  { %145 = vrot.lane.b32.xlu1 %v2127_v2, %s2032_s1  ;;  %143 = vrot.lane.b32.xlu0 %v2114_v0, %s2032_s1 }
  0x16   :  { %185 = vrot.lane.b32.xlu1 %v2131_v3, %s2034_s14  ;;  %183 = vrot.lane.b32.xlu0 %v2119_v1, %s2034_s14 }
  0x1a   :  { %56 = vrot.lane.b32.xlu1 %v2127_v2, %s2033_s30  ;;  %54 = vrot.lane.b32.xlu0 %v2114_v0, %s2033_s30 }
  0x1e   :  { %189 = vrot.lane.b32.xlu1 %v2127_v2, %s2034_s14  ;;  %187 = vrot.lane.b32.xlu0 %v2114_v0, %s2034_s14 }
  0x22   :  { %235 = vrot.lane.b32.xlu1 %v2114_v0, %s2035_s15  ;;  %233 = vrot.lane.b32.xlu0 %v2131_v3, %s2035_s15 }
  0x26   :  { %237 = vrot.lane.b32.xlu1 %v2127_v2, %s2035_s15  ;;  %231 = vrot.lane.b32.xlu0 %v2119_v1, %s2035_s15 }
  0x2a   :  { %279 = vrot.lane.b32.xlu1 %v2114_v0, %s2036_s16  ;;  %277 = vrot.lane.b32.xlu0 %v2131_v3, %s2036_s16 }
  0x2e   :  { %281 = vrot.lane.b32.xlu1 %v2127_v2, %s2036_s16  ;;  %275 = vrot.lane.b32.xlu0 %v2119_v1, %s2036_s16 }
  0x32   :  { %323 = vrot.lane.b32.xlu1 %v2114_v0, %s2037_s17  ;;  %321 = vrot.lane.b32.xlu0 %v2131_v3, %s2037_s17 }
  0x36   :  { %325 = vrot.lane.b32.xlu1 %v2127_v2, %s2037_s17  ;;  %319 = vrot.lane.b32.xlu0 %v2119_v1, %s2037_s17 }
  0x3a   :  { %365 = vrot.lane.b32.xlu1 %v2131_v3, %s2039_s18  ;;  %363 = vrot.lane.b32.xlu0 %v2119_v1, %s2039_s18 }
  0x3e   :  { %369 = vrot.lane.b32.xlu1 %v2127_v2, %s2039_s18  ;;  %367 = vrot.lane.b32.xlu0 %v2114_v0, %s2039_s18 }
  0x42   :  { %537 = vperm.xlu1 %2021, %v527_v5   ;;  %532 = vperm.xlu0 %2020, %v526_v6   ;;  %v2305_v5 = vrot.slane %v1976_v40, %v2217_v17  ;;  %v2308_v6 = vrot.slane %v1976_v40, %v2241_v26 }
  0x44   :  { %4247 = vst [vmem:[#allocation7_spill] sm:$0xff] %v2305_v5  ;;  %4248 = vst [vmem:[#allocation8_spill] sm:$0xff] %v2308_v6 }
  0x46   :  { %542 = vperm.xlu1 %2021, %v528_v7   ;;  %547 = vperm.xlu0 %2020, %v529_v8  }
  0x74   :  { %v100_v10 = vpop.permute.xlu1 %99  ;;  %v96_v11 = vpop.permute.xlu0 %95 }
  0x78   :  { %v102_v14 = vpop.permute.xlu1 %101  ;;  %v98_v15 = vpop.permute.xlu0 %97 }
  0x79   :  { %v106_v27 = vsel %vm103_vm0, %v96_v11, %v98_v15  ;;  %v107_v28 = vsel %vm103_vm0, %v102_v14, %v96_v11  ;;  %v104_v41 = vsel %vm103_vm0, %v100_v10, %v102_v14  ;;  %v105_v42 = vsel %vm103_vm0, %v98_v15, %v100_v10 }
  0x7a   :  { %v132_v35 = vmul.f32 %v2232_v23, %v106_v27  ;;  %v131_v37 = vmul.f32 %v2238_v25, %v107_v28  ;;  %v134_v53 = vmul.f32 %v2260_v36, %v104_v41  ;;  %v133_v55 = vmul.f32 %v2264_v38, %v105_v42 }
  0x7b   :  { %v2314_v10 = vrot.slane %v1976_v40, %v2235_v24 }
  0x7c   :  { %v142_v19 = vpop.permute.xlu1 %141  ;;  %v140_v20 = vpop.permute.xlu0 %139  ;;  %v136_v49 = vpack.c.bf16 %v132_v35, %v132_v35  ;;  %v135_v54 = vpack.c.bf16 %v131_v37, %v131_v37  ;;  %v138_v11 = vpack.c.bf16 %v134_v53, %v134_v53  ;;  %v137_v14 = vpack.c.bf16 %v133_v55, %v133_v55 }
  0x7d   :  { %v150_v33 = vsel %vm147_vm2, %v140_v20, %v142_v19  ;;  %4249 = vst [vmem:[#allocation9_spill] sm:$0xff] %v2314_v10 }
  0x7e   :  { %v176_v43 = vmul.f32 %v2248_v29, %v150_v33  ;;  %v412_v7 = vrot.slane %v136_v49, 6 }
  0x80   :  { %v53_v30 = vpop.permute.xlu1 %52  ;;  %v51_v32 = vpop.permute.xlu0 %50  ;;  %v180_v57 = vpack.c.bf16 %v176_v43, %v176_v43 }
  0x81   :  { %v63_v34 = vsel %vm60_vm1, %v51_v32, %v53_v30 }
  0x82   :  { %v88_v44 = vmul.f32 %v2251_v31, %v63_v34 }
  0x84   :  { %v146_v45 = vpop.permute.xlu1 %145  ;;  %v144_v46 = vpop.permute.xlu0 %143  ;;  %v92_v58 = vpack.c.bf16 %v88_v44, %v88_v44  ;;  %v414_v44 = vrot.slane %v138_v11, 6 }
  0x85   :  { %v151_v59 = vsel %vm147_vm2, %v146_v45, %v140_v20  ;;  %v149_v60 = vsel %vm147_vm2, %v142_v19, %v144_v46  ;;  %v148_v8 = vsel %vm147_vm2, %v144_v46, %v146_v45  ;;  %v411_v19 = vrot.slane %v135_v54, 6 }
  0x86   :  { %v175_v15 = vmul.f32 %v2267_v39, %v151_v59  ;;  %v177_v18 = vmul.f32 %v2279_v47, %v149_v60  ;;  %v420_v20 = vrot.slane %v180_v57, 4  ;;  %v461_v28 = vsel %vm455_vm4, %v92_v58, %v412_v7 }
  0x87   :  { %v178_v33 = vmul.f32 %v2282_v48, %v148_v8  ;;  %v413_v7 = vrot.slane %v137_v14, 6 }
  0x88   :  { %v186_v61 = vpop.permute.xlu1 %185  ;;  %v184_v62 = vpop.permute.xlu0 %183  ;;  %v179_v45 = vpack.c.bf16 %v175_v15, %v175_v15  ;;  %v181_v46 = vpack.c.bf16 %v177_v18, %v177_v18  ;;  %v472_v49 = vsel %vm468_vm5, %v461_v28, %v420_v20 }
  0x89   :  { %v194_v63 = vsel %vm191_vm3, %v184_v62, %v186_v61 }
  0x8a   :  { %v220_v9 = vmul.f32 %v2285_v50, %v194_v63 }
  0x8c   :  { %v57_v21 = vpop.permute.xlu1 %56  ;;  %v55_v22 = vpop.permute.xlu0 %54  ;;  %v224_v27 = vpack.c.bf16 %v220_v9, %v220_v9 }
  0x8d   :  { %v64_v34 = vsel %vm60_vm1, %v57_v21, %v51_v32  ;;  %v61_v35 = vsel %vm60_vm1, %v55_v22, %v57_v21  ;;  %v62_v37 = vsel %vm60_vm1, %v53_v30, %v55_v22  ;;  %v182_v30 = vpack.c.bf16 %v178_v33, %v178_v33 }
  0x8e   :  { %v87_v40 = vmul.f32 %v2288_v51, %v64_v34  ;;  %v89_v41 = vmul.f32 %v2291_v52, %v62_v37  ;;  %v90_v42 = vmul.f32 %v2296_v56, %v61_v35  ;;  %v428_v43 = vrot.slane %v224_v27, 2  ;;  %v1977_v34 = vld [vmem:[%s4123_s2 + $0x5] ss:$8 sm:$0xf] }
  0x8f   :  { %v421_v33 = vrot.slane %v181_v46, 4  ;;  %v422_v14 = vrot.slane %v182_v30, 4  ;;  %v2370_v30 = vrot.slane %v1977_v34, %v2217_v17 }
  0x90   :  { %v91_v53 = vpack.c.bf16 %v87_v40, %v87_v40  ;;  %v93_v32 = vpack.c.bf16 %v89_v41, %v89_v41  ;;  %v94_v54 = vpack.c.bf16 %v90_v42, %v90_v42  ;;  %v190_v55 = vpop.permute.xlu1 %189  ;;  %v188_v57 = vpop.permute.xlu0 %187  ;;  %v482_v58 = vsel %vm477_vm6, %v472_v49, %v428_v43 }
  0x91   :  { %v195_v59 = vsel %vm191_vm3, %v190_v55, %v184_v62  ;;  %v192_v60 = vsel %vm191_vm3, %v188_v57, %v190_v55  ;;  %v193_v63 = vsel %vm191_vm3, %v186_v61, %v188_v57  ;;  %579 = vmatprep.subr.bf16.mxu0 %v482_v58  ;;  %v419_v61 = vrot.slane %v179_v45, 4  ;;  %4253 = vst [vmem:[#allocation13_spill] sm:$0xff] %v2370_v30 }
  0x92   :  { %v219_v8 = vmul.f32 %v2305_v5, %v195_v59  ;;  %v221_v9 = vmul.f32 %v2308_v6, %v193_v63  ;;  %v222_v11 = vmul.f32 %v2314_v10, %v192_v60  ;;  %v458_v15 = vsel %vm455_vm4, %v91_v53, %v411_v19  ;;  %v1488_v10 = vld [vmem:[%s4127_s4] sm:$0xf] }
  0x93   :  { %v467_v18 = vsel %vm455_vm4, %v94_v54, %v414_v44  ;;  %v464_v28 = vsel %vm455_vm4, %v93_v32, %v413_v7  ;;  %v470_v40 = vsel %vm468_vm5, %v458_v15, %v419_v61  ;;  %v2351_v43 = vrot.slane %v1977_v34, %v2214_v16  ;;  %v1978_v32 = vld [vmem:[%s4123_s2 + $0x6] ss:$8 sm:$0xf] }
  0x94   :  { %v223_v20 = vpack.c.bf16 %v219_v8, %v219_v8  ;;  %v225_v62 = vpack.c.bf16 %v221_v9, %v221_v9  ;;  %v236_v21 = vpop.permute.xlu1 %235  ;;  %v234_v22 = vpop.permute.xlu0 %233  ;;  %v226_v27 = vpack.c.bf16 %v222_v11, %v222_v11  ;;  %v476_v41 = vsel %vm468_vm5, %v467_v18, %v422_v14 }
  0x95   :  { %v474_v42 = vsel %vm468_vm5, %v464_v28, %v421_v33  ;;  %4250 = vst [vmem:[#allocation10_spill] sm:$0xff] %v2351_v43  ;;  %v241_v54 = vsel %vm239_vm7, %v234_v22, %v236_v21  ;;  %v2363_v55 = vrot.slane %v1978_v32, %v2214_v16  ;;  %v2367_v58 = vrot.slane %v1977_v34, %v2241_v26 }
  0x96   :  { %v427_v35 = vrot.slane %v223_v20, 2  ;;  %v430_v19 = vrot.slane %v226_v27, 2  ;;  %v429_v37 = vrot.slane %v225_v62, 2  ;;  %v268_v57 = vmul.f32 %v2351_v43, %v241_v54 }
  0x97   :  { %4251 = vst [vmem:[#allocation11_spill] sm:$0xff] %v2363_v55  ;;  %4252 = vst [vmem:[#allocation12_spill] sm:$0xff] %v2367_v58  ;;  %v2375_v7 = vrot.slane %v1977_v34, %v2235_v24  ;;  %v228_v15 = vpack.c.bf16 %v2131_v3, %v2131_v3  ;;  %v2388_v20 = vrot.slane %v1978_v32, %v2241_v26 }
  0x98   :  { %v238_v44 = vpop.permute.xlu1 %237  ;;  %v232_v45 = vpop.permute.xlu0 %231  ;;  %v479_v46 = vsel %vm477_vm6, %v470_v40, %v427_v35  ;;  %v488_v49 = vsel %vm477_vm6, %v476_v41, %v430_v19  ;;  %v485_v53 = vsel %vm477_vm6, %v474_v42, %v429_v37  ;;  %v2391_v62 = vrot.slane %v1978_v32, %v2217_v17 }
  0x99   :  { %580 = vmatpush1.bf16.msra.mxu0 %v479_v46  ;;  %632 = vmatprep.subr.bf16.mxu1 %v488_v49  ;;  %v240_v63 = vsel %vm239_vm7, %v236_v21, %v238_v44  ;;  %4254 = vst [vmem:[#allocation14_spill] sm:$0xff] %v2375_v7  ;;  %v242_v8 = vsel %vm239_vm7, %v232_v45, %v234_v22  ;;  %4255 = vst [vmem:[#allocation15_spill] sm:$0xff] %v2388_v20  ;;  %v1979_v22 = vld [vmem:[%s4123_s2 + $0x7] ss:$8 sm:$0xf] }
  0x9a   :  { %633 = vmatpush1.bf16.msra.mxu1 %v485_v53  ;;  %v243_v11 = vsel %vm239_vm7, %v238_v44, %v232_v45  ;;  %4256 = vst [vmem:[#allocation16_spill] sm:$0xff] %v2391_v62  ;;  %v2394_v21 = vrot.slane %v1978_v32, %v2235_v24  ;;  %v272_v27 = vpack.c.bf16 %v268_v57, %v268_v57  ;;  %v1980_v53 = vld [vmem:[%s4123_s2 + $0x20] ss:$8 sm:$0xf] }
  0x9b   :  { %v269_v28 = vmul.f32 %v2367_v58, %v240_v63  ;;  %v267_v3 = vmul.f32 %v2370_v30, %v242_v8  ;;  %v227_v14 = vpack.c.bf16 %v2119_v1, %v2119_v1  ;;  %v270_v34 = vmul.f32 %v2375_v7, %v243_v11 }
  0x9c   :  { %v280_v59 = vpop.permute.xlu1 %279  ;;  %v278_v60 = vpop.permute.xlu0 %277  ;;  %4257 = vst [vmem:[#allocation17_spill] sm:$0xff] %v2394_v21  ;;  %v2412_v40 = vrot.slane %v1979_v22, %v2214_v16  ;;  %v2415_v41 = vrot.slane %v1979_v22, %v2241_v26  ;;  %v230_v1 = vpack.c.bf16 %v2127_v2, %v2127_v2  ;;  %v229_v42 = vpack.c.bf16 %v2114_v0, %v2114_v0 }
  0x9d   :  { %v285_v9 = vsel %vm283_vm8, %v278_v60, %v280_v59  ;;  %v436_v32 = vrot.slane %v272_v27, 6  ;;  %v273_v54 = vpack.c.bf16 %v269_v28, %v269_v28  ;;  %v271_v57 = vpack.c.bf16 %v267_v3, %v267_v3 }
  0x9e   :  { %v312_v18 = vmul.f32 %v2363_v55, %v285_v9  ;;  %4258 = vst [vmem:[#allocation18_spill] sm:$0xff] %v2412_v40  ;;  %4259 = vst [vmem:[#allocation19_spill] sm:$0xff] %v2415_v41  ;;  %v2428_v2 = vrot.slane %v1979_v22, %v2217_v17  ;;  %v274_v0 = vpack.c.bf16 %v270_v34, %v270_v34 }
  0x9f   :  { %v2433_v8 = vrot.slane %v1979_v22, %v2235_v24  ;;  %v2436_v9 = vrot.slane %v1980_v53, %v2235_v24  ;;  %v2443_v27 = vrot.slane %v1980_v53, %v2217_v17  ;;  %v2446_v28 = vrot.slane %v1980_v53, %v2241_v26 }
  0xa0   :  { %v282_v61 = vpop.permute.xlu1 %281  ;;  %v276_v33 = vpop.permute.xlu0 %275  ;;  %v316_v44 = vpack.c.bf16 %v312_v18, %v312_v18  ;;  %4260 = vst [vmem:[#allocation20_spill] sm:$0xff] %v2428_v2  ;;  %v2440_v18 = vrot.slane %v1980_v53, %v2214_v16  ;;  %v437_v22 = vrot.slane %v273_v54, 6  ;;  %v438_v4 = vrot.slane %v274_v0, 6 }
  0xa1   :  { %v284_v35 = vsel %vm283_vm8, %v280_v59, %v282_v61  ;;  %v286_v19 = vsel %vm283_vm8, %v276_v33, %v278_v60  ;;  %v287_v37 = vsel %vm283_vm8, %v282_v61, %v276_v33  ;;  %4261 = vst [vmem:[#allocation21_spill] sm:$0xff] %v2433_v8  ;;  %4262 = vst [vmem:[#allocation22_spill] sm:$0xff] %v2436_v9 }
  0xa2   :  { %v313_v45 = vmul.f32 %v2388_v20, %v284_v35  ;;  %v311_v46 = vmul.f32 %v2391_v62, %v286_v19  ;;  %v314_v49 = vmul.f32 %v2394_v21, %v287_v37  ;;  %4263 = vst [vmem:[#allocation23_spill] sm:$0xff] %v2440_v18  ;;  %4264 = vst [vmem:[#allocation24_spill] sm:$0xff] %v2443_v27  ;;  %v444_v3 = vrot.slane %v316_v44, 4 }
  0xa3   :  { %4265 = vst [vmem:[#allocation25_spill] sm:$0xff] %v2446_v28  ;;  %v435_v35 = vrot.slane %v271_v57, 6 }
  0xa4   :  { %v324_v59 = vpop.permute.xlu1 %323  ;;  %v322_v60 = vpop.permute.xlu0 %321  ;;  %v317_v61 = vpack.c.bf16 %v313_v45, %v313_v45  ;;  %v315_v33 = vpack.c.bf16 %v311_v46, %v311_v46  ;;  %v318_v34 = vpack.c.bf16 %v314_v49, %v314_v49 }
  0xa5   :  { %v329_v63 = vsel %vm327_vm9, %v322_v60, %v324_v59 }
  0xa6   :  { %v356_v11 = vmul.f32 %v2412_v40, %v329_v63  ;;  %v495_v63 = vsel %vm455_vm4, %v228_v15, %v436_v32  ;;  %v445_v53 = vrot.slane %v317_v61, 4  ;;  %v443_v54 = vrot.slane %v315_v33, 4 }
  0xa7   :  { %v446_v15 = vrot.slane %v318_v34, 4  ;;  %v505_v32 = vsel %vm468_vm5, %v495_v63, %v444_v3  ;;  %v498_v61 = vsel %vm455_vm4, %v229_v42, %v437_v22 }
  0xa8   :  { %v360_v19 = vpack.c.bf16 %v356_v11, %v356_v11  ;;  %v326_v24 = vpop.permute.xlu1 %325  ;;  %v320_v37 = vpop.permute.xlu0 %319 }
  0xa9   :  { %v328_v16 = vsel %vm327_vm9, %v324_v59, %v326_v24  ;;  %v330_v17 = vsel %vm327_vm9, %v320_v37, %v322_v60  ;;  %v331_v26 = vsel %vm327_vm9, %v326_v24, %v320_v37  ;;  %v492_v24 = vsel %vm455_vm4, %v227_v14, %v435_v35 }
  0xaa   :  { %v452_v44 = vrot.slane %v360_v19, 2  ;;  %v357_v45 = vmul.f32 %v2415_v41, %v328_v16  ;;  %v355_v46 = vmul.f32 %v2428_v2, %v330_v17  ;;  %v358_v49 = vmul.f32 %v2433_v8, %v331_v26 }
  0xab   :  { %v501_v37 = vsel %vm455_vm4, %v230_v1, %v438_v4  ;;  %v503_v16 = vsel %vm468_vm5, %v492_v24, %v443_v54  ;;  %v507_v26 = vsel %vm468_vm5, %v498_v61, %v445_v53 }
  0xac   :  { %v361_v57 = vpack.c.bf16 %v357_v45, %v357_v45  ;;  %v359_v59 = vpack.c.bf16 %v355_v46, %v355_v46  ;;  %v362_v0 = vpack.c.bf16 %v358_v49, %v358_v49  ;;  %v366_v11 = vpop.permute.xlu1 %365  ;;  %v364_v60 = vpop.permute.xlu0 %363  ;;  %v514_v12 = vsel %vm477_vm6, %v505_v32, %v452_v44 }
  0xad   :  { %v374_v19 = vsel %vm371_vm10, %v364_v60, %v366_v11  ;;  %581 = vmatprep.subr.bf16.mxu0 %v514_v12  ;;  %v509_v17 = vsel %vm468_vm5, %v501_v37, %v446_v15 }
  0xae   :  { %v453_v33 = vrot.slane %v361_v57, 2  ;;  %v451_v34 = vrot.slane %v359_v59, 2  ;;  %v454_v3 = vrot.slane %v362_v0, 2  ;;  %v399_v63 = vmul.f32 %v2443_v27, %v374_v19  ;;  %v2024_v0 = vld [vmem:[%s4121_s5] sm:$0xff]  }
  0xb0   :  { %v370_v44 = vpop.permute.xlu1 %369  ;;  %v368_v45 = vpop.permute.xlu0 %367  ;;  %v511_v12 = vsel %vm477_vm6, %v503_v16, %v451_v34  ;;  %v520_v14 = vsel %vm477_vm6, %v509_v17, %v454_v3  ;;  %v517_v4 = vsel %vm477_vm6, %v507_v26, %v453_v33  ;;  %v403_v49 = vpack.c.bf16 %v399_v63, %v399_v63 }
  0xb1   :  { %v375_v1 = vsel %vm371_vm10, %v370_v44, %v364_v60  ;;  %v372_v42 = vsel %vm371_vm10, %v368_v45, %v370_v44  ;;  %v373_v22 = vsel %vm371_vm10, %v366_v11, %v368_v45  ;;  %582 = vmatpush1.bf16.msra.mxu0 %v511_v12  ;;  %634 = vmatprep.subr.bf16.mxu1 %v520_v14  ;;  %v4266_v11 = vmov 0   ;;  %v2025_v60 = vld [vmem:[%s4121_s5 + $0x8] sm:$0xff]  }
  0xb2   :  { %v402_v35 = vmul.f32 %v2436_v9, %v375_v1  ;;  %v400_v46 = vmul.f32 %v2440_v18, %v373_v22  ;;  %635 = vmatpush1.bf16.msra.mxu1 %v517_v4  ;;  %v401_v53 = vmul.f32 %v2446_v28, %v372_v42  ;;  %v568_v57 = vsel %vm455_vm4, %v403_v49, 0 }
  0xb4   :  { %v406_v54 = vpack.c.bf16 %v402_v35, %v402_v35  ;;  %v404_v15 = vpack.c.bf16 %v400_v46, %v400_v46  ;;  %v405_v32 = vpack.c.bf16 %v401_v53, %v401_v53 }
  0xb6   :  { %1983 = vmatprep.subr.msk.bf16.mxu0 %vm455_vm4, %v404_v15  ;;  %1986 = vmatprep.subr.msk.bf16.mxu1 %vm455_vm4, %v406_v54  ;;  %v574_v59 = vsel %vm455_vm4, %v405_v32, 0 }
  0xb7   :  { %584 = vmatpush1.bf16.msra.mxu0 %v568_v57  ;;  %637 = vmatpush1.bf16.msra.mxu1 %v574_v59 }
  0xba   :  { %1984 = vmatmul.mubr.msk.bf16.vlgmr.msra.gmra.mrb[0].mxu0 %vm560_vm11, %v2024_v0  ;;  %1987 = vmatmul.mubr.msk.bf16.vlgmr.msra.gmra.mrb[0].mxu1 %vm560_vm11, %v2024_v0 }
  0xbb   :  { %621 = vmatprep.mubr.bf16.mxu0 %v4266_v11  ;;  %674 = vmatprep.mubr.bf16.mxu1 %v4266_v11 }
  0xc1   :  { %v2497_v19 = vpop.permute.xlu1 %537  ;;  %v533_v24 = vpop.permute.xlu0 %532 }
  0xc2   :  { %1985 = vmatmul.mubr.msk.bf16.gmra.mrb[4].mxu0 %vm560_vm11, %v2025_v60  ;;  %1988 = vmatmul.mubr.msk.bf16.gmra.mrb[4].mxu1 %vm560_vm11, %v2025_v60 }
 0x18d   :  { %v613_v37 = vpop.f32.mrb[0].mxu0  ;;  %v666_v61 = vpop.f32.mrb[0].mxu1 }
 0x18e   :  { %v614_v33 = vadd.f32 %v613_v37, %v533_v24  ;;  %v667_v34 = vadd.f32 %v666_v61, %v533_v24  ;;  %v615_v3 = vpop.f32.mrb[1].mxu0  ;;  %v668_v63 = vpop.f32.mrb[1].mxu1 }
 0x18f   :  { %v670_v16 = vpop.f32.mrb[2].mxu1  ;;  %v617_v17 = vpop.f32.mrb[2].mxu0  ;;  %v616_v0 = vadd.f32 %v615_v3, %v533_v24  ;;  %v669_v61 = vadd.f32 %v668_v63, %v533_v24 }
 0x190   :  { %v2499_v26 = vmax.f32 %v614_v33, 0.0  ;;  %v2501_v44 = vmax.f32 %v667_v34, 0.0  ;;  %v671_v45 = vadd.f32 %v670_v16, %v2497_v19  ;;  %v618_v12 = vadd.f32 %v617_v17, %v2497_v19  ;;  %v619_v14 = vpop.f32.mrb[3].mxu0  ;;  %v672_v4 = vpop.f32.mrb[3].mxu1 }
 0x191   :  { %v620_v60 = vadd.f32 %v619_v14, %v2497_v19  ;;  %v2592_v37 = vmax.f32 %v616_v0, 0.0  ;;  %v673_v34 = vadd.f32 %v672_v4, %v2497_v19  ;;  %v2601_v3 = vmax.f32 %v669_v61, 0.0  ;;  %v2649_v19 = vpop.permute.xlu1 %542  ;;  %v2653_v24 = vpop.permute.xlu0 %547 }
 0x192   :  { %4267 = vst [vmem:[#allocation26_spill] sm:$0xff] %v2499_v26  ;;  %4268 = vst [vmem:[#allocation27_spill] sm:$0xff] %v2501_v44  ;;  %v2505_v1 = vmax.f32 %v671_v45, 0.0  ;;  %v2507_v42 = vmax.f32 %v618_v12, 0.0  ;;  %701 = vrot.lane.b32.xlu1 %v2499_v26, %s2033_s30 }
 0x193   :  { %v2596_v33 = vmax.f32 %v620_v60, 0.0  ;;  %v2605_v16 = vmax.f32 %v673_v34, 0.0 }
 0x194   :  { %4269 = vst [vmem:[#allocation28_spill] sm:$0xff] %v2505_v1  ;;  %4270 = vst [vmem:[#allocation29_spill] sm:$0xff] %v2507_v42  ;;  %703 = vrot.lane.b32.xlu0 %v2507_v42, %s2033_s30 }
 0x195   :  { %v2517_v46 = vpop.f32.mrb[4].mxu0  ;;  %v2519_v49 = vpop.f32.mrb[4].mxu1 }
 0x196   :  { %v2521_v53 = vpop.f32.mrb[5].mxu0  ;;  %v2523_v54 = vpop.f32.mrb[5].mxu1  ;;  %717 = vrot.lane.b32.xlu1 %v2501_v44, %s2033_s30  ;;  %v624_v45 = vadd.f32 %v2517_v46, %v2649_v19  ;;  %v677_v60 = vadd.f32 %v2519_v49, %v2649_v19 }
 0x197   :  { %v2527_v15 = vpop.f32.mrb[6].mxu0  ;;  %v2529_v32 = vpop.f32.mrb[6].mxu1 }
 0x198   :  { %v2531_v57 = vpop.f32.mrb[7].mxu0  ;;  %v2533_v59 = vpop.f32.mrb[7].mxu1  ;;  %719 = vrot.lane.b32.xlu0 %v2505_v1, %s2033_s30  ;;  %v628_v14 = vadd.f32 %v2527_v15, %v2653_v24  ;;  %v2677_v0 = vmax.f32 %v624_v45, 0.0  ;;  %v681_v15 = vadd.f32 %v2529_v32, %v2653_v24  ;;  %v2693_v45 = vmax.f32 %v677_v60, 0.0 }
 0x19a   :  { %773 = vrot.lane.b32.xlu1 %v2499_v26, %s2031_s29  ;;  %4271 = vst [vmem:[#allocation30_spill] sm:$0xff] %v2677_v0  ;;  %v2685_v61 = vmax.f32 %v628_v14, 0.0  ;;  %4273 = vst [vmem:[#allocation32_spill] sm:$0xff] %v2693_v45  ;;  %v2699_v35 = vmax.f32 %v681_v15, 0.0 }
 0x19c   :  { %775 = vrot.lane.b32.xlu0 %v2507_v42, %s2031_s29  ;;  %4272 = vst [vmem:[#allocation31_spill] sm:$0xff] %v2685_v61  ;;  %4274 = vst [vmem:[#allocation33_spill] sm:$0xff] %v2699_v35 }
 0x19e   :  { %789 = vrot.lane.b32.xlu1 %v2501_v44, %s2031_s29 }
 0x1a0   :  { %791 = vrot.lane.b32.xlu0 %v2505_v1, %s2031_s29 }
 0x1a2   :  { %845 = vrot.lane.b32.xlu1 %v2499_v26, %s2032_s1 }
 0x1a4   :  { %847 = vrot.lane.b32.xlu0 %v2507_v42, %s2032_s1 }
 0x1a6   :  { %861 = vrot.lane.b32.xlu1 %v2501_v44, %s2032_s1 }
 0x1a8   :  { %863 = vrot.lane.b32.xlu0 %v2505_v1, %s2032_s1 }
 0x1aa   :  { %917 = vrot.lane.b32.xlu1 %v2499_v26, %s2034_s14 }
 0x1ac   :  { %919 = vrot.lane.b32.xlu0 %v2507_v42, %s2034_s14 }
 0x1ae   :  { %933 = vrot.lane.b32.xlu1 %v2501_v44, %s2034_s14 }
 0x1b0   :  { %935 = vrot.lane.b32.xlu0 %v2505_v1, %s2034_s14 }
 0x1b2   :  { %1013 = vrot.lane.b32.xlu1 %v2501_v44, %s2035_s15 }
 0x1b4   :  { %1015 = vrot.lane.b32.xlu0 %v2505_v1, %s2035_s15 }
 0x1b6   :  { %997 = vrot.lane.b32.xlu1 %v2499_v26, %s2035_s15 }
 0x1b8   :  { %999 = vrot.lane.b32.xlu0 %v2507_v42, %s2035_s15 }
 0x1ba   :  { %1085 = vrot.lane.b32.xlu1 %v2501_v44, %s2036_s16 }
 0x1bc   :  { %1087 = vrot.lane.b32.xlu0 %v2505_v1, %s2036_s16 }
 0x1be   :  { %1069 = vrot.lane.b32.xlu1 %v2499_v26, %s2036_s16 }
 0x1c0   :  { %1071 = vrot.lane.b32.xlu0 %v2507_v42, %s2036_s16 }
 0x1c2   :  { %1157 = vrot.lane.b32.xlu1 %v2501_v44, %s2037_s17 }
 0x1c4   :  { %1159 = vrot.lane.b32.xlu0 %v2505_v1, %s2037_s17 }
 0x1c6   :  { %1141 = vrot.lane.b32.xlu1 %v2499_v26, %s2037_s17 }
 0x1c8   :  { %1143 = vrot.lane.b32.xlu0 %v2507_v42, %s2037_s17 }
 0x1ca   :  { %1229 = vrot.lane.b32.xlu1 %v2501_v44, %s2039_s18 }
 0x1cc   :  { %1231 = vrot.lane.b32.xlu0 %v2505_v1, %s2039_s18 }
 0x1ce   :  { %1213 = vrot.lane.b32.xlu1 %v2499_v26, %s2039_s18 }
 0x1d0   :  { %1215 = vrot.lane.b32.xlu0 %v2507_v42, %s2039_s18 }
 0x1d2   :  { %709 = vrot.lane.b32.xlu1 %v2592_v37, %s2033_s30 }
 0x1d4   :  { %711 = vrot.lane.b32.xlu0 %v2596_v33, %s2033_s30 }
 0x1d6   :  { %725 = vrot.lane.b32.xlu1 %v2601_v3, %s2033_s30 }
 0x1d8   :  { %727 = vrot.lane.b32.xlu0 %v2605_v16, %s2033_s30 }
 0x1da   :  { %781 = vrot.lane.b32.xlu1 %v2592_v37, %s2031_s29 }
 0x1dc   :  { %783 = vrot.lane.b32.xlu0 %v2596_v33, %s2031_s29 }
 0x1de   :  { %797 = vrot.lane.b32.xlu1 %v2601_v3, %s2031_s29 }
 0x1e0   :  { %799 = vrot.lane.b32.xlu0 %v2605_v16, %s2031_s29 }
 0x1e2   :  { %853 = vrot.lane.b32.xlu1 %v2592_v37, %s2032_s1 }
 0x1e4   :  { %855 = vrot.lane.b32.xlu0 %v2596_v33, %s2032_s1 }
 0x1e6   :  { %869 = vrot.lane.b32.xlu1 %v2601_v3, %s2032_s1 }
 0x1e8   :  { %871 = vrot.lane.b32.xlu0 %v2605_v16, %s2032_s1 }
 0x1ea   :  { %925 = vrot.lane.b32.xlu1 %v2592_v37, %s2034_s14 }
 0x1ec   :  { %927 = vrot.lane.b32.xlu0 %v2596_v33, %s2034_s14 }
 0x1ee   :  { %941 = vrot.lane.b32.xlu1 %v2601_v3, %s2034_s14 }
 0x1f0   :  { %943 = vrot.lane.b32.xlu0 %v2605_v16, %s2034_s14 }
 0x1f2   :  { %1005 = vrot.lane.b32.xlu1 %v2592_v37, %s2035_s15 }
 0x1f4   :  { %1007 = vrot.lane.b32.xlu0 %v2596_v33, %s2035_s15 }
 0x1f6   :  { %1021 = vrot.lane.b32.xlu1 %v2601_v3, %s2035_s15 }
 0x1f8   :  { %1023 = vrot.lane.b32.xlu0 %v2605_v16, %s2035_s15 }
 0x1fa   :  { %1077 = vrot.lane.b32.xlu1 %v2592_v37, %s2036_s16 }
 0x1fc   :  { %1079 = vrot.lane.b32.xlu0 %v2596_v33, %s2036_s16 }
 0x1fe   :  { %1093 = vrot.lane.b32.xlu1 %v2601_v3, %s2036_s16 }
 0x200   :  { %1095 = vrot.lane.b32.xlu0 %v2605_v16, %s2036_s16 }
 0x202   :  { %1149 = vrot.lane.b32.xlu1 %v2592_v37, %s2037_s17 }
 0x204   :  { %1151 = vrot.lane.b32.xlu0 %v2596_v33, %s2037_s17  ;;  %v2659_v63 = vpop.permute.xlu1 %701 }
 0x206   :  { %v2661_v17 = vpop.permute.xlu0 %703  ;;  %1165 = vrot.lane.b32.xlu1 %v2601_v3, %s2037_s17 }
 0x208   :  { %1167 = vrot.lane.b32.xlu0 %v2605_v16, %s2037_s17  ;;  %v2669_v12 = vpop.permute.xlu1 %717 }
 0x20a   :  { %v2673_v4 = vpop.permute.xlu0 %719  ;;  %1221 = vrot.lane.b32.xlu1 %v2592_v37, %s2039_s18 }
 0x20c   :  { %1223 = vrot.lane.b32.xlu0 %v2596_v33, %s2039_s18  ;;  %v2683_v46 = vpop.permute.xlu1 %773 }
 0x20e   :  { %v2689_v34 = vpop.permute.xlu0 %775  ;;  %705 = vrot.lane.b32.xlu1 %v2677_v0, %s2033_s30 }
 0x210   :  { %707 = vrot.lane.b32.xlu0 %v2685_v61, %s2033_s30  ;;  %v2697_v49 = vpop.permute.xlu1 %789 }
 0x212   :  { %v2701_v22 = vpop.permute.xlu0 %791  ;;  %721 = vrot.lane.b32.xlu1 %v2693_v45, %s2033_s30 }
 0x214   :  { %723 = vrot.lane.b32.xlu0 %v2699_v35, %s2033_s30  ;;  %v2707_v32 = vpop.permute.xlu1 %845 }
 0x216   :  { %v2709_v14 = vpop.permute.xlu0 %847  ;;  %777 = vrot.lane.b32.xlu1 %v2677_v0, %s2031_s29 }
 0x218   :  { %779 = vrot.lane.b32.xlu0 %v2685_v61, %s2031_s29  ;;  %v2715_v60 = vpop.permute.xlu1 %861 }
 0x21a   :  { %v2717_v15 = vpop.permute.xlu0 %863  ;;  %793 = vrot.lane.b32.xlu1 %v2693_v45, %s2031_s29 }
 0x21c   :  { %795 = vrot.lane.b32.xlu0 %v2699_v35, %s2031_s29  ;;  %v2723_v11 = vpop.permute.xlu1 %917 }
 0x21e   :  { %v2725_v28 = vpop.permute.xlu0 %919  ;;  %849 = vrot.lane.b32.xlu1 %v2677_v0, %s2032_s1 }
 0x220   :  { %851 = vrot.lane.b32.xlu0 %v2685_v61, %s2032_s1  ;;  %v2731_v27 = vpop.permute.xlu1 %933 }
 0x222   :  { %v2733_v9 = vpop.permute.xlu0 %935  ;;  %865 = vrot.lane.b32.xlu1 %v2693_v45, %s2032_s1 }
 0x224   :  { %867 = vrot.lane.b32.xlu0 %v2699_v35, %s2032_s1  ;;  %v2739_v18 = vpop.permute.xlu1 %1013 }
 0x225   :  { %4275 = vst [vmem:[#allocation34_spill] sm:$0xff] %v2739_v18  ;;  %v1473_v18 = vld [vmem:[%s4126_s3] sm:$0xf] }
 0x226   :  { %v2741_v8 = vpop.permute.xlu0 %1015  ;;  %921 = vrot.lane.b32.xlu1 %v2677_v0, %s2034_s14 }
 0x227   :  { %4276 = vst [vmem:[#allocation35_spill] sm:$0xff] %v2741_v8 }
 0x228   :  { %923 = vrot.lane.b32.xlu0 %v2685_v61, %s2034_s14  ;;  %v2747_v41 = vpop.permute.xlu1 %997 }
 0x229   :  { %4277 = vst [vmem:[#allocation36_spill] sm:$0xff] %v2747_v41  ;;  %v1287_v41 = vld [vmem:[%s4125_s8] sm:$0xff] }
 0x22a   :  { %v2749_v40 = vpop.permute.xlu0 %999  ;;  %937 = vrot.lane.b32.xlu1 %v2693_v45, %s2034_s14 }
 0x22b   :  { %4278 = vst [vmem:[#allocation37_spill] sm:$0xff] %v2749_v40 }
 0x22c   :  { %939 = vrot.lane.b32.xlu0 %v2699_v35, %s2034_s14  ;;  %v2755_v2 = vpop.permute.xlu1 %1085 }
 0x22d   :  { %4279 = vst [vmem:[#allocation38_spill] sm:$0xff] %v2755_v2 }
 0x22e   :  { %v2757_v44 = vpop.permute.xlu0 %1087  ;;  %1017 = vrot.lane.b32.xlu1 %v2693_v45, %s2035_s15 }
 0x22f   :  { %4280 = vst [vmem:[#allocation39_spill] sm:$0xff] %v2757_v44 }
 0x230   :  { %1019 = vrot.lane.b32.xlu0 %v2699_v35, %s2035_s15  ;;  %v2763_v1 = vpop.permute.xlu1 %1069 }
 0x231   :  { %4281 = vst [vmem:[#allocation40_spill] sm:$0xff] %v2763_v1 }
 0x232   :  { %v2765_v26 = vpop.permute.xlu0 %1071  ;;  %1001 = vrot.lane.b32.xlu1 %v2677_v0, %s2035_s15 }
 0x233   :  { %4282 = vst [vmem:[#allocation41_spill] sm:$0xff] %v2765_v26 }
 0x234   :  { %1003 = vrot.lane.b32.xlu0 %v2685_v61, %s2035_s15  ;;  %v2771_v42 = vpop.permute.xlu1 %1157 }
 0x235   :  { %4283 = vst [vmem:[#allocation42_spill] sm:$0xff] %v2771_v42 }
 0x236   :  { %v2773_v21 = vpop.permute.xlu0 %1159  ;;  %1089 = vrot.lane.b32.xlu1 %v2693_v45, %s2036_s16 }
 0x237   :  { %4284 = vst [vmem:[#allocation43_spill] sm:$0xff] %v2773_v21  ;;  %v626_v21 = vadd.f32 %v2521_v53, %v2649_v19 }
 0x238   :  { %1091 = vrot.lane.b32.xlu0 %v2699_v35, %s2036_s16  ;;  %v2779_v20 = vpop.permute.xlu1 %1141 }
 0x239   :  { %4285 = vst [vmem:[#allocation44_spill] sm:$0xff] %v2779_v20  ;;  %v630_v20 = vadd.f32 %v2531_v57, %v2653_v24  ;;  %v683_v57 = vadd.f32 %v2533_v59, %v2653_v24 }
 0x23a   :  { %v2781_v55 = vpop.permute.xlu0 %1143  ;;  %1073 = vrot.lane.b32.xlu1 %v2677_v0, %s2036_s16 }
 0x23b   :  { %4286 = vst [vmem:[#allocation45_spill] sm:$0xff] %v2781_v55  ;;  %v2814_v7 = vmax.f32 %v630_v20, 0.0  ;;  %v2838_v1 = vmax.f32 %v683_v57, 0.0 }
 0x23c   :  { %1075 = vrot.lane.b32.xlu0 %v2685_v61, %s2036_s16  ;;  %v2787_v2 = vpop.permute.xlu1 %1229 }
 0x23d   :  { %4287 = vst [vmem:[#allocation46_spill] sm:$0xff] %v2787_v2  ;;  %v679_v2 = vadd.f32 %v2523_v54, %v2649_v19 }
 0x23e   :  { %v2789_v42 = vpop.permute.xlu0 %1231  ;;  %1161 = vrot.lane.b32.xlu1 %v2693_v45, %s2037_s17 }
 0x23f   :  { %4288 = vst [vmem:[#allocation47_spill] sm:$0xff] %v2789_v42  ;;  %v2805_v42 = vmax.f32 %v626_v21, 0.0  ;;  %v2823_v54 = vmax.f32 %v679_v2, 0.0 }
 0x240   :  { %1163 = vrot.lane.b32.xlu0 %v2699_v35, %s2037_s17  ;;  %v2797_v55 = vpop.permute.xlu1 %1213 }
 0x241   :  { %4289 = vst [vmem:[#allocation48_spill] sm:$0xff] %v2797_v55 }
 0x242   :  { %v2801_v62 = vpop.permute.xlu0 %1215  ;;  %1145 = vrot.lane.b32.xlu1 %v2677_v0, %s2037_s17 }
 0x243   :  { %4290 = vst [vmem:[#allocation49_spill] sm:$0xff] %v2801_v62 }
 0x244   :  { %1147 = vrot.lane.b32.xlu0 %v2685_v61, %s2037_s17  ;;  %v710_v53 = vpop.permute.xlu1 %709 }
 0x245   :  { %v741_v55 = vsel %vm60_vm1, %v2659_v63, %v710_v53 }
 0x246   :  { %v712_v62 = vpop.permute.xlu0 %711  ;;  %713 = vrot.lane.b32.xlu1 %v2805_v42, %s2033_s30  ;;  %v750_v19 = vmul.f32 %v741_v55, %v2251_v31  ;;  %v737_v55 = vsel %vm60_vm1, %v710_v53, %v2669_v12 }
 0x247   :  { %v742_v21 = vsel %vm60_vm1, %v2661_v17, %v712_v62  ;;  %v738_v20 = vsel %vm60_vm1, %v712_v62, %v2673_v4 }
 0x248   :  { %v754_v44 = vmul.f32 %v742_v21, %v2251_v31  ;;  %715 = vrot.lane.b32.xlu0 %v2814_v7, %s2033_s30  ;;  %v726_v59 = vpop.permute.xlu1 %725  ;;  %v755_v58 = vmul.f32 %v738_v20, %v2291_v52 }
 0x249   :  { %v733_v24 = vsel %vm60_vm1, %v2669_v12, %v726_v59  ;;  %v745_v2 = vsel %vm60_vm1, %v726_v59, %v2659_v63 }
 0x24a   :  { %v728_v62 = vpop.permute.xlu0 %727  ;;  %729 = vrot.lane.b32.xlu1 %v2823_v54, %s2033_s30  ;;  %v766_v21 = vpack.c.bf16 %v754_v44, %v750_v19  ;;  %v749_v26 = vmul.f32 %v745_v2, %v2288_v51  ;;  %v752_v57 = vmul.f32 %v733_v24, %v2296_v56  ;;  %v751_v19 = vmul.f32 %v737_v55, %v2291_v52 }
 0x24b   :  { %v734_v43 = vsel %vm60_vm1, %v2673_v4, %v728_v62  ;;  %v746_v63 = vsel %vm60_vm1, %v728_v62, %v2661_v17 }
 0x24c   :  { %v753_v12 = vmul.f32 %v746_v63, %v2288_v51  ;;  %v756_v53 = vmul.f32 %v734_v43, %v2296_v56  ;;  %731 = vrot.lane.b32.xlu0 %v2838_v1, %s2033_s30  ;;  %1307 = vmatprep.subr.bf16.mxu0 %v766_v21  ;;  %v2858_v44 = vpop.permute.xlu1 %781  ;;  %v767_v59 = vpack.c.bf16 %v755_v58, %v751_v19 }
 0x24e   :  { %v765_v20 = vpack.c.bf16 %v753_v12, %v749_v26  ;;  %v2861_v4 = vpop.permute.xlu0 %783  ;;  %785 = vrot.lane.b32.xlu1 %v2805_v42, %s2031_s29  ;;  %v768_v17 = vpack.c.bf16 %v756_v53, %v752_v57 }
 0x250   :  { %787 = vrot.lane.b32.xlu0 %v2814_v7, %s2031_s29  ;;  %1308 = vmatpush1.bf16.msra.mxu0 %v765_v20  ;;  %v2867_v43 = vpop.permute.xlu1 %797 }
 0x251   :  { %1389 = vmatprep.subr.bf16.mxu1 %v768_v17 }
 0x252   :  { %1390 = vmatpush1.bf16.msra.mxu1 %v767_v59  ;;  %v2869_v24 = vpop.permute.xlu0 %799  ;;  %801 = vrot.lane.b32.xlu1 %v2823_v54, %s2031_s29 }
 0x254   :  { %803 = vrot.lane.b32.xlu0 %v2838_v1, %s2031_s29  ;;  %v2875_v26 = vpop.permute.xlu1 %853 }
 0x256   :  { %v2877_v2 = vpop.permute.xlu0 %855  ;;  %857 = vrot.lane.b32.xlu1 %v2805_v42, %s2032_s1 }
 0x258   :  { %859 = vrot.lane.b32.xlu0 %v2814_v7, %s2032_s1  ;;  %v2883_v58 = vpop.permute.xlu1 %869 }
 0x25a   :  { %v2885_v55 = vpop.permute.xlu0 %871  ;;  %873 = vrot.lane.b32.xlu1 %v2823_v54, %s2032_s1 }
 0x25c   :  { %875 = vrot.lane.b32.xlu0 %v2838_v1, %s2032_s1  ;;  %v2891_v62 = vpop.permute.xlu1 %925 }
 0x25e   :  { %v2893_v21 = vpop.permute.xlu0 %927  ;;  %929 = vrot.lane.b32.xlu1 %v2805_v42, %s2034_s14 }
 0x260   :  { %931 = vrot.lane.b32.xlu0 %v2814_v7, %s2034_s14  ;;  %v2899_v63 = vpop.permute.xlu1 %941 }
 0x261   :  { %4291 = vst [vmem:[#allocation50_spill] sm:$0xff] %v2899_v63 }
 0x262   :  { %v2901_v57 = vpop.permute.xlu0 %943  ;;  %945 = vrot.lane.b32.xlu1 %v2823_v54, %s2034_s14 }
 0x263   :  { %4292 = vst [vmem:[#allocation51_spill] sm:$0xff] %v2901_v57 }
 0x264   :  { %947 = vrot.lane.b32.xlu0 %v2838_v1, %s2034_s14  ;;  %v2907_v12 = vpop.permute.xlu1 %1005 }
 0x265   :  { %4293 = vst [vmem:[#allocation52_spill] sm:$0xff] %v2907_v12 }
 0x266   :  { %v2909_v53 = vpop.permute.xlu0 %1007  ;;  %1237 = vrot.lane.b32.xlu1 %v2601_v3, %s2039_s18 }
 0x267   :  { %4294 = vst [vmem:[#allocation53_spill] sm:$0xff] %v2909_v53 }
 0x268   :  { %1239 = vrot.lane.b32.xlu0 %v2605_v16, %s2039_s18  ;;  %v2915_v19 = vpop.permute.xlu1 %1021 }
 0x269   :  { %4295 = vst [vmem:[#allocation54_spill] sm:$0xff] %v2915_v19 }
 0x26a   :  { %v2917_v20 = vpop.permute.xlu0 %1023  ;;  %1009 = vrot.lane.b32.xlu1 %v2805_v42, %s2035_s15 }
 0x26b   :  { %4296 = vst [vmem:[#allocation55_spill] sm:$0xff] %v2917_v20 }
 0x26c   :  { %1235 = vrot.lane.b32.xlu0 %v2699_v35, %s2039_s18  ;;  %v2923_v17 = vpop.permute.xlu1 %1077 }
 0x26d   :  { %4297 = vst [vmem:[#allocation56_spill] sm:$0xff] %v2923_v17 }
 0x26e   :  { %v2925_v59 = vpop.permute.xlu0 %1079  ;;  %1025 = vrot.lane.b32.xlu1 %v2823_v54, %s2035_s15 }
 0x26f   :  { %4298 = vst [vmem:[#allocation57_spill] sm:$0xff] %v2925_v59 }
 0x270   :  { %1011 = vrot.lane.b32.xlu0 %v2814_v7, %s2035_s15  ;;  %v2931_v40 = vpop.permute.xlu1 %1093 }
 0x271   :  { %4299 = vst [vmem:[#allocation58_spill] sm:$0xff] %v2931_v40 }
 0x272   :  { %v2933_v19 = vpop.permute.xlu0 %1095  ;;  %1081 = vrot.lane.b32.xlu1 %v2805_v42, %s2036_s16 }
 0x273   :  { %4300 = vst [vmem:[#allocation59_spill] sm:$0xff] %v2933_v19 }
 0x274   :  { %1027 = vrot.lane.b32.xlu0 %v2838_v1, %s2035_s15  ;;  %v2939_v20 = vpop.permute.xlu1 %1149 }
 0x275   :  { %4301 = vst [vmem:[#allocation60_spill] sm:$0xff] %v2939_v20 }
 0x276   :  { %v2941_v17 = vpop.permute.xlu0 %1151  ;;  %1097 = vrot.lane.b32.xlu1 %v2823_v54, %s2036_s16 }
 0x277   :  { %4302 = vst [vmem:[#allocation61_spill] sm:$0xff] %v2941_v17  ;;  %v2960_v17 = vld [vmem:[%s4124_s7] sm:$0xff] }
 0x278   :  { %1083 = vrot.lane.b32.xlu0 %v2814_v7, %s2036_s16  ;;  %v2947_v59 = vpop.permute.xlu1 %1165  ;;  %4306 = vst [vmem:[#allocation65_spill] sm:$0xff] %v2960_v17 }
 0x279   :  { %4303 = vst [vmem:[#allocation62_spill] sm:$0xff] %v2947_v59 }
 0x27a   :  { %v2949_v40 = vpop.permute.xlu0 %1167  ;;  %1153 = vrot.lane.b32.xlu1 %v2805_v42, %s2037_s17 }
 0x27b   :  { %4304 = vst [vmem:[#allocation63_spill] sm:$0xff] %v2949_v40  ;;  %v1990_v40 = vcombine.high %v2960_v17, %v2960_v17 }
 0x27c   :  { %1099 = vrot.lane.b32.xlu0 %v2838_v1, %s2036_s16  ;;  %v2955_v19 = vpop.permute.xlu1 %1221 }
 0x27d   :  { %4305 = vst [vmem:[#allocation64_spill] sm:$0xff] %v2955_v19  ;;  %1339 = vmatprep.mubr.bf16.mxu0 %v1990_v40  ;;  %1421 = vmatprep.mubr.bf16.mxu1 %v1990_v40 }
 0x27e   :  { %v2962_v20 = vpop.permute.xlu0 %1223  ;;  %1169 = vrot.lane.b32.xlu1 %v2823_v54, %s2037_s17 }
 0x27f   :  { %4307 = vst [vmem:[#allocation66_spill] sm:$0xff] %v2962_v20 }
 0x280   :  { %1155 = vrot.lane.b32.xlu0 %v2814_v7, %s2037_s17  ;;  %v2970_v59 = vpop.permute.xlu1 %705 }
 0x282   :  { %v2972_v19 = vpop.permute.xlu0 %707  ;;  %1225 = vrot.lane.b32.xlu1 %v2805_v42, %s2039_s18 }
 0x284   :  { %1171 = vrot.lane.b32.xlu0 %v2838_v1, %s2037_s17  ;;  %v2978_v20 = vpop.permute.xlu1 %721 }
 0x286   :  { %v2980_v53 = vpop.permute.xlu0 %723  ;;  %1233 = vrot.lane.b32.xlu1 %v2693_v45, %s2039_s18 }
 0x288   :  { %1219 = vrot.lane.b32.xlu0 %v2685_v61, %s2039_s18  ;;  %v2986_v17 = vpop.permute.xlu1 %777 }
 0x289   :  { %4308 = vst [vmem:[#allocation67_spill] sm:$0xff] %v2986_v17 }
 0x28a   :  { %v2988_v40 = vpop.permute.xlu0 %779  ;;  %1217 = vrot.lane.b32.xlu1 %v2677_v0, %s2039_s18 }
 0x28b   :  { %4309 = vst [vmem:[#allocation68_spill] sm:$0xff] %v2988_v40 }
 0x28c   :  { %1227 = vrot.lane.b32.xlu0 %v2814_v7, %s2039_s18  ;;  %v2994_v8 = vpop.permute.xlu1 %793 }
 0x28d   :  { %4310 = vst [vmem:[#allocation69_spill] sm:$0xff] %v2994_v8 }
 0x28e   :  { %v2996_v30 = vpop.permute.xlu0 %795  ;;  %1241 = vrot.lane.b32.xlu1 %v2823_v54, %s2039_s18 }
 0x28f   :  { %4311 = vst [vmem:[#allocation70_spill] sm:$0xff] %v2996_v30 }
 0x290   :  { %1243 = vrot.lane.b32.xlu0 %v2838_v1, %s2039_s18  ;;  %v3005_v12 = vpop.permute.xlu1 %849 }
 0x291   :  { %4312 = vst [vmem:[#allocation71_spill] sm:$0xff] %v3005_v12 }
 0x292   :  { %v3010_v57 = vpop.permute.xlu0 %851  ;;  %1290 = vperm.xlu1 %2021, %v1287_v41  }
 0x293   :  { %4313 = vst [vmem:[#allocation72_spill] sm:$0xff] %v3010_v57 }
 0x294   :  { %1476 = vperm.xlu0 %2020, %v1473_v18   ;;  %v3015_v8 = vpop.permute.xlu1 %865 }
 0x295   :  { %4314 = vst [vmem:[#allocation73_spill] sm:$0xff] %v3015_v8 }
 0x296   :  { %v3017_v5 = vpop.permute.xlu0 %867  ;;  %1491 = vperm.xlu1 %2021, %v1488_v10  }
 0x297   :  { %4315 = vst [vmem:[#allocation74_spill] sm:$0xff] %v3017_v5 }
 0x298   :  { %v3019_v30 = vpop.permute.xlu1 %921 }
 0x29a   :  { %v3021_v12 = vpop.permute.xlu0 %923 }
 0x29c   :  { %v3023_v40 = vpop.permute.xlu1 %937 }
 0x29d   :  { %4316 = vst [vmem:[#allocation75_spill] sm:$0xff] %v3023_v40  ;;  %v810_v40 = vsel %vm103_vm0, %v2861_v4, %v2701_v22 }
 0x29e   :  { %v3025_v63 = vpop.permute.xlu0 %939 }
 0x29f   :  { %4317 = vst [vmem:[#allocation76_spill] sm:$0xff] %v3025_v63 }
 0x2a0   :  { %v3027_v57 = vpop.permute.xlu1 %1017 }
 0x2a1   :  { %4318 = vst [vmem:[#allocation77_spill] sm:$0xff] %v3027_v57 }
 0x2a2   :  { %v3029_v41 = vpop.permute.xlu0 %1019 }
 0x2a3   :  { %4319 = vst [vmem:[#allocation78_spill] sm:$0xff] %v3029_v41  ;;  %v809_v41 = vsel %vm103_vm0, %v2858_v44, %v2697_v49 }
 0x2a4   :  { %v3031_v17 = vpop.permute.xlu1 %1001 }
 0x2a5   :  { %4320 = vst [vmem:[#allocation79_spill] sm:$0xff] %v3031_v17 }
 0x2a6   :  { %v3033_v18 = vpop.permute.xlu0 %1003 }
 0x2a7   :  { %4321 = vst [vmem:[#allocation80_spill] sm:$0xff] %v3033_v18  ;;  %v806_v18 = vsel %vm103_vm0, %v2701_v22, %v2869_v24  ;;  %v886_v22 = vsel %vm147_vm2, %v2709_v14, %v2877_v2 }
 0x2a8   :  { %v3035_v8 = vpop.permute.xlu1 %1089 }
 0x2a9   :  { %4322 = vst [vmem:[#allocation81_spill] sm:$0xff] %v3035_v8  ;;  %v818_v8 = vsel %vm103_vm0, %v2869_v24, %v2689_v34 }
 0x2aa   :  { %v3037_v5 = vpop.permute.xlu0 %1091 }
 0x2ab   :  { %4323 = vst [vmem:[#allocation82_spill] sm:$0xff] %v3037_v5  ;;  %v813_v5 = vsel %vm103_vm0, %v2683_v46, %v2858_v44  ;;  %v885_v44 = vsel %vm147_vm2, %v2707_v32, %v2875_v26 }
 0x2ac   :  { %v3039_v10 = vpop.permute.xlu1 %1073  ;;  %v3094_v57 = vmul.f32 %v813_v5, %v2232_v23  ;;  %v805_v5 = vsel %vm103_vm0, %v2697_v49, %v2867_v43 }
 0x2ad   :  { %4324 = vst [vmem:[#allocation83_spill] sm:$0xff] %v3039_v10  ;;  %v3064_v10 = vmul.f32 %v810_v40, %v2264_v38  ;;  %v3081_v40 = vmul.f32 %v809_v41, %v2264_v38  ;;  %v817_v41 = vsel %vm103_vm0, %v2867_v43, %v2683_v46  ;;  %v881_v46 = vsel %vm147_vm2, %v2875_v26, %v2715_v60 }
 0x2ae   :  { %v3045_v63 = vpop.permute.xlu0 %1075  ;;  %v3139_v43 = vmul.f32 %v817_v41, %v2238_v25  ;;  %v877_v26 = vsel %vm147_vm2, %v2715_v60, %v2883_v58  ;;  %v878_v41 = vsel %vm147_vm2, %v2717_v15, %v2885_v55 }
 0x2af   :  { %4325 = vst [vmem:[#allocation84_spill] sm:$0xff] %v3045_v63  ;;  %v814_v63 = vsel %vm103_vm0, %v2689_v34, %v2861_v4  ;;  %v882_v34 = vsel %vm147_vm2, %v2877_v2, %v2717_v15  ;;  %v3123_v2 = vmul.f32 %v806_v18, %v2260_v36  ;;  %v3142_v18 = vmul.f32 %v886_v22, %v2248_v29 }
 0x2b0   :  { %v3051_v17 = vpop.permute.xlu1 %1161  ;;  %v3097_v4 = vmul.f32 %v814_v63, %v2232_v23  ;;  %v3116_v63 = vmul.f32 %v818_v8, %v2238_v25  ;;  %v890_v8 = vsel %vm147_vm2, %v2885_v55, %v2709_v14  ;;  %v3153_v14 = vmul.f32 %v805_v5, %v2260_v36 }
 0x2b1   :  { %4326 = vst [vmem:[#allocation85_spill] sm:$0xff] %v3051_v17 }
 0x2b2   :  { %v3072_v17 = vpop.permute.xlu0 %1163  ;;  %v838_v60 = vpack.c.bf16 %v3097_v4, %v3094_v57  ;;  %v3181_v57 = vmul.f32 %v877_v26, %v2282_v48  ;;  %v953_v26 = vsel %vm191_vm3, %v2891_v62, %v2731_v27 }
 0x2b3   :  { %4327 = vst [vmem:[#allocation86_spill] sm:$0xff] %v3072_v17  ;;  %v3130_v17 = vmul.f32 %v882_v34, %v2279_v47  ;;  %v889_v34 = vsel %vm147_vm2, %v2883_v58, %v2707_v32  ;;  %v3167_v32 = vmul.f32 %v885_v44, %v2248_v29  ;;  %v3170_v58 = vmul.f32 %v890_v8, %v2267_v39 }
 0x2b4   :  { %v3107_v24 = vpop.permute.xlu1 %1145  ;;  %v3178_v55 = vmul.f32 %v889_v34, %v2267_v39  ;;  %v840_v44 = vpack.c.bf16 %v3123_v2, %v3153_v14  ;;  %v957_v8 = vsel %vm191_vm3, %v2723_v11, %v2891_v62  ;;  %v954_v2 = vsel %vm191_vm3, %v2893_v21, %v2733_v9 }
 0x2b5   :  { %4328 = vst [vmem:[#allocation87_spill] sm:$0xff] %v3107_v24  ;;  %v3229_v0 = vmul.f32 %v954_v2, %v2308_v6  ;;  %v3243_v2 = vmul.f32 %v953_v26, %v2308_v6 }
 0x2b6   :  { %v3136_v49 = vpop.permute.xlu0 %1147 }
 0x2b7   :  { %4329 = vst [vmem:[#allocation88_spill] sm:$0xff] %v3136_v49  ;;  %v3156_v49 = vmul.f32 %v881_v46, %v2279_v47  ;;  %v3186_v46 = vmul.f32 %v878_v41, %v2282_v48 }
 0x2b8   :  { %v714_v22 = vpop.permute.xlu1 %713 }
 0x2b9   :  { %v743_v5 = vsel %vm60_vm1, %v2970_v59, %v714_v22  ;;  %v739_v62 = vsel %vm60_vm1, %v714_v22, %v2978_v20 }
 0x2ba   :  { %v716_v4 = vpop.permute.xlu0 %715  ;;  %v758_v14 = vmul.f32 %v743_v5, %v2251_v31 }
 0x2bb   :  { %v744_v34 = vsel %vm60_vm1, %v2972_v19, %v716_v4  ;;  %v740_v41 = vsel %vm60_vm1, %v716_v4, %v2980_v53  ;;  %v3219_v4 = vmul.f32 %v957_v8, %v2285_v50 }
 0x2bc   :  { %v762_v15 = vmul.f32 %v744_v34, %v2251_v31  ;;  %v730_v24 = vpop.permute.xlu1 %729  ;;  %v958_v34 = vsel %vm191_vm3, %v2725_v28, %v2893_v21  ;;  %v763_v61 = vmul.f32 %v740_v41, %v2291_v52 }
 0x2bd   :  { %v735_v35 = vsel %vm60_vm1, %v2978_v20, %v730_v24  ;;  %v747_v5 = vsel %vm60_vm1, %v730_v24, %v2970_v59 }
 0x2be   :  { %v732_v45 = vpop.permute.xlu0 %731  ;;  %v770_v31 = vpack.c.bf16 %v762_v15, %v758_v14  ;;  %v757_v21 = vmul.f32 %v747_v5, %v2288_v51  ;;  %v760_v8 = vmul.f32 %v735_v35, %v2296_v56  ;;  %v759_v14 = vmul.f32 %v739_v62, %v2291_v52  ;;  %v4332_v52 = vld [vmem:[#allocation68_spill] sm:$0xff] }
 0x2bf   :  { %v736_v59 = vsel %vm60_vm1, %v2980_v53, %v732_v45  ;;  %v748_v24 = vsel %vm60_vm1, %v732_v45, %v2972_v19  ;;  %v4330_v53 = vld [vmem:[#allocation67_spill] sm:$0xff]  ;;  %v3252_v35 = vmul.f32 %v958_v34, %v2285_v50  ;;  %v4331_v19 = vld [vmem:[#allocation50_spill] sm:$0xff]  ;;  %v983_v62 = vpack.c.bf16 %v3229_v0, %v3243_v2 }
 0x2c0   :  { %v761_v20 = vmul.f32 %v748_v24, %v2288_v51  ;;  %v764_v22 = vmul.f32 %v736_v59, %v2296_v56  ;;  %1309 = vmatprep.subr.bf16.mxu0 %v770_v31  ;;  %v786_v15 = vpop.permute.xlu1 %785  ;;  %v961_v31 = vsel %vm191_vm3, %v4331_v19, %v2723_v11  ;;  %v949_v24 = vsel %vm191_vm3, %v2731_v27, %v4331_v19  ;;  %v4333_v51 = vld [vmem:[#allocation70_spill] sm:$0xff]  ;;  %v4335_v27 = vld [vmem:[#allocation69_spill] sm:$0xff] }
 0x2c1   :  { %v815_v41 = vsel %vm103_vm0, %v4330_v53, %v786_v15  ;;  %v771_v45 = vpack.c.bf16 %v763_v61, %v759_v14 }
 0x2c2   :  { %v769_v5 = vpack.c.bf16 %v761_v20, %v757_v21  ;;  %v788_v26 = vpop.permute.xlu0 %787  ;;  %v772_v59 = vpack.c.bf16 %v764_v22, %v760_v8  ;;  %v830_v56 = vmul.f32 %v815_v41, %v2232_v23  ;;  %v4334_v20 = vld [vmem:[#allocation7_spill] sm:$0xff]  ;;  %v4336_v41 = vld [vmem:[#allocation9_spill] sm:$0xff] }
 0x2c3   :  { %v816_v34 = vsel %vm103_vm0, %v4332_v52, %v788_v26  ;;  %v812_v11 = vsel %vm103_vm0, %v788_v26, %v4333_v51  ;;  %v3273_v22 = vmul.f32 %v961_v31, %v4334_v20  ;;  %v3282_v19 = vmul.f32 %v949_v24, %v4336_v41 }
 0x2c4   :  { %v834_v21 = vmul.f32 %v816_v34, %v2232_v23  ;;  %1310 = vmatpush1.bf16.msra.mxu0 %v769_v5  ;;  %1391 = vmatprep.subr.bf16.mxu1 %v772_v59  ;;  %v802_v8 = vpop.permute.xlu1 %801  ;;  %v4337_v5 = vld [vmem:[#allocation51_spill] sm:$0xff]  ;;  %v811_v31 = vsel %vm103_vm0, %v786_v15, %v4335_v27 }
 0x2c5   :  { %v807_v61 = vsel %vm103_vm0, %v4335_v27, %v802_v8  ;;  %v819_v14 = vsel %vm103_vm0, %v802_v8, %v4330_v53  ;;  %1311 = vmatprep.subr.bf16.mxu0 %v838_v60  ;;  %1392 = vmatpush1.bf16.msra.mxu1 %v771_v45  ;;  %v962_v26 = vsel %vm191_vm3, %v4337_v5, %v2725_v28  ;;  %v4339_v8 = vld [vmem:[#allocation71_spill] sm:$0xff] }
 0x2c6   :  { %v804_v59 = vpop.permute.xlu0 %803  ;;  %1393 = vmatprep.subr.bf16.mxu1 %v840_v44  ;;  %v842_v34 = vpack.c.bf16 %v834_v21, %v830_v56  ;;  %v950_v60 = vsel %vm191_vm3, %v2733_v9, %v4337_v5  ;;  %v835_v53 = vmul.f32 %v812_v11, %v2264_v38  ;;  %v829_v15 = vmul.f32 %v819_v14, %v2238_v25 }
 0x2c7   :  { %v808_v45 = vsel %vm103_vm0, %v4333_v51, %v804_v59  ;;  %v820_v28 = vsel %vm103_vm0, %v804_v59, %v4332_v52  ;;  %v832_v44 = vmul.f32 %v807_v61, %v2260_v36  ;;  %v4338_v9 = vpack.c.bf16 %v3116_v63, %v3139_v43 }
 0x2c8   :  { %v833_v56 = vmul.f32 %v820_v28, %v2238_v25  ;;  %v836_v24 = vmul.f32 %v808_v45, %v2260_v36  ;;  %v858_v11 = vpop.permute.xlu1 %857  ;;  %v3310_v21 = vmul.f32 %v962_v26, %v4334_v20  ;;  %v831_v51 = vmul.f32 %v811_v31, %v2264_v38  ;;  %v4341_v26 = vld [vmem:[#allocation34_spill] sm:$0xff]  ;;  %v4342_v31 = vld [vmem:[#allocation52_spill] sm:$0xff] }
 0x2c9   :  { %1312 = vmatpush1.bf16.msra.mxu0 %v4338_v9  ;;  %v887_v52 = vsel %vm147_vm2, %v4339_v8, %v858_v11  ;;  %v4340_v27 = vpack.c.bf16 %v3064_v10, %v3081_v40  ;;  %v3320_v61 = vmul.f32 %v950_v60, %v4336_v41  ;;  %v982_v5 = vpack.c.bf16 %v3252_v35, %v3219_v4  ;;  %v4344_v45 = vld [vmem:[#allocation72_spill] sm:$0xff] }
 0x2ca   :  { %1313 = vmatprep.subr.bf16.mxu0 %v842_v34  ;;  %v841_v63 = vpack.c.bf16 %v833_v56, %v829_v15  ;;  %v860_v43 = vpop.permute.xlu0 %859  ;;  %v844_v14 = vpack.c.bf16 %v836_v24, %v832_v44  ;;  %v1033_v59 = vsel %vm239_vm7, %v4342_v31, %v4341_v26  ;;  %v4343_v34 = vld [vmem:[#allocation36_spill] sm:$0xff]  ;;  %v843_v40 = vpack.c.bf16 %v835_v53, %v831_v51  ;;  %v4345_v15 = vld [vmem:[#allocation74_spill] sm:$0xff]  ;;  %v4346_v24 = vld [vmem:[#allocation73_spill] sm:$0xff] }
 0x2cb   :  { %1394 = vmatpush1.bf16.msra.mxu1 %v4340_v27  ;;  %v1037_v10 = vsel %vm239_vm7, %v4343_v34, %v4342_v31  ;;  %v888_v60 = vsel %vm147_vm2, %v4344_v45, %v860_v43  ;;  %v902_v28 = vmul.f32 %v887_v52, %v2248_v29  ;;  %v884_v4 = vsel %vm147_vm2, %v860_v43, %v4345_v15  ;;  %v4348_v52 = vld [vmem:[#allocation13_spill] sm:$0xff] }
 0x2cc   :  { %v906_v35 = vmul.f32 %v888_v60, %v2248_v29  ;;  %1395 = vmatprep.subr.bf16.mxu1 %v844_v14  ;;  %v874_v44 = vpop.permute.xlu1 %873  ;;  %v981_v56 = vpack.c.bf16 %v3310_v21, %v3273_v22  ;;  %v4347_v51 = vpack.c.bf16 %v3142_v18, %v3167_v32  ;;  %v3352_v27 = vmul.f32 %v1037_v10, %v4348_v52  ;;  %v4350_v43 = vld [vmem:[#allocation53_spill] sm:$0xff] }
 0x2cd   :  { %1314 = vmatpush1.bf16.msra.mxu0 %v841_v63  ;;  %v879_v53 = vsel %vm147_vm2, %v4346_v24, %v874_v44  ;;  %v891_v9 = vsel %vm147_vm2, %v874_v44, %v4339_v8  ;;  %v4349_v63 = vld [vmem:[#allocation35_spill] sm:$0xff]  ;;  %v883_v21 = vsel %vm147_vm2, %v858_v11, %v4346_v24  ;;  %v4351_v8 = vpack.c.bf16 %v3186_v46, %v3181_v57  ;;  %v4352_v32 = vld [vmem:[#allocation37_spill] sm:$0xff]  ;;  %v4354_v44 = vld [vmem:[#allocation10_spill] sm:$0xff] }
 0x2ce   :  { %1315 = vmatprep.subr.bf16.mxu0 %v4347_v51  ;;  %v1034_v22 = vsel %vm239_vm7, %v4350_v43, %v4349_v63  ;;  %v876_v14 = vpop.permute.xlu0 %875  ;;  %v914_v18 = vpack.c.bf16 %v906_v35, %v902_v28  ;;  %v1038_v31 = vsel %vm239_vm7, %v4352_v32, %v4350_v43  ;;  %v907_v10 = vmul.f32 %v884_v4, %v2279_v47 }
 0x2cf   :  { %1396 = vmatpush1.bf16.msra.mxu1 %v843_v40  ;;  %v880_v40 = vsel %vm147_vm2, %v4345_v15, %v876_v14  ;;  %v892_v11 = vsel %vm147_vm2, %v876_v14, %v4344_v45  ;;  %v901_v60 = vmul.f32 %v891_v9, %v2267_v39  ;;  %v904_v57 = vmul.f32 %v879_v53, %v2282_v48 }
 0x2d0   :  { %1397 = vmatprep.subr.bf16.mxu1 %v4351_v8  ;;  %v905_v46 = vmul.f32 %v892_v11, %v2267_v39  ;;  %v908_v28 = vmul.f32 %v880_v40, %v2282_v48  ;;  %v4353_v35 = vpack.c.bf16 %v3170_v58, %v3178_v55  ;;  %v930_v4 = vpop.permute.xlu1 %929  ;;  %v3383_v24 = vmul.f32 %v1033_v59, %v4354_v44  ;;  %v4359_v11 = vld [vmem:[#allocation55_spill] sm:$0xff] }
 0x2d1   :  { %v903_v15 = vmul.f32 %v883_v21, %v2279_v47  ;;  %v959_v45 = vsel %vm191_vm3, %v3019_v30, %v930_v4  ;;  %v4355_v53 = vpack.c.bf16 %v3130_v17, %v3156_v49  ;;  %v3393_v9 = vmul.f32 %v1038_v31, %v4348_v52  ;;  %v4356_v21 = vld [vmem:[#allocation54_spill] sm:$0xff] }
 0x2d2   :  { %1316 = vmatpush1.bf16.msra.mxu0 %v4353_v35  ;;  %v913_v58 = vpack.c.bf16 %v905_v46, %v901_v60  ;;  %v932_v55 = vpop.permute.xlu0 %931  ;;  %v916_v51 = vpack.c.bf16 %v908_v28, %v904_v57  ;;  %v984_v59 = vpack.c.bf16 %v3320_v61, %v3282_v19  ;;  %v3398_v43 = vmul.f32 %v1034_v22, %v4354_v44  ;;  %v4358_v22 = vld [vmem:[#allocation75_spill] sm:$0xff] }
 0x2d3   :  { %1317 = vmatprep.subr.bf16.mxu0 %v914_v18  ;;  %1398 = vmatpush1.bf16.msra.mxu1 %v4355_v53  ;;  %v1029_v14 = vsel %vm239_vm7, %v4341_v26, %v4356_v21  ;;  %v915_v8 = vpack.c.bf16 %v907_v10, %v903_v15  ;;  %v960_v17 = vsel %vm191_vm3, %v3021_v12, %v932_v55  ;;  %v4357_v18 = vld [vmem:[#allocation76_spill] sm:$0xff] }
 0x2d4   :  { %v974_v49 = vmul.f32 %v959_v45, %v2285_v50  ;;  %v956_v31 = vsel %vm191_vm3, %v932_v55, %v4357_v18  ;;  %v978_v19 = vmul.f32 %v960_v17, %v2285_v50  ;;  %1399 = vmatprep.subr.bf16.mxu1 %v916_v51  ;;  %v946_v61 = vpop.permute.xlu1 %945  ;;  %v1041_v26 = vsel %vm239_vm7, %v4356_v21, %v4343_v34  ;;  %v4362_v51 = vld [vmem:[#allocation12_spill] sm:$0xff] }
 0x2d5   :  { %v951_v10 = vsel %vm191_vm3, %v4358_v22, %v946_v61  ;;  %v963_v40 = vsel %vm191_vm3, %v946_v61, %v3019_v30  ;;  %v1030_v60 = vsel %vm239_vm7, %v4349_v63, %v4359_v11  ;;  %v1042_v34 = vsel %vm239_vm7, %v4359_v11, %v4352_v32  ;;  %v4360_v30 = vld [vmem:[#allocation57_spill] sm:$0xff]  ;;  %v4363_v21 = vld [vmem:[#allocation56_spill] sm:$0xff]  ;;  %v4366_v61 = vld [vmem:[#allocation14_spill] sm:$0xff] }
 0x2d6   :  { %1318 = vmatpush1.bf16.msra.mxu0 %v913_v58  ;;  %v955_v57 = vsel %vm191_vm3, %v930_v4, %v4358_v22  ;;  %v948_v46 = vpop.permute.xlu0 %947  ;;  %v986_v28 = vpack.c.bf16 %v978_v19, %v974_v49  ;;  %v979_v15 = vmul.f32 %v956_v31, %v2308_v6  ;;  %v973_v4 = vmul.f32 %v963_v40, %v4334_v20  ;;  %v4368_v11 = vld [vmem:[#allocation59_spill] sm:$0xff] }
 0x2d7   :  { %1319 = vmatprep.subr.bf16.mxu0 %v982_v5  ;;  %1400 = vmatpush1.bf16.msra.mxu1 %v915_v8  ;;  %v4361_v5 = vld [vmem:[#allocation41_spill] sm:$0xff]  ;;  %v952_v63 = vsel %vm191_vm3, %v4357_v18, %v948_v46  ;;  %v964_v32 = vsel %vm191_vm3, %v948_v46, %v3021_v12  ;;  %v976_v45 = vmul.f32 %v951_v10, %v4336_v41  ;;  %v4364_v8 = vld [vmem:[#allocation40_spill] sm:$0xff] }
 0x2d8   :  { %1401 = vmatprep.subr.bf16.mxu1 %v984_v59  ;;  %v1110_v35 = vsel %vm283_vm8, %v4361_v5, %v4360_v30  ;;  %v977_v53 = vmul.f32 %v964_v32, %v4334_v20  ;;  %v980_v58 = vmul.f32 %v952_v63, %v4336_v41  ;;  %v3448_v55 = vpop.permute.xlu1 %1237  ;;  %v3451_v59 = vmul.f32 %v1029_v14, %v4362_v51  ;;  %v4367_v10 = vld [vmem:[#allocation16_spill] sm:$0xff] }
 0x2d9   :  { %v1109_v17 = vsel %vm283_vm8, %v4364_v8, %v4363_v21  ;;  %v975_v12 = vmul.f32 %v955_v57, %v2308_v6  ;;  %v3462_v49 = vmul.f32 %v1030_v60, %v4362_v51  ;;  %v1052_v22 = vmul.f32 %v1042_v34, %v4366_v61  ;;  %v4369_v60 = vld [vmem:[#allocation38_spill] sm:$0xff] }
 0x2da   :  { %1320 = vmatpush1.bf16.msra.mxu0 %v981_v56  ;;  %v4365_v56 = vld [vmem:[#allocation39_spill] sm:$0xff]  ;;  %v985_v18 = vpack.c.bf16 %v977_v53, %v973_v4  ;;  %v3468_v31 = vpop.permute.xlu0 %1239  ;;  %v988_v19 = vpack.c.bf16 %v980_v58, %v976_v45  ;;  %v3472_v40 = vmul.f32 %v1110_v35, %v4367_v10  ;;  %v1105_v57 = vsel %vm283_vm8, %v4363_v21, %v4369_v60  ;;  %v4371_v35 = vld [vmem:[#allocation58_spill] sm:$0xff] }
 0x2db   :  { %1321 = vmatprep.subr.bf16.mxu0 %v986_v28  ;;  %1402 = vmatpush1.bf16.msra.mxu1 %v983_v62  ;;  %v1106_v14 = vsel %vm283_vm8, %v4360_v30, %v4365_v56  ;;  %v1102_v0 = vsel %vm283_vm8, %v4365_v56, %v4368_v11  ;;  %v987_v2 = vpack.c.bf16 %v979_v15, %v975_v12  ;;  %v4370_v28 = vld [vmem:[#allocation11_spill] sm:$0xff]  ;;  %v4379_v56 = vld [vmem:[#allocation26_spill] sm:$0xff] }
 0x2dc   :  { %v1048_v62 = vmul.f32 %v1041_v26, %v4366_v61  ;;  %v3484_v46 = vmul.f32 %v1109_v17, %v4367_v10  ;;  %1403 = vmatprep.subr.bf16.mxu1 %v988_v19  ;;  %v1010_v34 = vpop.permute.xlu1 %1009  ;;  %v3487_v30 = vmul.f32 %v1106_v14, %v4370_v28  ;;  %v1101_v15 = vsel %vm283_vm8, %v4369_v60, %v4371_v35  ;;  %v4373_v45 = vld [vmem:[#allocation15_spill] sm:$0xff]  ;;  %v4375_v17 = vld [vmem:[#allocation17_spill] sm:$0xff]  ;;  %v4381_v19 = vld [vmem:[#allocation42_spill] sm:$0xff] }
 0x2dd   :  { %v1113_v26 = vsel %vm283_vm8, %v4371_v35, %v4364_v8  ;;  %v4372_v63 = vpack.c.bf16 %v2596_v33, %v2592_v37  ;;  %v1061_v32 = vpack.c.bf16 %v3393_v9, %v3352_v27  ;;  %v1114_v4 = vsel %vm283_vm8, %v4368_v11, %v4361_v5  ;;  %v4387_v35 = vld [vmem:[#allocation44_spill] sm:$0xff] }
 0x2de   :  { %1322 = vmatpush1.bf16.msra.mxu0 %v985_v18  ;;  %v3507_v53 = vmul.f32 %v1102_v0, %v4373_v45  ;;  %v3509_v58 = vpop.permute.xlu0 %1235  ;;  %v4374_v21 = vpack.c.bf16 %v2605_v16, %v2601_v3  ;;  %v1062_v37 = vpack.c.bf16 %v3398_v43, %v3383_v24  ;;  %v1063_v33 = vpack.c.bf16 %v3462_v49, %v3451_v59  ;;  %v4376_v3 = vld [vmem:[#allocation77_spill] sm:$0xff]  ;;  %v4377_v24 = vld [vmem:[#allocation79_spill] sm:$0xff] }
 0x2df   :  { %1323 = vmatprep.subr.bf16.mxu0 %v4372_v63  ;;  %1404 = vmatpush1.bf16.msra.mxu1 %v987_v2  ;;  %v3519_v27 = vmul.f32 %v1105_v57, %v4370_v28  ;;  %v1064_v5 = vpack.c.bf16 %v1052_v22, %v1048_v62  ;;  %v3524_v8 = vmul.f32 %v1101_v15, %v4373_v45  ;;  %v4378_v49 = vld [vmem:[#allocation29_spill] sm:$0xff]  ;;  %v4382_v22 = vld [vmem:[#allocation60_spill] sm:$0xff]  ;;  %v4385_v62 = vld [vmem:[#allocation27_spill] sm:$0xff] }
 0x2e0   :  { %1405 = vmatprep.subr.bf16.mxu1 %v4374_v21  ;;  %v3527_v12 = vmul.f32 %v1113_v26, %v4375_v17  ;;  %v1035_v16 = vsel %vm239_vm7, %v1010_v34, %v4376_v3  ;;  %v1039_v43 = vsel %vm239_vm7, %v4377_v24, %v1010_v34  ;;  %v1026_v59 = vpop.permute.xlu1 %1025  ;;  %v4380_v14 = vpack.c.bf16 %v4378_v49, %v4379_v56  ;;  %v4384_v2 = vld [vmem:[#allocation28_spill] sm:$0xff]  ;;  %v4388_v26 = vld [vmem:[#allocation43_spill] sm:$0xff]  ;;  %v4389_v63 = vld [vmem:[#allocation61_spill] sm:$0xff] }
 0x2e1   :  { %v3539_v18 = vmul.f32 %v1114_v4, %v4375_v17  ;;  %v1177_v11 = vsel %vm327_vm9, %v4382_v22, %v4381_v19  ;;  %v4383_v0 = vpack.c.bf16 %v2814_v7, %v2805_v42  ;;  %v4386_v60 = vpack.c.bf16 %v4384_v2, %v4385_v62  ;;  %v4390_v42 = vld [vmem:[#allocation45_spill] sm:$0xff]  ;;  %v4392_v56 = vld [vmem:[#allocation78_spill] sm:$0xff]  ;;  %v4394_v62 = vld [vmem:[#allocation31_spill] sm:$0xff] }
 0x2e2   :  { %1324 = vmatpush1.bf16.msra.mxu0 %v4380_v14  ;;  %v1134_v57 = vpack.c.bf16 %v3487_v30, %v3519_v27  ;;  %v1181_v15 = vsel %vm327_vm9, %v4387_v35, %v4382_v22  ;;  %v1178_v7 = vsel %vm327_vm9, %v4389_v63, %v4388_v26  ;;  %v1182_v4 = vsel %vm327_vm9, %v4390_v42, %v4389_v63  ;;  %v1012_v21 = vpop.permute.xlu0 %1011  ;;  %v4393_v22 = vld [vmem:[#allocation80_spill] sm:$0xff] }
 0x2e3   :  { %1325 = vmatprep.subr.bf16.mxu0 %v4383_v0  ;;  %1406 = vmatpush1.bf16.msra.mxu1 %v4386_v60  ;;  %v4391_v30 = vpack.c.bf16 %v2838_v1, %v2823_v54  ;;  %v1053_v27 = vmul.f32 %v1039_v43, %v4348_v52  ;;  %v1054_v49 = vmul.f32 %v1035_v16, %v4354_v44  ;;  %v4395_v60 = vld [vmem:[#allocation30_spill] sm:$0xff] }
 0x2e4   :  { %v1036_v14 = vsel %vm239_vm7, %v1012_v21, %v4392_v56  ;;  %v1040_v0 = vsel %vm239_vm7, %v4393_v22, %v1012_v21  ;;  %v1031_v2 = vsel %vm239_vm7, %v4376_v3, %v1026_v59  ;;  %v1043_v1 = vsel %vm239_vm7, %v1026_v59, %v4377_v24  ;;  %v1082_v43 = vpop.permute.xlu1 %1081  ;;  %v4398_v21 = vld [vmem:[#allocation18_spill] sm:$0xff]  ;;  %v4399_v24 = vld [vmem:[#allocation33_spill] sm:$0xff]  ;;  %v4400_v59 = vld [vmem:[#allocation32_spill] sm:$0xff] }
 0x2e5   :  { %1407 = vmatprep.subr.bf16.mxu1 %v4391_v30  ;;  %v1057_v54 = vmul.f32 %v1040_v0, %v4348_v52  ;;  %v1058_v16 = vmul.f32 %v1036_v14, %v4354_v44  ;;  %v4396_v63 = vpack.c.bf16 %v4394_v62, %v4395_v60  ;;  %v4397_v30 = vld [vmem:[#allocation20_spill] sm:$0xff]  ;;  %v3593_v9 = vmul.f32 %v1177_v11, %v4398_v21 }
 0x2e6   :  { %v3590_v34 = vmul.f32 %v1181_v15, %v4397_v30  ;;  %v3596_v3 = vmul.f32 %v1182_v4, %v4397_v30  ;;  %v4401_v0 = vpack.c.bf16 %v4399_v24, %v4400_v59  ;;  %v3602_v14 = vmul.f32 %v1178_v7, %v4398_v21  ;;  %v1028_v62 = vpop.permute.xlu0 %1027 }
 0x2e7   :  { %1326 = vmatpush1.bf16.msra.mxu0 %v4396_v63  ;;  %v1065_v6 = vpack.c.bf16 %v1057_v54, %v1053_v27  ;;  %v1066_v60 = vpack.c.bf16 %v1058_v16, %v1054_v49  ;;  %v1136_v15 = vpack.c.bf16 %v3539_v18, %v3527_v12  ;;  %v1055_v11 = vmul.f32 %v1031_v2, %v4362_v51  ;;  %v4402_v63 = vld [vmem:[#allocation81_spill] sm:$0xff]  ;;  %v4403_v27 = vld [vmem:[#allocation83_spill] sm:$0xff] }
 0x2e8   :  { %1327 = vmatprep.subr.bf16.mxu0 %v1062_v37  ;;  %1408 = vmatpush1.bf16.msra.mxu1 %v4401_v0  ;;  %v1056_v4 = vmul.f32 %v1043_v1, %v4366_v61  ;;  %v1032_v37 = vsel %vm239_vm7, %v4392_v56, %v1028_v62  ;;  %v1044_v7 = vsel %vm239_vm7, %v1028_v62, %v4393_v22  ;;  %v1098_v2 = vpop.permute.xlu1 %1097  ;;  %v4404_v1 = vld [vmem:[#allocation62_spill] sm:$0xff]  ;;  %v4405_v16 = vld [vmem:[#allocation63_spill] sm:$0xff] }
 0x2e9   :  { %1409 = vmatprep.subr.bf16.mxu1 %v1064_v5  ;;  %v1107_v5 = vsel %vm283_vm8, %v1082_v43, %v4402_v63  ;;  %v1111_v12 = vsel %vm283_vm8, %v4403_v27, %v1082_v43  ;;  %v1059_v18 = vmul.f32 %v1032_v37, %v4362_v51  ;;  %v1060_v49 = vmul.f32 %v1044_v7, %v4366_v61  ;;  %v4408_v7 = vld [vmem:[#allocation19_spill] sm:$0xff] }
 0x2ea   :  { %v1205_v56 = vpack.c.bf16 %v3596_v3, %v3590_v34  ;;  %v1173_v22 = vsel %vm327_vm9, %v4381_v19, %v4404_v1  ;;  %v1185_v54 = vsel %vm327_vm9, %v4404_v1, %v4387_v35  ;;  %v1186_v43 = vsel %vm327_vm9, %v4405_v16, %v4390_v42  ;;  %v1084_v59 = vpop.permute.xlu0 %1083  ;;  %v4406_v35 = vld [vmem:[#allocation82_spill] sm:$0xff] }
 0x2eb   :  { %1328 = vmatpush1.bf16.msra.mxu0 %v1061_v32  ;;  %v1174_v32 = vsel %vm327_vm9, %v4388_v26, %v4405_v16  ;;  %v1067_v24 = vpack.c.bf16 %v1059_v18, %v1055_v11  ;;  %v1068_v19 = vpack.c.bf16 %v1060_v49, %v1056_v4  ;;  %v1125_v0 = vmul.f32 %v1111_v12, %v4367_v10 }
 0x2ec   :  { %1329 = vmatprep.subr.bf16.mxu0 %v1066_v60  ;;  %1410 = vmatpush1.bf16.msra.mxu1 %v1063_v33  ;;  %v1126_v62 = vmul.f32 %v1107_v5, %v4370_v28  ;;  %v1108_v33 = vsel %vm283_vm8, %v1084_v59, %v4406_v35  ;;  %v4407_v60 = vld [vmem:[#allocation84_spill] sm:$0xff]  ;;  %v1103_v37 = vsel %vm283_vm8, %v4402_v63, %v1098_v2  ;;  %v1154_v4 = vpop.permute.xlu1 %1153  ;;  %v4409_v63 = vld [vmem:[#allocation21_spill] sm:$0xff] }
 0x2ed   :  { %v1112_v26 = vsel %vm283_vm8, %v4407_v60, %v1084_v59  ;;  %v1130_v11 = vmul.f32 %v1108_v33, %v4370_v28  ;;  %1411 = vmatprep.subr.bf16.mxu1 %v1068_v19  ;;  %v3654_v5 = vmul.f32 %v1173_v22, %v4408_v7  ;;  %v3657_v12 = vmul.f32 %v1174_v32, %v4408_v7  ;;  %v4414_v33 = vld [vmem:[#allocation85_spill] sm:$0xff] }
 0x2ee   :  { %v1129_v42 = vmul.f32 %v1112_v26, %v4367_v10  ;;  %v1115_v18 = vsel %vm283_vm8, %v1098_v2, %v4403_v27  ;;  %v1192_v49 = vmul.f32 %v1185_v54, %v4409_v63  ;;  %v1196_v1 = vmul.f32 %v1186_v43, %v4409_v63  ;;  %v1100_v59 = vpop.permute.xlu0 %1099  ;;  %v4410_v54 = vld [vmem:[#allocation87_spill] sm:$0xff] }
 0x2ef   :  { %1330 = vmatpush1.bf16.msra.mxu0 %v1065_v6  ;;  %v1138_v6 = vpack.c.bf16 %v1130_v11, %v1126_v62  ;;  %v1127_v22 = vmul.f32 %v1103_v37, %v4373_v45  ;;  %v1104_v32 = vsel %vm283_vm8, %v4406_v35, %v1100_v59  ;;  %v1116_v27 = vsel %vm283_vm8, %v1100_v59, %v4407_v60  ;;  %v4412_v35 = vld [vmem:[#allocation46_spill] sm:$0xff]  ;;  %v4416_v37 = vld [vmem:[#allocation47_spill] sm:$0xff] }
 0x2f0   :  { %1331 = vmatprep.subr.bf16.mxu0 %v1134_v57  ;;  %1412 = vmatpush1.bf16.msra.mxu1 %v1067_v24  ;;  %v1137_v16 = vpack.c.bf16 %v1129_v42, %v1125_v0  ;;  %v1206_v57 = vpack.c.bf16 %v3602_v14, %v3593_v9  ;;  %v1128_v2 = vmul.f32 %v1115_v18, %v4375_v17  ;;  %v1170_v19 = vpop.permute.xlu1 %1169  ;;  %v4413_v9 = vld [vmem:[#allocation64_spill] sm:$0xff]  ;;  %v4418_v18 = vld [vmem:[#allocation49_spill] sm:$0xff] }
 0x2f1   :  { %1413 = vmatprep.subr.bf16.mxu1 %v1136_v15  ;;  %v1183_v15 = vsel %vm327_vm9, %v4410_v54, %v1154_v4  ;;  %v1131_v43 = vmul.f32 %v1104_v32, %v4373_v45  ;;  %v1132_v24 = vmul.f32 %v1116_v27, %v4375_v17  ;;  %v4411_v0 = vpack.c.bf16 %v3472_v40, %v3484_v46  ;;  %v4417_v40 = vld [vmem:[#allocation66_spill] sm:$0xff] }
 0x2f2   :  { %v1207_v62 = vpack.c.bf16 %v3657_v12, %v3654_v5  ;;  %v1249_v14 = vsel %vm371_vm10, %v4413_v9, %v4412_v35  ;;  %v1179_v60 = vsel %vm327_vm9, %v1154_v4, %v4414_v33  ;;  %v4415_v26 = vpack.c.bf16 %v3507_v53, %v3524_v8  ;;  %v1156_v11 = vpop.permute.xlu0 %1155  ;;  %v4420_v8 = vld [vmem:[#allocation88_spill] sm:$0xff] }
 0x2f3   :  { %1332 = vmatpush1.bf16.msra.mxu0 %v4411_v0  ;;  %v1250_v46 = vsel %vm371_vm10, %v4417_v40, %v4416_v37  ;;  %v1139_v42 = vpack.c.bf16 %v1131_v43, %v1127_v22  ;;  %v1140_v5 = vpack.c.bf16 %v1132_v24, %v1128_v2  ;;  %v1208_v12 = vpack.c.bf16 %v1196_v1, %v1192_v49  ;;  %v4421_v24 = vld [vmem:[#allocation23_spill] sm:$0xff] }
 0x2f4   :  { %1333 = vmatprep.subr.bf16.mxu0 %v1138_v6  ;;  %1414 = vmatpush1.bf16.msra.mxu1 %v4415_v26  ;;  %v1258_v59 = vsel %vm371_vm10, %v3468_v31, %v4418_v18  ;;  %v1197_v4 = vmul.f32 %v1183_v15, %v4397_v30  ;;  %v4419_v6 = vld [vmem:[#allocation86_spill] sm:$0xff]  ;;  %v1184_v32 = vsel %vm327_vm9, %v4420_v8, %v1156_v11  ;;  %v1226_v1 = vpop.permute.xlu1 %1225 }
 0x2f5   :  { %v1180_v53 = vsel %vm327_vm9, %v1156_v11, %v4419_v6  ;;  %v1198_v22 = vmul.f32 %v1179_v60, %v4398_v21  ;;  %v1201_v27 = vmul.f32 %v1184_v32, %v4397_v30  ;;  %1415 = vmatprep.subr.bf16.mxu1 %v1140_v5  ;;  %v1254_v2 = vsel %vm371_vm10, %v4418_v18, %v4417_v40  ;;  %v4422_v60 = vld [vmem:[#allocation48_spill] sm:$0xff]  ;;  %v4423_v5 = vld [vmem:[#allocation22_spill] sm:$0xff]  ;;  %v4425_v32 = vld [vmem:[#allocation25_spill] sm:$0xff] }
 0x2f6   :  { %v1202_v49 = vmul.f32 %v1180_v53, %v4398_v21  ;;  %v1175_v15 = vsel %vm327_vm9, %v4414_v33, %v1170_v19  ;;  %v1187_v43 = vsel %vm327_vm9, %v1170_v19, %v4410_v54  ;;  %v1266_v0 = vmul.f32 %v1250_v46, %v4421_v24  ;;  %v1172_v11 = vpop.permute.xlu0 %1171 }
 0x2f7   :  { %1334 = vmatpush1.bf16.msra.mxu0 %v1137_v16  ;;  %v1257_v16 = vsel %vm371_vm10, %v3448_v55, %v4422_v60  ;;  %v1209_v26 = vpack.c.bf16 %v1201_v27, %v1197_v4  ;;  %v1246_v33 = vsel %vm371_vm10, %v4416_v37, %v3468_v31  ;;  %v1268_v54 = vmul.f32 %v1258_v59, %v4423_v5  ;;  %v4424_v59 = vld [vmem:[#allocation24_spill] sm:$0xff] }
 0x2f8   :  { %1335 = vmatprep.subr.bf16.mxu0 %v1206_v57  ;;  %1416 = vmatpush1.bf16.msra.mxu1 %v1139_v42  ;;  %v1210_v40 = vpack.c.bf16 %v1202_v49, %v1198_v22  ;;  %v1176_v57 = vsel %vm327_vm9, %v4419_v6, %v1172_v11  ;;  %v1188_v19 = vsel %vm327_vm9, %v1172_v11, %v4420_v8  ;;  %v1234_v4 = vpop.permute.xlu1 %1233 }
 0x2f9   :  { %1417 = vmatprep.subr.bf16.mxu1 %v1208_v12  ;;  %v1199_v46 = vmul.f32 %v1175_v15, %v4408_v7  ;;  %v1200_v42 = vmul.f32 %v1187_v43, %v4409_v63  ;;  %v1203_v12 = vmul.f32 %v1176_v57, %v4408_v7  ;;  %v1204_v18 = vmul.f32 %v1188_v19, %v4409_v63 }
 0x2fa   :  { %v1253_v31 = vsel %vm371_vm10, %v4422_v60, %v4413_v9  ;;  %v1262_v37 = vmul.f32 %v1249_v14, %v4421_v24  ;;  %v1265_v6 = vmul.f32 %v1254_v2, %v4424_v59  ;;  %v1245_v53 = vsel %vm371_vm10, %v4412_v35, %v3448_v55  ;;  %v1220_v3 = vpop.permute.xlu0 %1219  ;;  %v4426_v9 = vld [vmem:[#allocation65_spill] sm:$0xff] }
 0x2fb   :  { %1336 = vmatpush1.bf16.msra.mxu0 %v1205_v56  ;;  %v1264_v8 = vmul.f32 %v1257_v16, %v4423_v5  ;;  %v1211_v34 = vpack.c.bf16 %v1203_v12, %v1199_v46  ;;  %v1212_v56 = vpack.c.bf16 %v1204_v18, %v1200_v42  ;;  %v1267_v22 = vmul.f32 %v1246_v33, %v4425_v32 }
 0x2fc   :  { %1337 = vmatprep.subr.bf16.mxu0 %v1210_v40  ;;  %1418 = vmatpush1.bf16.msra.mxu1 %v1207_v62  ;;  %v1278_v27 = vpack.c.bf16 %v1266_v0, %v1262_v37  ;;  %v1989_v14 = vcombine.low %v4426_v9, %v4426_v9  ;;  %v1261_v49 = vmul.f32 %v1253_v31, %v4424_v59  ;;  %v1218_v2 = vpop.permute.xlu1 %1217  ;;  %v4427_v46 = vmov 0  }
 0x2fd   :  { %v1251_v62 = vsel %vm371_vm10, %v1226_v1, %v1234_v4  ;;  %1419 = vmatprep.subr.bf16.mxu1 %v1212_v56  ;;  %v1280_v55 = vpack.c.bf16 %v1268_v54, %v1264_v8  ;;  %v1263_v35 = vmul.f32 %v1245_v53, %v4425_v32  ;;  %v1255_v15 = vsel %vm371_vm10, %v1218_v2, %v1226_v1 }
 0x2fe   :  { %v1277_v43 = vpack.c.bf16 %v1265_v6, %v1261_v49  ;;  %v1228_v0 = vpop.permute.xlu0 %1227  ;;  %v1270_v16 = vmul.f32 %v1251_v62, %v4421_v24  ;;  %v1269_v40 = vmul.f32 %v1255_v15, %v4424_v59  ;;  %v1472_v15 = vld [vmem:[%s4128_s0 + $0x8] sm:$0xff] }
 0x2ff   :  { %1338 = vmatpush1.bf16.msra.mxu0 %v1209_v26  ;;  %v1279_v60 = vpack.c.bf16 %v1267_v22, %v1263_v35  ;;  %v1252_v11 = vsel %vm371_vm10, %v1228_v0, %v3509_v58  ;;  %v1256_v26 = vsel %vm371_vm10, %v1220_v3, %v1228_v0  ;;  %v2028_v22 = vld [vmem:[%s4124_s7 + $0x8] ss:$0 sps:$4 sm:$0xff]  }
 0x300   :  { %1348 = vmatprep.subr.bf16.mxu0 %v1278_v27  ;;  %1420 = vmatpush1.bf16.msra.mxu1 %v1211_v34  ;;  %v1273_v1 = vmul.f32 %v1256_v26, %v4424_v59  ;;  %v1274_v33 = vmul.f32 %v1252_v11, %v4421_v24  ;;  %v1242_v54 = vpop.permute.xlu1 %1241 }
 0x301   :  { %1430 = vmatprep.subr.bf16.mxu1 %v1280_v55  ;;  %v1247_v57 = vsel %vm371_vm10, %v1234_v4, %v1242_v54  ;;  %v1259_v19 = vsel %vm371_vm10, %v1242_v54, %v1218_v2  ;;  %v1471_v55 = vld [vmem:[%s4128_s0] sm:$0xff] }
 0x302   :  { %1340 = vmatmul.mubr.bf16.vlgmr.msra.gmra.mrb[8].mxu0 %v1989_v14  ;;  %v1281_v42 = vpack.c.bf16 %v1273_v1, %v1269_v40  ;;  %v1244_v12 = vpop.permute.xlu0 %1243  ;;  %v1282_v18 = vpack.c.bf16 %v1274_v33, %v1270_v16  ;;  %v1271_v4 = vmul.f32 %v1247_v57, %v4425_v32  ;;  %v1272_v6 = vmul.f32 %v1259_v19, %v4423_v5 }
 0x303   :  { %1422 = vmatmul.mubr.bf16.vlgmr.msra.gmra.mrb[8].mxu1 %v1989_v14  ;;  %1349 = vmatpush1.bf16.msra.mxu0 %v1277_v43  ;;  %v1248_v31 = vsel %vm371_vm10, %v3509_v58, %v1244_v12  ;;  %v1260_v37 = vsel %vm371_vm10, %v1244_v12, %v1220_v3  ;;  %v2040_v58 = vmov 839922192   ;;  %v4428_v14 = vld [vmem:[#allocation2_spill] sm:$0xff] }
 0x304   :  { %1431 = vmatpush1.bf16.msra.mxu1 %v1279_v60  ;;  %1380 = vmatprep.mubr.bf16.mxu0 %v4427_v46  ;;  %v1275_v53 = vmul.f32 %v1248_v31, %v4425_v32  ;;  %v1276_v8 = vmul.f32 %v1260_v37, %v4423_v5  ;;  %v1479_v3 = vunpack.c.l.s4 %v2040_v58 }
 0x305   :  { %1462 = vmatprep.mubr.bf16.mxu1 %v4427_v46  ;;  %1350 = vmatprep.subr.bf16.mxu0 %v1282_v18 }
 0x306   :  { %v1283_v34 = vpack.c.bf16 %v1275_v53, %v1271_v4  ;;  %v1284_v56 = vpack.c.bf16 %v1276_v8, %v1272_v6  ;;  %v1480_v27 = vunpack.c.0.s8 %v1479_v3 }
 0x307   :  { %1351 = vmatpush1.bf16.msra.mxu0 %v1281_v42 }
 0x308   :  { %1432 = vmatprep.subr.bf16.mxu1 %v1284_v56  ;;  %v1483_v49 = vsub.s32 %v1480_v27, %v4428_v14 }
 0x309   :  { %1433 = vmatpush1.bf16.msra.mxu1 %v1283_v34 }
 0x30e   :  { %1992 = vmatmul.mubr.msk.bf16.vlgmr.msra.gmra.mrb[8].mxu0 %vm1303_vm12, %v2028_v22 }
 0x30f   :  { %1993 = vmatmul.mubr.msk.bf16.vlgmr.msra.gmra.mrb[8].mxu1 %vm1303_vm12, %v2028_v22  ;;  %1869 = vmatprep.mubr.bf16.mxu0 %v4427_v46 }
 0x310   :  { %1910 = vmatprep.mubr.bf16.mxu1 %v4427_v46 }
 0x311   :  { %v1291_v9 = vpop.permute.xlu1 %1290 }
 0x313   :  { %v1477_v62 = vpop.permute.xlu0 %1476 }
 0x314   :  { %v1484_v2 = vrot.slane %v1477_v62, %v1483_v49 }
 0x315   :  { %v1492_v35 = vpop.permute.xlu1 %1491 }
 0x316   :  { %v1486_v11 = vmul.f32 %v1484_v2, %v1471_v55  ;;  %v1499_v26 = vrot.slane %v1492_v35, %v1483_v49  ;;  %v1487_v57 = vmul.f32 %v1484_v2, %v1472_v15  ;;  %v1816_v15 = vld [vmem:[%s4129_s10] sm:$0xf] }
 0x318   :  { %v1501_v8 = vadd.f32 %v1499_v26, %v1486_v11  ;;  %v1502_v56 = vadd.f32 %v1499_v26, %v1487_v57 }
 0x3e1   :  { %v1382_v43 = vpop.f32.mrb[8].mxu0 }
 0x3e2   :  { %v1998_v0 = vadd.f32 %v1382_v43, %v1291_v9  ;;  %v1384_v60 = vpop.f32.mrb[9].mxu0  ;;  %v1464_v16 = vpop.f32.mrb[8].mxu1 }
 0x3e3   :  { %v1999_v40 = vadd.f32 %v1384_v60, %v1291_v9  ;;  %v2000_v1 = vadd.f32 %v1464_v16, %v1291_v9  ;;  %v1386_v33 = vpop.f32.mrb[10].mxu0  ;;  %v1466_v54 = vpop.f32.mrb[9].mxu1 }
 0x3e4   :  { %v1503_v19 = vadd.f32 1.0, %v1998_v0  ;;  %v2001_v46 = vadd.f32 %v1466_v54, %v1291_v9  ;;  %v1387_v42 = vpop.f32.mrb[11].mxu0  ;;  %v1468_v12 = vpop.f32.mrb[10].mxu1 }
 0x3e5   :  { %v1504_v18 = vadd.f32 1.0, %v1999_v40  ;;  %v1521_v31 = vcombine.high %v1998_v0, %v1999_v40  ;;  %v1505_v37 = vadd.f32 1.0, %v2000_v1  ;;  %v1469_v4 = vpop.f32.mrb[11].mxu1 }
 0x3e6   :  { %v1506_v6 = vadd.f32 1.0, %v2001_v46  ;;  %v1522_v53 = vcombine.high %v2000_v1, %v2001_v46 }
 0x3e7   :  { %v1511_v34 = vcombine.low %v1503_v19, %v1504_v18 }
 0x3e8   :  { %v1512_v22 = vcombine.low %v1505_v37, %v1506_v6 }
 0x3e9   :  { %v1515_v58 = vmul.f32 %v1511_v34, %v1501_v8 }
 0x3ea   :  { %v1516_v3 = vmul.f32 %v1512_v22, %v1502_v56 }
 0x3eb   :  { %v1525_v27 = vadd.f32 %v1521_v31, %v1515_v58 }
 0x3ec   :  { %v1526_v14 = vadd.f32 %v1522_v53, %v1516_v3 }
 0x3ed   :  { %vm1527_vm13 = vcmp.ge.f32.partialorder %v1525_v27, 0.0  ;;  %v1529_v49 = vmul.f32 0.2, %v1525_v27 }
 0x3ee   :  { %v1530_v9 = vmul.f32 0.2, %v1526_v14  ;;  %vm1528_vm14 = vcmp.ge.f32.partialorder %v1526_v14, 0.0 }
 0x3ef   :  { %v3801_v62 = vsel %vm1527_vm13, %v1525_v27, %v1529_v49 }
 0x3f0   :  { %1580 = vrot.lane.b32.xlu1 %v3801_v62, %s2032_s1  ;;  %1560 = vrot.lane.b32.xlu0 %v3801_v62, %s2031_s29  ;;  %v3811_v2 = vsel %vm1528_vm14, %v1526_v14, %v1530_v9  ;;  %v3835_v35 = vcombine.high %v3801_v62, %v3801_v62  ;;  %v4429_v9 = vld [vmem:[#allocation4_spill] sm:$0xff] }
 0x3f1   :  { %v3827_v55 = vcombine.high %v3811_v2, %v3811_v2  ;;  %v4435_v13 = vpack.c.bf16 %v3811_v2, %v3811_v2 }
 0x3f4   :  { %1540 = vrot.lane.b32.xlu1 %v3801_v62, %s2033_s30  ;;  %1600 = vrot.lane.b32.xlu0 %v3801_v62, %s2034_s14 }
 0x3f8   :  { %1564 = vrot.lane.b32.xlu1 %v3811_v2, %s2031_s29  ;;  %1544 = vrot.lane.b32.xlu0 %v3811_v2, %s2033_s30 }
 0x3fc   :  { %1584 = vrot.lane.b32.xlu1 %v3811_v2, %s2032_s1  ;;  %1624 = vrot.lane.b32.xlu0 %v3801_v62, %s2035_s15 }
 0x400   :  { %1628 = vrot.lane.b32.xlu1 %v3811_v2, %s2035_s15  ;;  %1648 = vrot.lane.b32.xlu0 %v3811_v2, %s2036_s16 }
 0x404   :  { %1604 = vrot.lane.b32.xlu1 %v3811_v2, %s2034_s14  ;;  %1566 = vrot.lane.b32.xlu0 %v3827_v55, %s2031_s29 }
 0x408   :  { %1644 = vrot.lane.b32.xlu1 %v3801_v62, %s2036_s16  ;;  %1582 = vrot.lane.b32.xlu0 %v3835_v35, %s2032_s1 }
 0x40c   :  { %1668 = vrot.lane.b32.xlu1 %v3811_v2, %s2037_s17  ;;  %1542 = vrot.lane.b32.xlu0 %v3835_v35, %s2033_s30 }
 0x410   :  { %1664 = vrot.lane.b32.xlu1 %v3801_v62, %s2037_s17  ;;  %1546 = vrot.lane.b32.xlu0 %v3827_v55, %s2033_s30 }
 0x414   :  { %1606 = vrot.lane.b32.xlu0 %v3827_v55, %s2034_s14  ;;  %1562 = vrot.lane.b32.xlu1 %v3835_v35, %s2031_s29 }
 0x418   :  { %1626 = vrot.lane.b32.xlu0 %v3835_v35, %s2035_s15  ;;  %1586 = vrot.lane.b32.xlu1 %v3827_v55, %s2032_s1 }
 0x41c   :  { %1666 = vrot.lane.b32.xlu0 %v3835_v35, %s2037_s17  ;;  %1602 = vrot.lane.b32.xlu1 %v3835_v35, %s2034_s14 }
 0x420   :  { %1630 = vrot.lane.b32.xlu0 %v3827_v55, %s2035_s15  ;;  %1646 = vrot.lane.b32.xlu1 %v3835_v35, %s2036_s16 }
 0x424   :  { %1650 = vrot.lane.b32.xlu0 %v3827_v55, %s2036_s16  ;;  %1670 = vrot.lane.b32.xlu1 %v3827_v55, %s2037_s17 }
 0x428   :  { %1684 = vrot.lane.b32.xlu0 %v3801_v62, %s2039_s18  ;;  %1686 = vrot.lane.b32.xlu1 %v3835_v35, %s2039_s18 }
 0x42c   :  { %1688 = vrot.lane.b32.xlu0 %v3811_v2, %s2039_s18  ;;  %1690 = vrot.lane.b32.xlu1 %v3827_v55, %s2039_s18 }
 0x430   :  { %1819 = vperm.xlu0 %2020, %v1816_v15  }
 0x462   :  { %v3880_v43 = vpop.permute.xlu1 %1580  ;;  %v1561_v0 = vpop.permute.xlu0 %1560 }
 0x466   :  { %v1541_v60 = vpop.permute.xlu1 %1540  ;;  %v3882_v16 = vpop.permute.xlu0 %1600 }
 0x46a   :  { %v1565_v11 = vpop.permute.xlu1 %1564  ;;  %v1545_v26 = vpop.permute.xlu0 %1544 }
 0x46e   :  { %v3884_v40 = vpop.permute.xlu1 %1584  ;;  %v3886_v1 = vpop.permute.xlu0 %1624 }
 0x472   :  { %v3888_v33 = vpop.permute.xlu1 %1628  ;;  %v3890_v54 = vpop.permute.xlu0 %1648 }
 0x476   :  { %v3892_v57 = vpop.permute.xlu1 %1604  ;;  %v1567_v19 = vpop.permute.xlu0 %1566 }
 0x477   :  { %v1571_v46 = vsel %vm103_vm0, %v1567_v19, %v1561_v0  ;;  %v1568_v18 = vsel %vm103_vm0, %v1565_v11, %v1567_v19  ;;  %v4430_v19 = vld [vmem:[#allocation6_spill] sm:$0xff] }
 0x478   :  { %v1572_v37 = vmul.f32 %v1571_v46, %v2238_v25  ;;  %v1575_v4 = vmul.f32 %v1568_v18, %v2260_v36 }
 0x47a   :  { %v3896_v42 = vpop.permute.xlu1 %1644  ;;  %v1583_v12 = vpop.permute.xlu0 %1582  ;;  %v1576_v56 = vpack.c.bf16 %v1572_v37, %v1572_v37  ;;  %v1579_v58 = vpack.c.bf16 %v1575_v4, %v1575_v4  ;;  %v4431_v37 = vld [vmem:[#allocation3_spill] sm:$0xff] }
 0x47b   :  { %v1590_v31 = vsel %vm147_vm2, %v3880_v43, %v1583_v12  ;;  %v1589_v6 = vsel %vm147_vm2, %v1583_v12, %v3884_v40  ;;  %v1621_v12 = vpack.c.bf16 %v3835_v35, %v3835_v35 }
 0x47c   :  { %v1593_v53 = vmul.f32 %v1590_v31, %v2248_v29  ;;  %v1594_v22 = vmul.f32 %v1589_v6, %v2279_v47  ;;  %v1620_v47 = vpack.c.bf16 %v3801_v62, %v3801_v62 }
 0x47e   :  { %v3909_v8 = vpop.permute.xlu1 %1668  ;;  %v1543_v34 = vpop.permute.xlu0 %1542  ;;  %v1597_v3 = vpack.c.bf16 %v1593_v53, %v1593_v53  ;;  %v1598_v31 = vpack.c.bf16 %v1594_v22, %v1594_v22  ;;  %v1708_v53 = vrot.slane %v1576_v56, 6 }
 0x47f   :  { %v1549_v27 = vsel %vm60_vm1, %v1543_v34, %v1545_v26  ;;  %v1550_v25 = vsel %vm60_vm1, %v1541_v60, %v1543_v34  ;;  %v1711_v34 = vrot.slane %v1579_v58, 6 }
 0x480   :  { %v1553_v4 = vmul.f32 %v1550_v25, %v4431_v37  ;;  %v3951_v37 = vrot.slane %v1598_v31, 4 }
 0x482   :  { %v3916_v36 = vpop.permute.xlu1 %1664  ;;  %v1547_v14 = vpop.permute.xlu0 %1546 }
 0x483   :  { %v1548_v29 = vsel %vm60_vm1, %v1545_v26, %v1547_v14  ;;  %v1551_v49 = vsel %vm60_vm1, %v1547_v14, %v1541_v60  ;;  %v4432_v26 = vld [vmem:[#allocation5_spill] sm:$0xff]  ;;  %v3936_v14 = vrot.slane %v1597_v3, 4 }
 0x484   :  { %v1552_v15 = vmul.f32 %v1551_v49, %v4429_v9  ;;  %v1555_v46 = vmul.f32 %v1548_v29, %v4430_v19  ;;  %v3932_v6 = vmul.f32 %v1549_v27, %v4432_v26  ;;  %v1557_v26 = vpack.c.bf16 %v1553_v4, %v1553_v4 }
 0x486   :  { %v1556_v29 = vpack.c.bf16 %v1552_v15, %v1552_v15  ;;  %v1607_v49 = vpop.permute.xlu0 %1606  ;;  %v1563_v9 = vpop.permute.xlu1 %1562  ;;  %v1559_v58 = vpack.c.bf16 %v1555_v46, %v1555_v46  ;;  %v1558_v18 = vpack.c.bf16 %v3932_v6, %v3932_v6 }
 0x487   :  { %v1608_v19 = vsel %vm191_vm3, %v3892_v57, %v1607_v49  ;;  %v1611_v22 = vsel %vm191_vm3, %v1607_v49, %v3882_v16  ;;  %v1569_v27 = vsel %vm103_vm0, %v1563_v9, %v1565_v11  ;;  %v1570_v56 = vsel %vm103_vm0, %v1561_v0, %v1563_v9 }
 0x488   :  { %v1612_v3 = vmul.f32 %v1611_v22, %v4334_v20  ;;  %v1615_v25 = vmul.f32 %v1608_v19, %v4336_v41  ;;  %v1573_v15 = vmul.f32 %v1570_v56, %v2232_v23  ;;  %v1574_v49 = vmul.f32 %v1569_v27, %v2264_v38 }
 0x489   :  { %v3957_v11 = vsel %vm455_vm4, %v1556_v29, %v1708_v53  ;;  %v1763_v29 = vsel %vm455_vm4, %v1559_v58, %v1711_v34 }
 0x48a   :  { %v1616_v60 = vpack.c.bf16 %v1612_v3, %v1612_v3  ;;  %v1619_v0 = vpack.c.bf16 %v1615_v25, %v1615_v25  ;;  %v1577_v46 = vpack.c.bf16 %v1573_v15, %v1573_v15  ;;  %v1627_v9 = vpop.permute.xlu0 %1626  ;;  %v1587_v20 = vpop.permute.xlu1 %1586  ;;  %v1578_v22 = vpack.c.bf16 %v1574_v49, %v1574_v49 }
 0x48b   :  { %v1633_v23 = vsel %vm239_vm7, %v1627_v9, %v3888_v33  ;;  %v1634_v41 = vsel %vm239_vm7, %v3886_v1, %v1627_v9  ;;  %v1588_v38 = vsel %vm147_vm2, %v3884_v40, %v1587_v20  ;;  %v1591_v56 = vsel %vm147_vm2, %v1587_v20, %v3880_v43 }
 0x48c   :  { %v3968_v31 = vrot.slane %v1616_v60, 2  ;;  %v1709_v4 = vrot.slane %v1577_v46, 6  ;;  %v1636_v53 = vmul.f32 %v1634_v41, %v4348_v52  ;;  %v1727_v19 = vrot.slane %v1619_v0, 2 }
 0x48d   :  { %v1637_v27 = vmul.f32 %v1633_v23, %v4354_v44  ;;  %v1595_v3 = vmul.f32 %v1588_v38, %v2282_v48  ;;  %v3977_v25 = vrot.slane %v1578_v22, 6  ;;  %v1592_v40 = vmul.f32 %v1591_v56, %v2267_v39 }
 0x48e   :  { %v1640_v15 = vpack.c.bf16 %v1636_v53, %v1636_v53  ;;  %v1667_v60 = vpop.permute.xlu0 %1666  ;;  %v1603_v49 = vpop.permute.xlu1 %1602  ;;  %v1757_v52 = vsel %vm455_vm4, %v1557_v26, %v1709_v4 }
 0x48f   :  { %v1641_v46 = vpack.c.bf16 %v1637_v27, %v1637_v27  ;;  %v1599_v34 = vpack.c.bf16 %v1595_v3, %v1595_v3  ;;  %v1673_v44 = vsel %vm327_vm9, %v1667_v60, %v3909_v8  ;;  %v1674_v43 = vsel %vm327_vm9, %v3916_v36, %v1667_v60  ;;  %v4433_v27 = vld [vmem:[#allocation8_spill] sm:$0xff] }
 0x490   :  { %v3987_v48 = vrot.slane %v1640_v15, 6  ;;  %v1596_v58 = vpack.c.bf16 %v1592_v40, %v1592_v40  ;;  %v1676_v0 = vmul.f32 %v1674_v43, %v4397_v30  ;;  %v1677_v39 = vmul.f32 %v1673_v44, %v4398_v21 }
 0x491   :  { %v3991_v9 = vrot.slane %v1641_v46, 6  ;;  %v1719_v26 = vrot.slane %v1599_v34, 4  ;;  %v1609_v20 = vsel %vm191_vm3, %v1603_v49, %v3892_v57  ;;  %v1610_v22 = vsel %vm191_vm3, %v3882_v16, %v1603_v49 }
 0x492   :  { %v1716_v23 = vrot.slane %v1596_v58, 4  ;;  %v1680_v41 = vpack.c.bf16 %v1676_v0, %v1676_v0  ;;  %v1681_v38 = vpack.c.bf16 %v1677_v39, %v1677_v39  ;;  %v1613_v4 = vmul.f32 %v1610_v22, %v2285_v50  ;;  %v1631_v53 = vpop.permute.xlu0 %1630  ;;  %v1647_v30 = vpop.permute.xlu1 %1646 }
 0x493   :  { %v1614_v21 = vmul.f32 %v1609_v20, %v4433_v27  ;;  %v1632_v56 = vsel %vm239_vm7, %v3888_v33, %v1631_v53  ;;  %v1635_v57 = vsel %vm239_vm7, %v1631_v53, %v3886_v1  ;;  %v1653_v16 = vsel %vm283_vm8, %v1647_v30, %v3890_v54 }
 0x494   :  { %v4010_v3 = vrot.slane %v1680_v41, 2  ;;  %v1749_v15 = vrot.slane %v1681_v38, 2  ;;  %v1617_v50 = vpack.c.bf16 %v1613_v4, %v1613_v4  ;;  %v1638_v40 = vmul.f32 %v1632_v56, %v4362_v51 }
 0x495   :  { %v1618_v60 = vpack.c.bf16 %v1614_v21, %v1614_v21  ;;  %v1639_v49 = vmul.f32 %v1635_v57, %v4366_v61  ;;  %v1654_v33 = vsel %vm283_vm8, %v3896_v42, %v1647_v30  ;;  %v1657_v46 = vmul.f32 %v1653_v16, %v4370_v28 }
 0x496   :  { %v1725_v1 = vrot.slane %v1617_v50, 2  ;;  %v1642_v34 = vpack.c.bf16 %v1638_v40, %v1638_v40  ;;  %v1656_v44 = vmul.f32 %v1654_v33, %v4367_v10  ;;  %v1771_v43 = vsel %vm468_vm5, %v1763_v29, %v1719_v26  ;;  %v1651_v58 = vpop.permute.xlu0 %1650  ;;  %v1671_v0 = vpop.permute.xlu1 %1670 }
 0x497   :  { %v1726_v39 = vrot.slane %v1618_v60, 2  ;;  %v1643_v20 = vpack.c.bf16 %v1639_v49, %v1639_v49  ;;  %v1661_v51 = vpack.c.bf16 %v1657_v46, %v1657_v46  ;;  %v1782_v22 = vsel %vm477_vm6, %v1771_v43, %v1727_v19 }
 0x498   :  { %v1734_v61 = vrot.slane %v1642_v34, 6  ;;  %v1660_v41 = vpack.c.bf16 %v1656_v44, %v1656_v44  ;;  %1878 = vmatprep.subr.bf16.mxu1 %v1782_v22  ;;  %v1652_v28 = vsel %vm283_vm8, %v3890_v54, %v1651_v58  ;;  %v1655_v10 = vsel %vm283_vm8, %v1651_v58, %v3896_v42 }
 0x499   :  { %v1735_v38 = vrot.slane %v1643_v20, 6  ;;  %v1741_v29 = vrot.slane %v1661_v51, 4  ;;  %v1658_v26 = vmul.f32 %v1652_v28, %v4373_v45  ;;  %v1659_v4 = vmul.f32 %v1655_v10, %v4375_v17 }
 0x49a   :  { %v1740_v53 = vrot.slane %v1660_v41, 4  ;;  %v1672_v19 = vsel %vm327_vm9, %v3909_v8, %v1671_v0  ;;  %v1675_v30 = vsel %vm327_vm9, %v1671_v0, %v3916_v36  ;;  %v1767_v54 = vsel %vm468_vm5, %v1757_v52, %v3936_v14  ;;  %v1685_v27 = vpop.permute.xlu0 %1684  ;;  %v1687_v42 = vpop.permute.xlu1 %1686 }
 0x49b   :  { %v1662_v21 = vpack.c.bf16 %v1658_v26, %v1658_v26  ;;  %v1663_v56 = vpack.c.bf16 %v1659_v4, %v1659_v4  ;;  %v1678_v45 = vmul.f32 %v1672_v19, %v4408_v7  ;;  %v1679_v17 = vmul.f32 %v1675_v30, %v4409_v63 }
 0x49c   :  { %v1776_v57 = vsel %vm477_vm6, %v1767_v54, %v1725_v1  ;;  %v1760_v8 = vsel %vm455_vm4, %v1558_v18, %v3977_v25  ;;  %v1765_v36 = vsel %vm468_vm5, %v3957_v11, %v1716_v23  ;;  %v1694_v14 = vsel %vm371_vm10, %v1685_v27, %v1687_v42 }
 0x49d   :  { %v1742_v52 = vrot.slane %v1662_v21, 4  ;;  %v1743_v16 = vrot.slane %v1663_v56, 4  ;;  %v1682_v50 = vpack.c.bf16 %v1678_v45, %v1678_v45  ;;  %v1683_v7 = vpack.c.bf16 %v1679_v17, %v1679_v17  ;;  %1837 = vmatprep.subr.bf16.mxu0 %v1776_v57 }
 0x49e   :  { %v1769_v63 = vsel %vm468_vm5, %v1760_v8, %v3951_v37  ;;  %v1773_v40 = vsel %vm477_vm6, %v1765_v36, %v3968_v31  ;;  %v1696_v6 = vmul.f32 %v1694_v14, %v4424_v59  ;;  %v1789_v18 = vsel %vm455_vm4, %v1621_v12, %v3991_v9  ;;  %v1689_v11 = vpop.permute.xlu0 %1688  ;;  %v1691_v25 = vpop.permute.xlu1 %1690 }
 0x49f   :  { %v1750_v23 = vrot.slane %v1682_v50, 2  ;;  %v1751_v60 = vrot.slane %v1683_v7, 2  ;;  %v1779_v49 = vsel %vm477_vm6, %v1769_v63, %v1726_v39  ;;  %1838 = vmatpush1.bf16.msra.mxu0 %v1773_v40  ;;  %v1799_v37 = vsel %vm468_vm5, %v1789_v18, %v1741_v29  ;;  %v1533_v39 = vld [vmem:[%s4130_s9] sm:$0x3] }
 0x4a0   :  { %1879 = vmatpush1.bf16.msra.mxu1 %v1779_v49  ;;  %v1700_v33 = vpack.c.bf16 %v1696_v6, %v1696_v6  ;;  %v1808_v31 = vsel %vm477_vm6, %v1799_v37, %v1749_v15  ;;  %v1786_v59 = vsel %vm455_vm4, %v1620_v47, %v3987_v48  ;;  %v1693_v35 = vsel %vm371_vm10, %v1687_v42, %v1689_v11 }
 0x4a1   :  { %1839 = vmatprep.subr.bf16.mxu0 %v1808_v31  ;;  %v1797_v12 = vsel %vm468_vm5, %v1786_v59, %v1740_v53  ;;  %v1697_v9 = vmul.f32 %v1693_v35, %v4421_v24  ;;  %v1692_v46 = vsel %vm371_vm10, %v1689_v11, %v1691_v25  ;;  %v1695_v15 = vsel %vm371_vm10, %v1691_v25, %v1685_v27 }
 0x4a2   :  { %v1805_v1 = vsel %vm477_vm6, %v1797_v12, %v4010_v3  ;;  %v1698_v62 = vmul.f32 %v1692_v46, %v4425_v32  ;;  %v1699_v47 = vmul.f32 %v1695_v15, %v4423_v5  ;;  %v4434_v48 = vpack.c.bf16 %v3827_v55, %v3827_v55 }
 0x4a3   :  { %1840 = vmatpush1.bf16.msra.mxu0 %v1805_v1  ;;  %v1701_v24 = vpack.c.bf16 %v1697_v9, %v1697_v9  ;;  %v1792_v43 = vsel %vm455_vm4, %v4435_v13, %v1734_v61  ;;  %v1826_v0 = vsel %vm455_vm4, %v1700_v33, 0 }
 0x4a4   :  { %v1795_v34 = vsel %vm455_vm4, %v4434_v48, %v1735_v38  ;;  %v1702_v58 = vpack.c.bf16 %v1698_v62, %v1698_v62  ;;  %v1703_v3 = vpack.c.bf16 %v1699_v47, %v1699_v47  ;;  %v1801_v5 = vsel %vm468_vm5, %v1792_v43, %v1742_v52 }
 0x4a5   :  { %v1803_v44 = vsel %vm468_vm5, %v1795_v34, %v1743_v16  ;;  %v1811_v55 = vsel %vm477_vm6, %v1801_v5, %v1750_v23  ;;  %1994 = vmatprep.subr.msk.bf16.mxu0 %vm455_vm4, %v1701_v24 }
 0x4a6   :  { %v1814_v32 = vsel %vm477_vm6, %v1803_v44, %v1751_v60  ;;  %v1832_v2 = vsel %vm455_vm4, %v1702_v58, 0 }
 0x4a7   :  { %1880 = vmatprep.subr.bf16.mxu1 %v1814_v32  ;;  %1842 = vmatpush1.bf16.msra.mxu0 %v1826_v0 }
 0x4a8   :  { %1881 = vmatpush1.bf16.msra.mxu1 %v1811_v55 }
 0x4a9   :  { %1996 = vmatprep.subr.msk.bf16.mxu1 %vm455_vm4, %v1703_v3 }
 0x4aa   :  { %1995 = vmatmul.mubr.msk.bf16.vlgmr.msra.gmra.mrb[12].mxu0 %vm560_vm11, %v1533_v39 }
 0x4ac   :  { %1883 = vmatpush1.bf16.msra.mxu1 %v1832_v2 }
 0x4af   :  { %1997 = vmatmul.mubr.msk.bf16.vlgmr.msra.gmra.mrb[12].mxu1 %vm560_vm11, %v1533_v39  ;;  %v1820_v20 = vpop.permute.xlu0 %1819 }
 0x57d   :  { %v1871_v51 = vpop.f32.mrb[12].mxu0 }
 0x57e   :  { %v1872_v22 = vadd.f32 %v1871_v51, %v1820_v20  ;;  %v1873_v61 = vpop.f32.mrb[13].mxu0 }
 0x57f   :  { %v1874_v41 = vadd.f32 %v1873_v61, %v1820_v20  ;;  %v1875_v28 = vpop.f32.mrb[14].mxu0 }
 0x580   :  { %v1929_v10 = vsel %vm468_vm5, %v1872_v22, 0.0  ;;  %v1939_v38 = vmul.f32 %v1872_v22, %v1872_v22  ;;  %v1876_v26 = vpop.f32.mrb[15].mxu0 }
 0x581   :  { %v1923_v53 = vcombine.low %v1872_v22, %v1874_v41  ;;  %v1930_v19 = vsel %vm468_vm5, %v1874_v41, 0.0  ;;  %v1940_v30 = vmul.f32 %v1874_v41, %v1874_v41 }
 0x582   :  { %v1912_v29 = vpop.f32.mrb[12].mxu1  ;;  %v1943_v27 = vsel %vm468_vm5, %v1939_v38, 0.0  ;;  %v1931_v42 = vadd.f32 %v1930_v19, %v1929_v10 }
 0x583   :  { %v1913_v4 = vadd.f32 %v1912_v29, %v1820_v20  ;;  %v1914_v54 = vpop.f32.mrb[13].mxu1  ;;  %1927 = vst [vmem:[%s4131_s11] sm:$0xff] %v1923_v53  ;;  %v1944_v57 = vsel %vm468_vm5, %v1940_v30, 0.0 }
 0x584   :  { %v1915_v21 = vadd.f32 %v1914_v54, %v1820_v20  ;;  %v1916_v56 = vpop.f32.mrb[14].mxu1  ;;  %v1945_v50 = vadd.f32 %v1944_v57, %v1943_v27 }
 0x585   :  { %v1932_v45 = vsel %vm468_vm5, %v1913_v4, 0.0  ;;  %v1941_v17 = vmul.f32 %v1913_v4, %v1913_v4  ;;  %v1917_v8 = vpop.f32.mrb[15].mxu1 }
 0x586   :  { %v1924_v36 = vcombine.low %v1913_v4, %v1915_v21  ;;  %v1942_v14 = vmul.f32 %v1915_v21, %v1915_v21  ;;  %v1933_v52 = vadd.f32 %v1932_v45, %v1931_v42  ;;  %v1934_v16 = vsel %vm468_vm5, %v1915_v21, 0.0 }
 0x587   :  { %v1946_v63 = vsel %vm468_vm5, %v1941_v17, 0.0 }
 0x588   :  { %1928 = vst [vmem:[%s4131_s11 + $0x8] sm:$0xff] %v1924_v36  ;;  %v1935_v7 = vadd.f32 %v1934_v16, %v1933_v52  ;;  %v1947_v40 = vadd.f32 %v1946_v63, %v1945_v50  ;;  %v1948_v6 = vsel %vm468_vm5, %v1942_v14, 0.0 }
 0x58a   :  { %1936 = vadd.xlane.f32.xlu1 %v1935_v7  ;;  %v1949_v18 = vadd.f32 %v1948_v6, %v1947_v40 }
 0x58c   :  { %1950 = vadd.xlane.f32.xlu0 %v1949_v18 }
 0x617   :  { %v1937_v11 = vpop.xlane.xlu1 %1936 }
 0x618   :  { %v1938_v25 = vmul.f32 0.001953125, %v1937_v11 }
 0x619   :  { %v1951_v60 = vpop.xlane.xlu0 %1950 }
 0x61a   :  { %v1953_v23 = vmul.f32 %v1938_v25, %v1938_v25  ;;  %v1952_v49 = vmul.f32 0.001953125, %v1951_v60  ;;  %v1959_v31 = vsub.f32 0.0, %v1938_v25 }
 0x61c   :  { %v1954_v37 = vsub.f32 %v1952_v49, %v1953_v23 }
 0x61e   :  { %v1955_v33 = vadd.f32 1e-05, %v1954_v37 }
 0x620   :  { %2029 = vrsqrt.f32 %v1955_v33 }
 0x62a   :  { %v2030_v59 = vpop.eup %2029 }
 0x62b   :  { %1958 = vst.msk [vmem:[%s4132_s12] sm:$0xf] %vm1957_vm15, %v2030_v59  ;;  %v1960_v35 = vmul.f32 %v2030_v59, %v1959_v31 }
 0x62d   :  { %1961 = vst.msk [vmem:[%s4133_s13] sm:$0xf] %vm1957_vm15, %v1960_v35 }

</bundles_post_ra>
